<compile_context>
chip_gen: v5e
topology: v5e:2x2
jax: 0.10.0
libtpu: 0.0.40
codegen_flags: <defaults>
</compile_context>

<pallas_src>
import functools
import random

import jax
import jax.numpy as jnp
from jax import lax
from jax.experimental import pallas as pl
from jax.experimental.pallas import tpu as pltpu


_VMEM = pl.BlockSpec(memory_space=pltpu.MemorySpace.VMEM)
_SMEM = pl.BlockSpec(memory_space=pltpu.MemorySpace.SMEM)


# ----------------------------------------------------------------------------
# In-kernel helpers
# ----------------------------------------------------------------------------
def _lstm_activations(gates, c_prev, H):
    """Gate order [i, f, o, g]: one wide sigmoid over 3H lanes + one tanh."""
    sig = jax.nn.sigmoid(gates[:, :3 * H])      # single EUP pass for i|f|o
    g_g = jnp.tanh(gates[:, 3 * H:])
    i_g = sig[:, 0 * H:1 * H]
    f_g = sig[:, 1 * H:2 * H]
    o_g = sig[:, 2 * H:3 * H]
    c_new = f_g * c_prev + i_g * g_g
    h_new = o_g * jnp.tanh(c_new)
    return h_new, c_new


# ----------------------------------------------------------------------------
# Fused Seq2Seq kernel (encoder + decoder + projection + teacher forcing)
# ----------------------------------------------------------------------------
def _seq2seq_kernel(tf_ref, x_ref, y_ref,
                    enc_wih_ref, enc_whh_ref, enc_b_ref,
                    dec_w_ref, dec_b_ref, wout_ref, bout_ref,
                    out_ref, xg_ref, hseq_ref, *, B):
    """One launch for the whole forward pass.

    tf:      (T_dec,) int32 in SMEM, teacher-forcing decisions.
    x:       (T_enc*B, D_enc) time-major, batch/feature-padded encoder input.
    y:       (T_dec*B, D_dec) time-major teacher inputs.
    enc_wih: (L, D_enc, 4H) (rows >= in_l zero); enc_whh: (L, H, 4H);
    enc_b:   (L, 1, 4H) = b_ih + b_hh.
    dec_w:   (L, D_dec+H, 4H) packed [W_ih ; W_hh]; dec_b: (L, 1, 4H).
    wout:    (H, D_dec) (cols >= output_size zero); bout: (1, D_dec).
    out:     (B, T_dec*D_dec) lane-dense; step-0 block stays zero (PyTorch).
    Scratch: xg (T_enc*B, 4H), hseq (T_enc*B, D_enc).
    Gate column order everywhere is [i, f, o, g].
    """
    L, D_enc, G = enc_wih_ref.shape
    H = G // 4
    T_enc = x_ref.shape[0] // B
    T_dec = tf_ref.shape[0]
    D_dec = dec_w_ref.shape[1] - H
    f32 = jnp.float32

    # -------------------------- Encoder (layer-major) -----------------------
    # Per layer: hoist the whole-sequence input projection into one big
    # (T*B, D) x (D, 4H) matmul; only h @ W_hh + elementwise stay serial.
    hseq_ref[...] = jnp.zeros_like(hseq_ref)    # keeps D_enc > H pad cols inert

    enc_h, enc_c = [], []
    for l in range(L):
        src_ref = x_ref if l == 0 else hseq_ref
        xg_ref[...] = (jnp.dot(src_ref[...], enc_wih_ref[l],
                               preferred_element_type=f32)
                       + enc_b_ref[l])
        w_hh = enc_whh_ref[l]                   # (H, 4H), loaded once per layer

        def enc_step(t, carry, w_hh=w_hh):
            h, c = carry
            idx = pl.multiple_of(t * B, 8)
            gates = xg_ref[pl.ds(idx, B), :] + jnp.dot(
                h, w_hh, preferred_element_type=f32)
            h, c = _lstm_activations(gates, c, H)
            if D_enc == H:
                hseq_ref[pl.ds(idx, B), :] = h      # feeds next layer
            else:
                hseq_ref[pl.ds(idx, B), :H] = h
            return h, c

        zeros = jnp.zeros((B, H), f32)
        h, c = lax.fori_loop(0, T_enc, enc_step, (zeros, zeros), unroll=True)
        enc_h.append(h)
        enc_c.append(c)

    # -------------------------- Decoder (step-wise) --------------------------
    out_ref[...] = jnp.zeros_like(out_ref)      # outputs[0] stays zero

    dec_ws = [dec_w_ref[l] for l in range(L)]   # one (D+H,4H) load per layer
    dec_bs = [dec_b_ref[l] for l in range(L)]
    w_out = wout_ref[...]
    b_out = bout_ref[...]
    pad = jnp.zeros((B, D_dec - H), f32) if D_dec > H else None  # hoisted

    hs, cs = list(enc_h), list(enc_c)           # states never leave the chip
    inp = y_ref[pl.ds(0, B), :]                 # y[:, 0, :] (padded)

    for t in range(1, T_dec):
        for l in range(L):
            if l == 0:
                x_l = inp
            elif D_dec == H:
                x_l = hs[l - 1]
            else:
                x_l = jnp.concatenate([hs[l - 1], pad], axis=1)
            xh = jnp.concatenate([x_l, hs[l]], axis=1)          # (B, D_dec+H)
            gates = (jnp.dot(xh, dec_ws[l], preferred_element_type=f32)
                     + dec_bs[l])
            hs[l], cs[l] = _lstm_activations(gates, cs[l], H)
        pred = jnp.dot(hs[-1], w_out, preferred_element_type=f32) + b_out
        out_ref[:, t * D_dec:(t + 1) * D_dec] = pred            # lane-dense slab
        teacher_force = tf_ref[t] != 0
        inp = jnp.where(teacher_force, y_ref[pl.ds(t * B, B), :], pred)


# ----------------------------------------------------------------------------
# Parameter construction (PyTorch-style U(-1/sqrt(H), 1/sqrt(H)), pre-packed)
# ----------------------------------------------------------------------------
def _uniform(key, shape, bound):
    return jax.random.uniform(key, shape, jnp.float32, -bound, bound)


def make_encoder_params(key, in0, hidden, num_layers):
    """Encoder weights for the hoisted-input formulation.

    enc_wih: (L, D, 4H) with rows [0:in_l] = W_ih, rest zero (D = max(in0, H)).
    enc_whh: (L, H, 4H); enc_b: (L, 1, 4H) = b_ih + b_hh.
    Gate column order is [i, f, o, g].
    """
    bound = 1.0 / (hidden ** 0.5)
    D = max(in0, hidden)
    wih, whh, bs = [], [], []
    for layer in range(num_layers):
        in_l = in0 if layer == 0 else hidden
        k1, k2, k3, k4, key = jax.random.split(key, 5)
        w_ih = jnp.zeros((D, 4 * hidden), jnp.float32).at[:in_l, :].set(
            _uniform(k1, (in_l, 4 * hidden), bound))
        w_hh = _uniform(k2, (hidden, 4 * hidden), bound)
        b = (_uniform(k3, (1, 4 * hidden), bound)
             + _uniform(k4, (1, 4 * hidden), bound))
        wih.append(w_ih)
        whh.append(w_hh)
        bs.append(b)
    return jnp.stack(wih), jnp.stack(whh), jnp.stack(bs), key


def make_decoder_lstm_params(key, in0, hidden, num_layers):
    """Packed decoder weights: (L, D+H, 4H), rows [0:in_l] = W_ih,
    rows [D:D+H] = W_hh (D = max(in0, hidden)); bias (L, 1, 4H)."""
    bound = 1.0 / (hidden ** 0.5)
    D = max(in0, hidden)
    ws, bs = [], []
    for layer in range(num_layers):
        in_l = in0 if layer == 0 else hidden
        k1, k2, k3, k4, key = jax.random.split(key, 5)
        w = jnp.zeros((D + hidden, 4 * hidden), jnp.float32)
        w = w.at[:in_l, :].set(_uniform(k1, (in_l, 4 * hidden), bound))
        w = w.at[D:, :].set(_uniform(k2, (hidden, 4 * hidden), bound))
        b = (_uniform(k3, (1, 4 * hidden), bound)
             + _uniform(k4, (1, 4 * hidden), bound))
        ws.append(w)
        bs.append(b)
    return jnp.stack(ws), jnp.stack(bs), key


def make_output_proj_params(key, hidden, out_size, d_pad):
    bound = 1.0 / (hidden ** 0.5)
    k1, k2, key = jax.random.split(key, 3)
    w = _uniform(k1, (hidden, out_size), bound)
    b = _uniform(k2, (1, out_size), bound)
    w_pad = jnp.zeros((hidden, d_pad), jnp.float32).at[:, :out_size].set(w)
    b_pad = jnp.zeros((1, d_pad), jnp.float32).at[:, :out_size].set(b)
    return w_pad, b_pad, key


# ----------------------------------------------------------------------------
# Forward (mirrors Seq2Seq.forward)
# ----------------------------------------------------------------------------
@jax.jit
def seq2seq_forward(x, y, tf_mask, params):
    """x: (B, T_in, input_size); y: (B, seq_len, output_size);
    tf_mask: (seq_len,) int32 pre-sampled teacher-forcing decisions.
    Returns (seq_len, B, output_size)."""
    # TODO(synk): inter-layer dropout (p=0.5, training mode) omitted — eval semantics.
    enc_wih, enc_whh, enc_b, dec_w, dec_b, w_out, b_out = params
    B, T_in, in_size = x.shape
    _, T_dec, out_size = y.shape
    H = enc_whh.shape[1]
    D_enc = enc_wih.shape[1]
    D_dec = dec_w.shape[1] - H
    B_pad = max(8, -(-B // 8) * 8)              # fill f32 sublanes

    # Time-major, batch- and feature-padded, flattened to (T*B_pad, F).
    xp = jnp.zeros((T_in, B_pad, D_enc), jnp.float32)
    xp = xp.at[:, :B, :in_size].set(jnp.transpose(x, (1, 0, 2)))
    xp = xp.reshape(T_in * B_pad, D_enc)
    yp = jnp.zeros((T_dec, B_pad, D_dec), jnp.float32)
    yp = yp.at[:, :B, :out_size].set(jnp.transpose(y, (1, 0, 2)))
    yp = yp.reshape(T_dec * B_pad, D_dec)

    out_pad = pl.pallas_call(
        functools.partial(_seq2seq_kernel, B=B_pad),
        out_shape=jax.ShapeDtypeStruct((B_pad, T_dec * D_dec), jnp.float32),
        in_specs=[_SMEM] + [_VMEM] * 9,
        out_specs=_VMEM,
        scratch_shapes=[
            pltpu.VMEM((T_in * B_pad, 4 * H), jnp.float32),   # xg: hoisted X@W_ih
            pltpu.VMEM((T_in * B_pad, D_enc), jnp.float32),   # per-layer h sequence
        ],
    )(tf_mask, xp, yp, enc_wih, enc_whh, enc_b, dec_w, dec_b, w_out, b_out)

    out = jnp.transpose(out_pad.reshape(B_pad, T_dec, D_dec), (1, 0, 2))
    return out[:, :B, :out_size]


# ----------------------------------------------------------------------------
# Main
# ----------------------------------------------------------------------------
if __name__ == "__main__":
    batch = 2
    input_size = 8
    output_size = 8
    hidden_size = 32
    num_layers = 2
    enc_seq_len = 10
    seq_len = 8
    teacher_forcing_ratio = 0.5

    random.seed(0)  # deterministic teacher-forcing schedule
    key = jax.random.PRNGKey(0)

    enc_wih, enc_whh, enc_b, key = make_encoder_params(
        key, input_size, hidden_size, num_layers)
    dec_w, dec_b, key = make_decoder_lstm_params(
        key, output_size, hidden_size, num_layers)
    d_dec = max(output_size, hidden_size)
    w_out, b_out, key = make_output_proj_params(
        key, hidden_size, output_size, d_dec)
    params = (enc_wih, enc_whh, enc_b, dec_w, dec_b, w_out, b_out)

    kx, ky = jax.random.split(key)
    x = jax.random.normal(kx, (batch, enc_seq_len, input_size), jnp.float32)
    y = jax.random.normal(ky, (batch, seq_len, output_size), jnp.float32)

    # Pre-sample teacher-forcing decisions: one random.random() per decoder
    # step t=1..seq_len-1, same call order as the PyTorch loop.
    tf = [0] * seq_len
    for t in range(1, seq_len):
        tf[t] = 1 if random.random() < teacher_forcing_ratio else 0
    tf_mask = jnp.asarray(tf, jnp.int32)

    out = seq2seq_forward(x, y, tf_mask, params)
    out = jax.block_until_ready(out)

    assert out.shape == (seq_len, batch, output_size)
    assert bool(jnp.all(jnp.isfinite(out)))
    print("KERNEL_OK")
</pallas_src>

<mosaic_0001>
module attributes {stable_mosaic.version = 11 : i64} {
  func.func @_seq2seq_kernel(%arg0: memref<8xi32, #tpu.memory_space<smem>>, %arg1: memref<80x32xf32, #tpu.memory_space<vmem>>, %arg2: memref<64x32xf32, #tpu.memory_space<vmem>>, %arg3: memref<2x32x128xf32, #tpu.memory_space<vmem>>, %arg4: memref<2x32x128xf32, #tpu.memory_space<vmem>>, %arg5: memref<2x1x128xf32, #tpu.memory_space<vmem>>, %arg6: memref<2x64x128xf32, #tpu.memory_space<vmem>>, %arg7: memref<2x1x128xf32, #tpu.memory_space<vmem>>, %arg8: memref<32x32xf32, #tpu.memory_space<vmem>>, %arg9: memref<1x32xf32, #tpu.memory_space<vmem>>, %arg10: memref<8x256xf32, #tpu.memory_space<vmem>>, %arg11: memref<80x128xf32, #tpu.memory_space<vmem>>, %arg12: memref<80x32xf32, #tpu.memory_space<vmem>>) attributes {dimension_semantics = [], scalar_prefetch = 0 : i64, scratch_operands = 2 : i64, tpu.core_type = #tpu.core_type<tc>} {
    %cst = arith.constant 0.000000e+00 : f32
    %0 = vector.broadcast %cst : f32 to vector<80x32xf32>
    %c0 = arith.constant 0 : index
    %c0_0 = arith.constant 0 : index
    %1 = vector.load %arg12[%c0, %c0_0] : memref<80x32xf32, #tpu.memory_space<vmem>>, vector<80x32xf32>
    tpu.vector_store %arg12[%c0, %c0_0], %0 {strides = array<i32>} : memref<80x32xf32, #tpu.memory_space<vmem>>, vector<80x32xf32>,
    %c0_1 = arith.constant 0 : index
    %c0_2 = arith.constant 0 : index
    %2 = vector.load %arg1[%c0_1, %c0_2] : memref<80x32xf32, #tpu.memory_space<vmem>>, vector<80x32xf32>
    %c0_3 = arith.constant 0 : index
    %c0_4 = arith.constant 0 : index
    %c0_5 = arith.constant 0 : index
    %3 = vector.load %arg3[%c0_3, %c0_4, %c0_5] : memref<2x32x128xf32, #tpu.memory_space<vmem>>, vector<1x32x128xf32>
    %4 = vector.shape_cast %3 : vector<1x32x128xf32> to vector<32x128xf32>
    %cst_6 = arith.constant dense<0.000000e+00> : vector<80x128xf32>
    %5 = tpu.matmul %2, %4, %cst_6 {dimension_numbers = #tpu.dot_dimension_numbers<[1], [0], [0], [1], [0, 0, 1, 1], [], []>} : vector<80x32xf32>, vector<32x128xf32>, vector<80x128xf32> -> vector<80x128xf32>
    %c0_7 = arith.constant 0 : index
    %c0_8 = arith.constant 0 : index
    %c0_9 = arith.constant 0 : index
    %6 = vector.load %arg5[%c0_7, %c0_8, %c0_9] : memref<2x1x128xf32, #tpu.memory_space<vmem>>, vector<1x1x128xf32>
    %7 = vector.shape_cast %6 : vector<1x1x128xf32> to vector<1x128xf32>
    %8 = vector.broadcast %7 : vector<1x128xf32> to vector<80x128xf32>
    %9 = arith.addf %5, %8 : vector<80x128xf32>
    %c0_10 = arith.constant 0 : index
    %c0_11 = arith.constant 0 : index
    %10 = vector.load %arg11[%c0_10, %c0_11] : memref<80x128xf32, #tpu.memory_space<vmem>>, vector<80x128xf32>
    tpu.vector_store %arg11[%c0_10, %c0_11], %9 {strides = array<i32>} : memref<80x128xf32, #tpu.memory_space<vmem>>, vector<80x128xf32>,
    %c0_12 = arith.constant 0 : index
    %c0_13 = arith.constant 0 : index
    %c0_14 = arith.constant 0 : index
    %11 = vector.load %arg4[%c0_12, %c0_13, %c0_14] : memref<2x32x128xf32, #tpu.memory_space<vmem>>, vector<1x32x128xf32>
    %12 = vector.shape_cast %11 : vector<1x32x128xf32> to vector<32x128xf32>
    %cst_15 = arith.constant 0.000000e+00 : f32
    %13 = vector.broadcast %cst_15 : f32 to vector<8x32xf32>
    %c0_i32 = arith.constant 0 : i32
    %c8_i32 = arith.constant 8 : i32
    %14 = arith.muli %c0_i32, %c8_i32 : i32
    %15 = tpu.assume_multiple %14, 8 : i32
    %16 = arith.index_cast %15 : i32 to index
    %c0_16 = arith.constant 0 : index
    %17 = vector.load %arg11[%16, %c0_16] : memref<80x128xf32, #tpu.memory_space<vmem>>, vector<8x128xf32>
    %cst_17 = arith.constant dense<0.000000e+00> : vector<8x128xf32>
    %18 = tpu.matmul %13, %12, %cst_17 {dimension_numbers = #tpu.dot_dimension_numbers<[1], [0], [0], [1], [0, 0, 1, 1], [], []>} : vector<8x32xf32>, vector<32x128xf32>, vector<8x128xf32> -> vector<8x128xf32>
    %19 = arith.addf %17, %18 : vector<8x128xf32>
    %20 = vector.extract_strided_slice %19 {offsets = [0, 0], sizes = [8, 96], strides = [1, 1]} : vector<8x128xf32> to vector<8x96xf32>
    %21 = arith.negf %20 : vector<8x96xf32>
    %22 = math.exp %21 : vector<8x96xf32>
    %cst_18 = arith.constant 1.000000e+00 : f32
    %23 = vector.broadcast %cst_18 : f32 to vector<8x96xf32>
    %24 = arith.addf %23, %22 : vector<8x96xf32>
    %25 = arith.divf %23, %24 : vector<8x96xf32>
    %26 = vector.extract_strided_slice %19 {offsets = [0, 96], sizes = [8, 32], strides = [1, 1]} : vector<8x128xf32> to vector<8x32xf32>
    %27 = math.tanh %26 : vector<8x32xf32>
    %28 = vector.extract_strided_slice %25 {offsets = [0, 0], sizes = [8, 32], strides = [1, 1]} : vector<8x96xf32> to vector<8x32xf32>
    %29 = vector.extract_strided_slice %25 {offsets = [0, 32], sizes = [8, 32], strides = [1, 1]} : vector<8x96xf32> to vector<8x32xf32>
    %30 = vector.extract_strided_slice %25 {offsets = [0, 64], sizes = [8, 32], strides = [1, 1]} : vector<8x96xf32> to vector<8x32xf32>
    %31 = arith.mulf %29, %13 : vector<8x32xf32>
    %32 = arith.mulf %28, %27 : vector<8x32xf32>
    %33 = arith.addf %31, %32 : vector<8x32xf32>
    %34 = math.tanh %33 : vector<8x32xf32>
    %35 = arith.mulf %30, %34 : vector<8x32xf32>
    %36 = arith.index_cast %15 : i32 to index
    %c0_19 = arith.constant 0 : index
    %37 = vector.load %arg12[%36, %c0_19] : memref<80x32xf32, #tpu.memory_space<vmem>>, vector<8x32xf32>
    tpu.vector_store %arg12[%36, %c0_19], %35 {strides = array<i32>} : memref<80x32xf32, #tpu.memory_space<vmem>>, vector<8x32xf32>,
    %c1_i32 = arith.constant 1 : i32
    %c8_i32_20 = arith.constant 8 : i32
    %38 = arith.muli %c1_i32, %c8_i32_20 : i32
    %39 = tpu.assume_multiple %38, 8 : i32
    %40 = arith.index_cast %39 : i32 to index
    %c0_21 = arith.constant 0 : index
    %41 = vector.load %arg11[%40, %c0_21] : memref<80x128xf32, #tpu.memory_space<vmem>>, vector<8x128xf32>
    %cst_22 = arith.constant dense<0.000000e+00> : vector<8x128xf32>
    %42 = tpu.matmul %35, %12, %cst_22 {dimension_numbers = #tpu.dot_dimension_numbers<[1], [0], [0], [1], [0, 0, 1, 1], [], []>} : vector<8x32xf32>, vector<32x128xf32>, vector<8x128xf32> -> vector<8x128xf32>
    %43 = arith.addf %41, %42 : vector<8x128xf32>
    %44 = vector.extract_strided_slice %43 {offsets = [0, 0], sizes = [8, 96], strides = [1, 1]} : vector<8x128xf32> to vector<8x96xf32>
    %45 = arith.negf %44 : vector<8x96xf32>
    %46 = math.exp %45 : vector<8x96xf32>
    %cst_23 = arith.constant 1.000000e+00 : f32
    %47 = vector.broadcast %cst_23 : f32 to vector<8x96xf32>
    %48 = arith.addf %47, %46 : vector<8x96xf32>
    %49 = arith.divf %47, %48 : vector<8x96xf32>
    %50 = vector.extract_strided_slice %43 {offsets = [0, 96], sizes = [8, 32], strides = [1, 1]} : vector<8x128xf32> to vector<8x32xf32>
    %51 = math.tanh %50 : vector<8x32xf32>
    %52 = vector.extract_strided_slice %49 {offsets = [0, 0], sizes = [8, 32], strides = [1, 1]} : vector<8x96xf32> to vector<8x32xf32>
    %53 = vector.extract_strided_slice %49 {offsets = [0, 32], sizes = [8, 32], strides = [1, 1]} : vector<8x96xf32> to vector<8x32xf32>
    %54 = vector.extract_strided_slice %49 {offsets = [0, 64], sizes = [8, 32], strides = [1, 1]} : vector<8x96xf32> to vector<8x32xf32>
    %55 = arith.mulf %53, %33 : vector<8x32xf32>
    %56 = arith.mulf %52, %51 : vector<8x32xf32>
    %57 = arith.addf %55, %56 : vector<8x32xf32>
    %58 = math.tanh %57 : vector<8x32xf32>
    %59 = arith.mulf %54, %58 : vector<8x32xf32>
    %60 = arith.index_cast %39 : i32 to index
    %c0_24 = arith.constant 0 : index
    %61 = vector.load %arg12[%60, %c0_24] : memref<80x32xf32, #tpu.memory_space<vmem>>, vector<8x32xf32>
    tpu.vector_store %arg12[%60, %c0_24], %59 {strides = array<i32>} : memref<80x32xf32, #tpu.memory_space<vmem>>, vector<8x32xf32>,
    %c2_i32 = arith.constant 2 : i32
    %c8_i32_25 = arith.constant 8 : i32
    %62 = arith.muli %c2_i32, %c8_i32_25 : i32
    %63 = tpu.assume_multiple %62, 8 : i32
    %64 = arith.index_cast %63 : i32 to index
    %c0_26 = arith.constant 0 : index
    %65 = vector.load %arg11[%64, %c0_26] : memref<80x128xf32, #tpu.memory_space<vmem>>, vector<8x128xf32>
    %cst_27 = arith.constant dense<0.000000e+00> : vector<8x128xf32>
    %66 = tpu.matmul %59, %12, %cst_27 {dimension_numbers = #tpu.dot_dimension_numbers<[1], [0], [0], [1], [0, 0, 1, 1], [], []>} : vector<8x32xf32>, vector<32x128xf32>, vector<8x128xf32> -> vector<8x128xf32>
    %67 = arith.addf %65, %66 : vector<8x128xf32>
    %68 = vector.extract_strided_slice %67 {offsets = [0, 0], sizes = [8, 96], strides = [1, 1]} : vector<8x128xf32> to vector<8x96xf32>
    %69 = arith.negf %68 : vector<8x96xf32>
    %70 = math.exp %69 : vector<8x96xf32>
    %cst_28 = arith.constant 1.000000e+00 : f32
    %71 = vector.broadcast %cst_28 : f32 to vector<8x96xf32>
    %72 = arith.addf %71, %70 : vector<8x96xf32>
    %73 = arith.divf %71, %72 : vector<8x96xf32>
    %74 = vector.extract_strided_slice %67 {offsets = [0, 96], sizes = [8, 32], strides = [1, 1]} : vector<8x128xf32> to vector<8x32xf32>
    %75 = math.tanh %74 : vector<8x32xf32>
    %76 = vector.extract_strided_slice %73 {offsets = [0, 0], sizes = [8, 32], strides = [1, 1]} : vector<8x96xf32> to vector<8x32xf32>
    %77 = vector.extract_strided_slice %73 {offsets = [0, 32], sizes = [8, 32], strides = [1, 1]} : vector<8x96xf32> to vector<8x32xf32>
    %78 = vector.extract_strided_slice %73 {offsets = [0, 64], sizes = [8, 32], strides = [1, 1]} : vector<8x96xf32> to vector<8x32xf32>
    %79 = arith.mulf %77, %57 : vector<8x32xf32>
    %80 = arith.mulf %76, %75 : vector<8x32xf32>
    %81 = arith.addf %79, %80 : vector<8x32xf32>
    %82 = math.tanh %81 : vector<8x32xf32>
    %83 = arith.mulf %78, %82 : vector<8x32xf32>
    %84 = arith.index_cast %63 : i32 to index
    %c0_29 = arith.constant 0 : index
    %85 = vector.load %arg12[%84, %c0_29] : memref<80x32xf32, #tpu.memory_space<vmem>>, vector<8x32xf32>
    tpu.vector_store %arg12[%84, %c0_29], %83 {strides = array<i32>} : memref<80x32xf32, #tpu.memory_space<vmem>>, vector<8x32xf32>,
    %c3_i32 = arith.constant 3 : i32
    %c8_i32_30 = arith.constant 8 : i32
    %86 = arith.muli %c3_i32, %c8_i32_30 : i32
    %87 = tpu.assume_multiple %86, 8 : i32
    %88 = arith.index_cast %87 : i32 to index
    %c0_31 = arith.constant 0 : index
    %89 = vector.load %arg11[%88, %c0_31] : memref<80x128xf32, #tpu.memory_space<vmem>>, vector<8x128xf32>
    %cst_32 = arith.constant dense<0.000000e+00> : vector<8x128xf32>
    %90 = tpu.matmul %83, %12, %cst_32 {dimension_numbers = #tpu.dot_dimension_numbers<[1], [0], [0], [1], [0, 0, 1, 1], [], []>} : vector<8x32xf32>, vector<32x128xf32>, vector<8x128xf32> -> vector<8x128xf32>
    %91 = arith.addf %89, %90 : vector<8x128xf32>
    %92 = vector.extract_strided_slice %91 {offsets = [0, 0], sizes = [8, 96], strides = [1, 1]} : vector<8x128xf32> to vector<8x96xf32>
    %93 = arith.negf %92 : vector<8x96xf32>
    %94 = math.exp %93 : vector<8x96xf32>
    %cst_33 = arith.constant 1.000000e+00 : f32
    %95 = vector.broadcast %cst_33 : f32 to vector<8x96xf32>
    %96 = arith.addf %95, %94 : vector<8x96xf32>
    %97 = arith.divf %95, %96 : vector<8x96xf32>
    %98 = vector.extract_strided_slice %91 {offsets = [0, 96], sizes = [8, 32], strides = [1, 1]} : vector<8x128xf32> to vector<8x32xf32>
    %99 = math.tanh %98 : vector<8x32xf32>
    %100 = vector.extract_strided_slice %97 {offsets = [0, 0], sizes = [8, 32], strides = [1, 1]} : vector<8x96xf32> to vector<8x32xf32>
    %101 = vector.extract_strided_slice %97 {offsets = [0, 32], sizes = [8, 32], strides = [1, 1]} : vector<8x96xf32> to vector<8x32xf32>
    %102 = vector.extract_strided_slice %97 {offsets = [0, 64], sizes = [8, 32], strides = [1, 1]} : vector<8x96xf32> to vector<8x32xf32>
    %103 = arith.mulf %101, %81 : vector<8x32xf32>
    %104 = arith.mulf %100, %99 : vector<8x32xf32>
    %105 = arith.addf %103, %104 : vector<8x32xf32>
    %106 = math.tanh %105 : vector<8x32xf32>
    %107 = arith.mulf %102, %106 : vector<8x32xf32>
    %108 = arith.index_cast %87 : i32 to index
    %c0_34 = arith.constant 0 : index
    %109 = vector.load %arg12[%108, %c0_34] : memref<80x32xf32, #tpu.memory_space<vmem>>, vector<8x32xf32>
    tpu.vector_store %arg12[%108, %c0_34], %107 {strides = array<i32>} : memref<80x32xf32, #tpu.memory_space<vmem>>, vector<8x32xf32>,
    %c4_i32 = arith.constant 4 : i32
    %c8_i32_35 = arith.constant 8 : i32
    %110 = arith.muli %c4_i32, %c8_i32_35 : i32
    %111 = tpu.assume_multiple %110, 8 : i32
    %112 = arith.index_cast %111 : i32 to index
    %c0_36 = arith.constant 0 : index
    %113 = vector.load %arg11[%112, %c0_36] : memref<80x128xf32, #tpu.memory_space<vmem>>, vector<8x128xf32>
    %cst_37 = arith.constant dense<0.000000e+00> : vector<8x128xf32>
    %114 = tpu.matmul %107, %12, %cst_37 {dimension_numbers = #tpu.dot_dimension_numbers<[1], [0], [0], [1], [0, 0, 1, 1], [], []>} : vector<8x32xf32>, vector<32x128xf32>, vector<8x128xf32> -> vector<8x128xf32>
    %115 = arith.addf %113, %114 : vector<8x128xf32>
    %116 = vector.extract_strided_slice %115 {offsets = [0, 0], sizes = [8, 96], strides = [1, 1]} : vector<8x128xf32> to vector<8x96xf32>
    %117 = arith.negf %116 : vector<8x96xf32>
    %118 = math.exp %117 : vector<8x96xf32>
    %cst_38 = arith.constant 1.000000e+00 : f32
    %119 = vector.broadcast %cst_38 : f32 to vector<8x96xf32>
    %120 = arith.addf %119, %118 : vector<8x96xf32>
    %121 = arith.divf %119, %120 : vector<8x96xf32>
    %122 = vector.extract_strided_slice %115 {offsets = [0, 96], sizes = [8, 32], strides = [1, 1]} : vector<8x128xf32> to vector<8x32xf32>
    %123 = math.tanh %122 : vector<8x32xf32>
    %124 = vector.extract_strided_slice %121 {offsets = [0, 0], sizes = [8, 32], strides = [1, 1]} : vector<8x96xf32> to vector<8x32xf32>
    %125 = vector.extract_strided_slice %121 {offsets = [0, 32], sizes = [8, 32], strides = [1, 1]} : vector<8x96xf32> to vector<8x32xf32>
    %126 = vector.extract_strided_slice %121 {offsets = [0, 64], sizes = [8, 32], strides = [1, 1]} : vector<8x96xf32> to vector<8x32xf32>
    %127 = arith.mulf %125, %105 : vector<8x32xf32>
    %128 = arith.mulf %124, %123 : vector<8x32xf32>
    %129 = arith.addf %127, %128 : vector<8x32xf32>
    %130 = math.tanh %129 : vector<8x32xf32>
    %131 = arith.mulf %126, %130 : vector<8x32xf32>
    %132 = arith.index_cast %111 : i32 to index
    %c0_39 = arith.constant 0 : index
    %133 = vector.load %arg12[%132, %c0_39] : memref<80x32xf32, #tpu.memory_space<vmem>>, vector<8x32xf32>
    tpu.vector_store %arg12[%132, %c0_39], %131 {strides = array<i32>} : memref<80x32xf32, #tpu.memory_space<vmem>>, vector<8x32xf32>,
    %c5_i32 = arith.constant 5 : i32
    %c8_i32_40 = arith.constant 8 : i32
    %134 = arith.muli %c5_i32, %c8_i32_40 : i32
    %135 = tpu.assume_multiple %134, 8 : i32
    %136 = arith.index_cast %135 : i32 to index
    %c0_41 = arith.constant 0 : index
    %137 = vector.load %arg11[%136, %c0_41] : memref<80x128xf32, #tpu.memory_space<vmem>>, vector<8x128xf32>
    %cst_42 = arith.constant dense<0.000000e+00> : vector<8x128xf32>
    %138 = tpu.matmul %131, %12, %cst_42 {dimension_numbers = #tpu.dot_dimension_numbers<[1], [0], [0], [1], [0, 0, 1, 1], [], []>} : vector<8x32xf32>, vector<32x128xf32>, vector<8x128xf32> -> vector<8x128xf32>
    %139 = arith.addf %137, %138 : vector<8x128xf32>
    %140 = vector.extract_strided_slice %139 {offsets = [0, 0], sizes = [8, 96], strides = [1, 1]} : vector<8x128xf32> to vector<8x96xf32>
    %141 = arith.negf %140 : vector<8x96xf32>
    %142 = math.exp %141 : vector<8x96xf32>
    %cst_43 = arith.constant 1.000000e+00 : f32
    %143 = vector.broadcast %cst_43 : f32 to vector<8x96xf32>
    %144 = arith.addf %143, %142 : vector<8x96xf32>
    %145 = arith.divf %143, %144 : vector<8x96xf32>
    %146 = vector.extract_strided_slice %139 {offsets = [0, 96], sizes = [8, 32], strides = [1, 1]} : vector<8x128xf32> to vector<8x32xf32>
    %147 = math.tanh %146 : vector<8x32xf32>
    %148 = vector.extract_strided_slice %145 {offsets = [0, 0], sizes = [8, 32], strides = [1, 1]} : vector<8x96xf32> to vector<8x32xf32>
    %149 = vector.extract_strided_slice %145 {offsets = [0, 32], sizes = [8, 32], strides = [1, 1]} : vector<8x96xf32> to vector<8x32xf32>
    %150 = vector.extract_strided_slice %145 {offsets = [0, 64], sizes = [8, 32], strides = [1, 1]} : vector<8x96xf32> to vector<8x32xf32>
    %151 = arith.mulf %149, %129 : vector<8x32xf32>
    %152 = arith.mulf %148, %147 : vector<8x32xf32>
    %153 = arith.addf %151, %152 : vector<8x32xf32>
    %154 = math.tanh %153 : vector<8x32xf32>
    %155 = arith.mulf %150, %154 : vector<8x32xf32>
    %156 = arith.index_cast %135 : i32 to index
    %c0_44 = arith.constant 0 : index
    %157 = vector.load %arg12[%156, %c0_44] : memref<80x32xf32, #tpu.memory_space<vmem>>, vector<8x32xf32>
    tpu.vector_store %arg12[%156, %c0_44], %155 {strides = array<i32>} : memref<80x32xf32, #tpu.memory_space<vmem>>, vector<8x32xf32>,
    %c6_i32 = arith.constant 6 : i32
    %c8_i32_45 = arith.constant 8 : i32
    %158 = arith.muli %c6_i32, %c8_i32_45 : i32
    %159 = tpu.assume_multiple %158, 8 : i32
    %160 = arith.index_cast %159 : i32 to index
    %c0_46 = arith.constant 0 : index
    %161 = vector.load %arg11[%160, %c0_46] : memref<80x128xf32, #tpu.memory_space<vmem>>, vector<8x128xf32>
    %cst_47 = arith.constant dense<0.000000e+00> : vector<8x128xf32>
    %162 = tpu.matmul %155, %12, %cst_47 {dimension_numbers = #tpu.dot_dimension_numbers<[1], [0], [0], [1], [0, 0, 1, 1], [], []>} : vector<8x32xf32>, vector<32x128xf32>, vector<8x128xf32> -> vector<8x128xf32>
    %163 = arith.addf %161, %162 : vector<8x128xf32>
    %164 = vector.extract_strided_slice %163 {offsets = [0, 0], sizes = [8, 96], strides = [1, 1]} : vector<8x128xf32> to vector<8x96xf32>
    %165 = arith.negf %164 : vector<8x96xf32>
    %166 = math.exp %165 : vector<8x96xf32>
    %cst_48 = arith.constant 1.000000e+00 : f32
    %167 = vector.broadcast %cst_48 : f32 to vector<8x96xf32>
    %168 = arith.addf %167, %166 : vector<8x96xf32>
    %169 = arith.divf %167, %168 : vector<8x96xf32>
    %170 = vector.extract_strided_slice %163 {offsets = [0, 96], sizes = [8, 32], strides = [1, 1]} : vector<8x128xf32> to vector<8x32xf32>
    %171 = math.tanh %170 : vector<8x32xf32>
    %172 = vector.extract_strided_slice %169 {offsets = [0, 0], sizes = [8, 32], strides = [1, 1]} : vector<8x96xf32> to vector<8x32xf32>
    %173 = vector.extract_strided_slice %169 {offsets = [0, 32], sizes = [8, 32], strides = [1, 1]} : vector<8x96xf32> to vector<8x32xf32>
    %174 = vector.extract_strided_slice %169 {offsets = [0, 64], sizes = [8, 32], strides = [1, 1]} : vector<8x96xf32> to vector<8x32xf32>
    %175 = arith.mulf %173, %153 : vector<8x32xf32>
    %176 = arith.mulf %172, %171 : vector<8x32xf32>
    %177 = arith.addf %175, %176 : vector<8x32xf32>
    %178 = math.tanh %177 : vector<8x32xf32>
    %179 = arith.mulf %174, %178 : vector<8x32xf32>
    %180 = arith.index_cast %159 : i32 to index
    %c0_49 = arith.constant 0 : index
    %181 = vector.load %arg12[%180, %c0_49] : memref<80x32xf32, #tpu.memory_space<vmem>>, vector<8x32xf32>
    tpu.vector_store %arg12[%180, %c0_49], %179 {strides = array<i32>} : memref<80x32xf32, #tpu.memory_space<vmem>>, vector<8x32xf32>,
    %c7_i32 = arith.constant 7 : i32
    %c8_i32_50 = arith.constant 8 : i32
    %182 = arith.muli %c7_i32, %c8_i32_50 : i32
    %183 = tpu.assume_multiple %182, 8 : i32
    %184 = arith.index_cast %183 : i32 to index
    %c0_51 = arith.constant 0 : index
    %185 = vector.load %arg11[%184, %c0_51] : memref<80x128xf32, #tpu.memory_space<vmem>>, vector<8x128xf32>
    %cst_52 = arith.constant dense<0.000000e+00> : vector<8x128xf32>
    %186 = tpu.matmul %179, %12, %cst_52 {dimension_numbers = #tpu.dot_dimension_numbers<[1], [0], [0], [1], [0, 0, 1, 1], [], []>} : vector<8x32xf32>, vector<32x128xf32>, vector<8x128xf32> -> vector<8x128xf32>
    %187 = arith.addf %185, %186 : vector<8x128xf32>
    %188 = vector.extract_strided_slice %187 {offsets = [0, 0], sizes = [8, 96], strides = [1, 1]} : vector<8x128xf32> to vector<8x96xf32>
    %189 = arith.negf %188 : vector<8x96xf32>
    %190 = math.exp %189 : vector<8x96xf32>
    %cst_53 = arith.constant 1.000000e+00 : f32
    %191 = vector.broadcast %cst_53 : f32 to vector<8x96xf32>
    %192 = arith.addf %191, %190 : vector<8x96xf32>
    %193 = arith.divf %191, %192 : vector<8x96xf32>
    %194 = vector.extract_strided_slice %187 {offsets = [0, 96], sizes = [8, 32], strides = [1, 1]} : vector<8x128xf32> to vector<8x32xf32>
    %195 = math.tanh %194 : vector<8x32xf32>
    %196 = vector.extract_strided_slice %193 {offsets = [0, 0], sizes = [8, 32], strides = [1, 1]} : vector<8x96xf32> to vector<8x32xf32>
    %197 = vector.extract_strided_slice %193 {offsets = [0, 32], sizes = [8, 32], strides = [1, 1]} : vector<8x96xf32> to vector<8x32xf32>
    %198 = vector.extract_strided_slice %193 {offsets = [0, 64], sizes = [8, 32], strides = [1, 1]} : vector<8x96xf32> to vector<8x32xf32>
    %199 = arith.mulf %197, %177 : vector<8x32xf32>
    %200 = arith.mulf %196, %195 : vector<8x32xf32>
    %201 = arith.addf %199, %200 : vector<8x32xf32>
    %202 = math.tanh %201 : vector<8x32xf32>
    %203 = arith.mulf %198, %202 : vector<8x32xf32>
    %204 = arith.index_cast %183 : i32 to index
    %c0_54 = arith.constant 0 : index
    %205 = vector.load %arg12[%204, %c0_54] : memref<80x32xf32, #tpu.memory_space<vmem>>, vector<8x32xf32>
    tpu.vector_store %arg12[%204, %c0_54], %203 {strides = array<i32>} : memref<80x32xf32, #tpu.memory_space<vmem>>, vector<8x32xf32>,
    %c8_i32_55 = arith.constant 8 : i32
    %c8_i32_56 = arith.constant 8 : i32
    %206 = arith.muli %c8_i32_55, %c8_i32_56 : i32
    %207 = tpu.assume_multiple %206, 8 : i32
    %208 = arith.index_cast %207 : i32 to index
    %c0_57 = arith.constant 0 : index
    %209 = vector.load %arg11[%208, %c0_57] : memref<80x128xf32, #tpu.memory_space<vmem>>, vector<8x128xf32>
    %cst_58 = arith.constant dense<0.000000e+00> : vector<8x128xf32>
    %210 = tpu.matmul %203, %12, %cst_58 {dimension_numbers = #tpu.dot_dimension_numbers<[1], [0], [0], [1], [0, 0, 1, 1], [], []>} : vector<8x32xf32>, vector<32x128xf32>, vector<8x128xf32> -> vector<8x128xf32>
    %211 = arith.addf %209, %210 : vector<8x128xf32>
    %212 = vector.extract_strided_slice %211 {offsets = [0, 0], sizes = [8, 96], strides = [1, 1]} : vector<8x128xf32> to vector<8x96xf32>
    %213 = arith.negf %212 : vector<8x96xf32>
    %214 = math.exp %213 : vector<8x96xf32>
    %cst_59 = arith.constant 1.000000e+00 : f32
    %215 = vector.broadcast %cst_59 : f32 to vector<8x96xf32>
    %216 = arith.addf %215, %214 : vector<8x96xf32>
    %217 = arith.divf %215, %216 : vector<8x96xf32>
    %218 = vector.extract_strided_slice %211 {offsets = [0, 96], sizes = [8, 32], strides = [1, 1]} : vector<8x128xf32> to vector<8x32xf32>
    %219 = math.tanh %218 : vector<8x32xf32>
    %220 = vector.extract_strided_slice %217 {offsets = [0, 0], sizes = [8, 32], strides = [1, 1]} : vector<8x96xf32> to vector<8x32xf32>
    %221 = vector.extract_strided_slice %217 {offsets = [0, 32], sizes = [8, 32], strides = [1, 1]} : vector<8x96xf32> to vector<8x32xf32>
    %222 = vector.extract_strided_slice %217 {offsets = [0, 64], sizes = [8, 32], strides = [1, 1]} : vector<8x96xf32> to vector<8x32xf32>
    %223 = arith.mulf %221, %201 : vector<8x32xf32>
    %224 = arith.mulf %220, %219 : vector<8x32xf32>
    %225 = arith.addf %223, %224 : vector<8x32xf32>
    %226 = math.tanh %225 : vector<8x32xf32>
    %227 = arith.mulf %222, %226 : vector<8x32xf32>
    %228 = arith.index_cast %207 : i32 to index
    %c0_60 = arith.constant 0 : index
    %229 = vector.load %arg12[%228, %c0_60] : memref<80x32xf32, #tpu.memory_space<vmem>>, vector<8x32xf32>
    tpu.vector_store %arg12[%228, %c0_60], %227 {strides = array<i32>} : memref<80x32xf32, #tpu.memory_space<vmem>>, vector<8x32xf32>,
    %c9_i32 = arith.constant 9 : i32
    %c8_i32_61 = arith.constant 8 : i32
    %230 = arith.muli %c9_i32, %c8_i32_61 : i32
    %231 = tpu.assume_multiple %230, 8 : i32
    %232 = arith.index_cast %231 : i32 to index
    %c0_62 = arith.constant 0 : index
    %233 = vector.load %arg11[%232, %c0_62] : memref<80x128xf32, #tpu.memory_space<vmem>>, vector<8x128xf32>
    %cst_63 = arith.constant dense<0.000000e+00> : vector<8x128xf32>
    %234 = tpu.matmul %227, %12, %cst_63 {dimension_numbers = #tpu.dot_dimension_numbers<[1], [0], [0], [1], [0, 0, 1, 1], [], []>} : vector<8x32xf32>, vector<32x128xf32>, vector<8x128xf32> -> vector<8x128xf32>
    %235 = arith.addf %233, %234 : vector<8x128xf32>
    %236 = vector.extract_strided_slice %235 {offsets = [0, 0], sizes = [8, 96], strides = [1, 1]} : vector<8x128xf32> to vector<8x96xf32>
    %237 = arith.negf %236 : vector<8x96xf32>
    %238 = math.exp %237 : vector<8x96xf32>
    %cst_64 = arith.constant 1.000000e+00 : f32
    %239 = vector.broadcast %cst_64 : f32 to vector<8x96xf32>
    %240 = arith.addf %239, %238 : vector<8x96xf32>
    %241 = arith.divf %239, %240 : vector<8x96xf32>
    %242 = vector.extract_strided_slice %235 {offsets = [0, 96], sizes = [8, 32], strides = [1, 1]} : vector<8x128xf32> to vector<8x32xf32>
    %243 = math.tanh %242 : vector<8x32xf32>
    %244 = vector.extract_strided_slice %241 {offsets = [0, 0], sizes = [8, 32], strides = [1, 1]} : vector<8x96xf32> to vector<8x32xf32>
    %245 = vector.extract_strided_slice %241 {offsets = [0, 32], sizes = [8, 32], strides = [1, 1]} : vector<8x96xf32> to vector<8x32xf32>
    %246 = vector.extract_strided_slice %241 {offsets = [0, 64], sizes = [8, 32], strides = [1, 1]} : vector<8x96xf32> to vector<8x32xf32>
    %247 = arith.mulf %245, %225 : vector<8x32xf32>
    %248 = arith.mulf %244, %243 : vector<8x32xf32>
    %249 = arith.addf %247, %248 : vector<8x32xf32>
    %250 = math.tanh %249 : vector<8x32xf32>
    %251 = arith.mulf %246, %250 : vector<8x32xf32>
    %252 = arith.index_cast %231 : i32 to index
    %c0_65 = arith.constant 0 : index
    %253 = vector.load %arg12[%252, %c0_65] : memref<80x32xf32, #tpu.memory_space<vmem>>, vector<8x32xf32>
    tpu.vector_store %arg12[%252, %c0_65], %251 {strides = array<i32>} : memref<80x32xf32, #tpu.memory_space<vmem>>, vector<8x32xf32>,
    %c10_i32 = arith.constant 10 : i32
    %c0_66 = arith.constant 0 : index
    %c0_67 = arith.constant 0 : index
    %254 = vector.load %arg12[%c0_66, %c0_67] : memref<80x32xf32, #tpu.memory_space<vmem>>, vector<80x32xf32>
    %c1 = arith.constant 1 : index
    %c0_68 = arith.constant 0 : index
    %c0_69 = arith.constant 0 : index
    %255 = vector.load %arg3[%c1, %c0_68, %c0_69] : memref<2x32x128xf32, #tpu.memory_space<vmem>>, vector<1x32x128xf32>
    %256 = vector.shape_cast %255 : vector<1x32x128xf32> to vector<32x128xf32>
    %cst_70 = arith.constant dense<0.000000e+00> : vector<80x128xf32>
    %257 = tpu.matmul %254, %256, %cst_70 {dimension_numbers = #tpu.dot_dimension_numbers<[1], [0], [0], [1], [0, 0, 1, 1], [], []>} : vector<80x32xf32>, vector<32x128xf32>, vector<80x128xf32> -> vector<80x128xf32>
    %c1_71 = arith.constant 1 : index
    %c0_72 = arith.constant 0 : index
    %c0_73 = arith.constant 0 : index
    %258 = vector.load %arg5[%c1_71, %c0_72, %c0_73] : memref<2x1x128xf32, #tpu.memory_space<vmem>>, vector<1x1x128xf32>
    %259 = vector.shape_cast %258 : vector<1x1x128xf32> to vector<1x128xf32>
    %260 = vector.broadcast %259 : vector<1x128xf32> to vector<80x128xf32>
    %261 = arith.addf %257, %260 : vector<80x128xf32>
    %c0_74 = arith.constant 0 : index
    %c0_75 = arith.constant 0 : index
    %262 = vector.load %arg11[%c0_74, %c0_75] : memref<80x128xf32, #tpu.memory_space<vmem>>, vector<80x128xf32>
    tpu.vector_store %arg11[%c0_74, %c0_75], %261 {strides = array<i32>} : memref<80x128xf32, #tpu.memory_space<vmem>>, vector<80x128xf32>,
    %c1_76 = arith.constant 1 : index
    %c0_77 = arith.constant 0 : index
    %c0_78 = arith.constant 0 : index
    %263 = vector.load %arg4[%c1_76, %c0_77, %c0_78] : memref<2x32x128xf32, #tpu.memory_space<vmem>>, vector<1x32x128xf32>
    %264 = vector.shape_cast %263 : vector<1x32x128xf32> to vector<32x128xf32>
    %cst_79 = arith.constant 0.000000e+00 : f32
    %265 = vector.broadcast %cst_79 : f32 to vector<8x32xf32>
    %c0_i32_80 = arith.constant 0 : i32
    %c8_i32_81 = arith.constant 8 : i32
    %266 = arith.muli %c0_i32_80, %c8_i32_81 : i32
    %267 = tpu.assume_multiple %266, 8 : i32
    %268 = arith.index_cast %267 : i32 to index
    %c0_82 = arith.constant 0 : index
    %269 = vector.load %arg11[%268, %c0_82] : memref<80x128xf32, #tpu.memory_space<vmem>>, vector<8x128xf32>
    %cst_83 = arith.constant dense<0.000000e+00> : vector<8x128xf32>
    %270 = tpu.matmul %265, %264, %cst_83 {dimension_numbers = #tpu.dot_dimension_numbers<[1], [0], [0], [1], [0, 0, 1, 1], [], []>} : vector<8x32xf32>, vector<32x128xf32>, vector<8x128xf32> -> vector<8x128xf32>
    %271 = arith.addf %269, %270 : vector<8x128xf32>
    %272 = vector.extract_strided_slice %271 {offsets = [0, 0], sizes = [8, 96], strides = [1, 1]} : vector<8x128xf32> to vector<8x96xf32>
    %273 = arith.negf %272 : vector<8x96xf32>
    %274 = math.exp %273 : vector<8x96xf32>
    %cst_84 = arith.constant 1.000000e+00 : f32
    %275 = vector.broadcast %cst_84 : f32 to vector<8x96xf32>
    %276 = arith.addf %275, %274 : vector<8x96xf32>
    %277 = arith.divf %275, %276 : vector<8x96xf32>
    %278 = vector.extract_strided_slice %271 {offsets = [0, 96], sizes = [8, 32], strides = [1, 1]} : vector<8x128xf32> to vector<8x32xf32>
    %279 = math.tanh %278 : vector<8x32xf32>
    %280 = vector.extract_strided_slice %277 {offsets = [0, 0], sizes = [8, 32], strides = [1, 1]} : vector<8x96xf32> to vector<8x32xf32>
    %281 = vector.extract_strided_slice %277 {offsets = [0, 32], sizes = [8, 32], strides = [1, 1]} : vector<8x96xf32> to vector<8x32xf32>
    %282 = vector.extract_strided_slice %277 {offsets = [0, 64], sizes = [8, 32], strides = [1, 1]} : vector<8x96xf32> to vector<8x32xf32>
    %283 = arith.mulf %281, %265 : vector<8x32xf32>
    %284 = arith.mulf %280, %279 : vector<8x32xf32>
    %285 = arith.addf %283, %284 : vector<8x32xf32>
    %286 = math.tanh %285 : vector<8x32xf32>
    %287 = arith.mulf %282, %286 : vector<8x32xf32>
    %288 = arith.index_cast %267 : i32 to index
    %c0_85 = arith.constant 0 : index
    %289 = vector.load %arg12[%288, %c0_85] : memref<80x32xf32, #tpu.memory_space<vmem>>, vector<8x32xf32>
    tpu.vector_store %arg12[%288, %c0_85], %287 {strides = array<i32>} : memref<80x32xf32, #tpu.memory_space<vmem>>, vector<8x32xf32>,
    %c1_i32_86 = arith.constant 1 : i32
    %c8_i32_87 = arith.constant 8 : i32
    %290 = arith.muli %c1_i32_86, %c8_i32_87 : i32
    %291 = tpu.assume_multiple %290, 8 : i32
    %292 = arith.index_cast %291 : i32 to index
    %c0_88 = arith.constant 0 : index
    %293 = vector.load %arg11[%292, %c0_88] : memref<80x128xf32, #tpu.memory_space<vmem>>, vector<8x128xf32>
    %cst_89 = arith.constant dense<0.000000e+00> : vector<8x128xf32>
    %294 = tpu.matmul %287, %264, %cst_89 {dimension_numbers = #tpu.dot_dimension_numbers<[1], [0], [0], [1], [0, 0, 1, 1], [], []>} : vector<8x32xf32>, vector<32x128xf32>, vector<8x128xf32> -> vector<8x128xf32>
    %295 = arith.addf %293, %294 : vector<8x128xf32>
    %296 = vector.extract_strided_slice %295 {offsets = [0, 0], sizes = [8, 96], strides = [1, 1]} : vector<8x128xf32> to vector<8x96xf32>
    %297 = arith.negf %296 : vector<8x96xf32>
    %298 = math.exp %297 : vector<8x96xf32>
    %cst_90 = arith.constant 1.000000e+00 : f32
    %299 = vector.broadcast %cst_90 : f32 to vector<8x96xf32>
    %300 = arith.addf %299, %298 : vector<8x96xf32>
    %301 = arith.divf %299, %300 : vector<8x96xf32>
    %302 = vector.extract_strided_slice %295 {offsets = [0, 96], sizes = [8, 32], strides = [1, 1]} : vector<8x128xf32> to vector<8x32xf32>
    %303 = math.tanh %302 : vector<8x32xf32>
    %304 = vector.extract_strided_slice %301 {offsets = [0, 0], sizes = [8, 32], strides = [1, 1]} : vector<8x96xf32> to vector<8x32xf32>
    %305 = vector.extract_strided_slice %301 {offsets = [0, 32], sizes = [8, 32], strides = [1, 1]} : vector<8x96xf32> to vector<8x32xf32>
    %306 = vector.extract_strided_slice %301 {offsets = [0, 64], sizes = [8, 32], strides = [1, 1]} : vector<8x96xf32> to vector<8x32xf32>
    %307 = arith.mulf %305, %285 : vector<8x32xf32>
    %308 = arith.mulf %304, %303 : vector<8x32xf32>
    %309 = arith.addf %307, %308 : vector<8x32xf32>
    %310 = math.tanh %309 : vector<8x32xf32>
    %311 = arith.mulf %306, %310 : vector<8x32xf32>
    %312 = arith.index_cast %291 : i32 to index
    %c0_91 = arith.constant 0 : index
    %313 = vector.load %arg12[%312, %c0_91] : memref<80x32xf32, #tpu.memory_space<vmem>>, vector<8x32xf32>
    tpu.vector_store %arg12[%312, %c0_91], %311 {strides = array<i32>} : memref<80x32xf32, #tpu.memory_space<vmem>>, vector<8x32xf32>,
    %c2_i32_92 = arith.constant 2 : i32
    %c8_i32_93 = arith.constant 8 : i32
    %314 = arith.muli %c2_i32_92, %c8_i32_93 : i32
    %315 = tpu.assume_multiple %314, 8 : i32
    %316 = arith.index_cast %315 : i32 to index
    %c0_94 = arith.constant 0 : index
    %317 = vector.load %arg11[%316, %c0_94] : memref<80x128xf32, #tpu.memory_space<vmem>>, vector<8x128xf32>
    %cst_95 = arith.constant dense<0.000000e+00> : vector<8x128xf32>
    %318 = tpu.matmul %311, %264, %cst_95 {dimension_numbers = #tpu.dot_dimension_numbers<[1], [0], [0], [1], [0, 0, 1, 1], [], []>} : vector<8x32xf32>, vector<32x128xf32>, vector<8x128xf32> -> vector<8x128xf32>
    %319 = arith.addf %317, %318 : vector<8x128xf32>
    %320 = vector.extract_strided_slice %319 {offsets = [0, 0], sizes = [8, 96], strides = [1, 1]} : vector<8x128xf32> to vector<8x96xf32>
    %321 = arith.negf %320 : vector<8x96xf32>
    %322 = math.exp %321 : vector<8x96xf32>
    %cst_96 = arith.constant 1.000000e+00 : f32
    %323 = vector.broadcast %cst_96 : f32 to vector<8x96xf32>
    %324 = arith.addf %323, %322 : vector<8x96xf32>
    %325 = arith.divf %323, %324 : vector<8x96xf32>
    %326 = vector.extract_strided_slice %319 {offsets = [0, 96], sizes = [8, 32], strides = [1, 1]} : vector<8x128xf32> to vector<8x32xf32>
    %327 = math.tanh %326 : vector<8x32xf32>
    %328 = vector.extract_strided_slice %325 {offsets = [0, 0], sizes = [8, 32], strides = [1, 1]} : vector<8x96xf32> to vector<8x32xf32>
    %329 = vector.extract_strided_slice %325 {offsets = [0, 32], sizes = [8, 32], strides = [1, 1]} : vector<8x96xf32> to vector<8x32xf32>
    %330 = vector.extract_strided_slice %325 {offsets = [0, 64], sizes = [8, 32], strides = [1, 1]} : vector<8x96xf32> to vector<8x32xf32>
    %331 = arith.mulf %329, %309 : vector<8x32xf32>
    %332 = arith.mulf %328, %327 : vector<8x32xf32>
    %333 = arith.addf %331, %332 : vector<8x32xf32>
    %334 = math.tanh %333 : vector<8x32xf32>
    %335 = arith.mulf %330, %334 : vector<8x32xf32>
    %336 = arith.index_cast %315 : i32 to index
    %c0_97 = arith.constant 0 : index
    %337 = vector.load %arg12[%336, %c0_97] : memref<80x32xf32, #tpu.memory_space<vmem>>, vector<8x32xf32>
    tpu.vector_store %arg12[%336, %c0_97], %335 {strides = array<i32>} : memref<80x32xf32, #tpu.memory_space<vmem>>, vector<8x32xf32>,
    %c3_i32_98 = arith.constant 3 : i32
    %c8_i32_99 = arith.constant 8 : i32
    %338 = arith.muli %c3_i32_98, %c8_i32_99 : i32
    %339 = tpu.assume_multiple %338, 8 : i32
    %340 = arith.index_cast %339 : i32 to index
    %c0_100 = arith.constant 0 : index
    %341 = vector.load %arg11[%340, %c0_100] : memref<80x128xf32, #tpu.memory_space<vmem>>, vector<8x128xf32>
    %cst_101 = arith.constant dense<0.000000e+00> : vector<8x128xf32>
    %342 = tpu.matmul %335, %264, %cst_101 {dimension_numbers = #tpu.dot_dimension_numbers<[1], [0], [0], [1], [0, 0, 1, 1], [], []>} : vector<8x32xf32>, vector<32x128xf32>, vector<8x128xf32> -> vector<8x128xf32>
    %343 = arith.addf %341, %342 : vector<8x128xf32>
    %344 = vector.extract_strided_slice %343 {offsets = [0, 0], sizes = [8, 96], strides = [1, 1]} : vector<8x128xf32> to vector<8x96xf32>
    %345 = arith.negf %344 : vector<8x96xf32>
    %346 = math.exp %345 : vector<8x96xf32>
    %cst_102 = arith.constant 1.000000e+00 : f32
    %347 = vector.broadcast %cst_102 : f32 to vector<8x96xf32>
    %348 = arith.addf %347, %346 : vector<8x96xf32>
    %349 = arith.divf %347, %348 : vector<8x96xf32>
    %350 = vector.extract_strided_slice %343 {offsets = [0, 96], sizes = [8, 32], strides = [1, 1]} : vector<8x128xf32> to vector<8x32xf32>
    %351 = math.tanh %350 : vector<8x32xf32>
    %352 = vector.extract_strided_slice %349 {offsets = [0, 0], sizes = [8, 32], strides = [1, 1]} : vector<8x96xf32> to vector<8x32xf32>
    %353 = vector.extract_strided_slice %349 {offsets = [0, 32], sizes = [8, 32], strides = [1, 1]} : vector<8x96xf32> to vector<8x32xf32>
    %354 = vector.extract_strided_slice %349 {offsets = [0, 64], sizes = [8, 32], strides = [1, 1]} : vector<8x96xf32> to vector<8x32xf32>
    %355 = arith.mulf %353, %333 : vector<8x32xf32>
    %356 = arith.mulf %352, %351 : vector<8x32xf32>
    %357 = arith.addf %355, %356 : vector<8x32xf32>
    %358 = math.tanh %357 : vector<8x32xf32>
    %359 = arith.mulf %354, %358 : vector<8x32xf32>
    %360 = arith.index_cast %339 : i32 to index
    %c0_103 = arith.constant 0 : index
    %361 = vector.load %arg12[%360, %c0_103] : memref<80x32xf32, #tpu.memory_space<vmem>>, vector<8x32xf32>
    tpu.vector_store %arg12[%360, %c0_103], %359 {strides = array<i32>} : memref<80x32xf32, #tpu.memory_space<vmem>>, vector<8x32xf32>,
    %c4_i32_104 = arith.constant 4 : i32
    %c8_i32_105 = arith.constant 8 : i32
    %362 = arith.muli %c4_i32_104, %c8_i32_105 : i32
    %363 = tpu.assume_multiple %362, 8 : i32
    %364 = arith.index_cast %363 : i32 to index
    %c0_106 = arith.constant 0 : index
    %365 = vector.load %arg11[%364, %c0_106] : memref<80x128xf32, #tpu.memory_space<vmem>>, vector<8x128xf32>
    %cst_107 = arith.constant dense<0.000000e+00> : vector<8x128xf32>
    %366 = tpu.matmul %359, %264, %cst_107 {dimension_numbers = #tpu.dot_dimension_numbers<[1], [0], [0], [1], [0, 0, 1, 1], [], []>} : vector<8x32xf32>, vector<32x128xf32>, vector<8x128xf32> -> vector<8x128xf32>
    %367 = arith.addf %365, %366 : vector<8x128xf32>
    %368 = vector.extract_strided_slice %367 {offsets = [0, 0], sizes = [8, 96], strides = [1, 1]} : vector<8x128xf32> to vector<8x96xf32>
    %369 = arith.negf %368 : vector<8x96xf32>
    %370 = math.exp %369 : vector<8x96xf32>
    %cst_108 = arith.constant 1.000000e+00 : f32
    %371 = vector.broadcast %cst_108 : f32 to vector<8x96xf32>
    %372 = arith.addf %371, %370 : vector<8x96xf32>
    %373 = arith.divf %371, %372 : vector<8x96xf32>
    %374 = vector.extract_strided_slice %367 {offsets = [0, 96], sizes = [8, 32], strides = [1, 1]} : vector<8x128xf32> to vector<8x32xf32>
    %375 = math.tanh %374 : vector<8x32xf32>
    %376 = vector.extract_strided_slice %373 {offsets = [0, 0], sizes = [8, 32], strides = [1, 1]} : vector<8x96xf32> to vector<8x32xf32>
    %377 = vector.extract_strided_slice %373 {offsets = [0, 32], sizes = [8, 32], strides = [1, 1]} : vector<8x96xf32> to vector<8x32xf32>
    %378 = vector.extract_strided_slice %373 {offsets = [0, 64], sizes = [8, 32], strides = [1, 1]} : vector<8x96xf32> to vector<8x32xf32>
    %379 = arith.mulf %377, %357 : vector<8x32xf32>
    %380 = arith.mulf %376, %375 : vector<8x32xf32>
    %381 = arith.addf %379, %380 : vector<8x32xf32>
    %382 = math.tanh %381 : vector<8x32xf32>
    %383 = arith.mulf %378, %382 : vector<8x32xf32>
    %384 = arith.index_cast %363 : i32 to index
    %c0_109 = arith.constant 0 : index
    %385 = vector.load %arg12[%384, %c0_109] : memref<80x32xf32, #tpu.memory_space<vmem>>, vector<8x32xf32>
    tpu.vector_store %arg12[%384, %c0_109], %383 {strides = array<i32>} : memref<80x32xf32, #tpu.memory_space<vmem>>, vector<8x32xf32>,
    %c5_i32_110 = arith.constant 5 : i32
    %c8_i32_111 = arith.constant 8 : i32
    %386 = arith.muli %c5_i32_110, %c8_i32_111 : i32
    %387 = tpu.assume_multiple %386, 8 : i32
    %388 = arith.index_cast %387 : i32 to index
    %c0_112 = arith.constant 0 : index
    %389 = vector.load %arg11[%388, %c0_112] : memref<80x128xf32, #tpu.memory_space<vmem>>, vector<8x128xf32>
    %cst_113 = arith.constant dense<0.000000e+00> : vector<8x128xf32>
    %390 = tpu.matmul %383, %264, %cst_113 {dimension_numbers = #tpu.dot_dimension_numbers<[1], [0], [0], [1], [0, 0, 1, 1], [], []>} : vector<8x32xf32>, vector<32x128xf32>, vector<8x128xf32> -> vector<8x128xf32>
    %391 = arith.addf %389, %390 : vector<8x128xf32>
    %392 = vector.extract_strided_slice %391 {offsets = [0, 0], sizes = [8, 96], strides = [1, 1]} : vector<8x128xf32> to vector<8x96xf32>
    %393 = arith.negf %392 : vector<8x96xf32>
    %394 = math.exp %393 : vector<8x96xf32>
    %cst_114 = arith.constant 1.000000e+00 : f32
    %395 = vector.broadcast %cst_114 : f32 to vector<8x96xf32>
    %396 = arith.addf %395, %394 : vector<8x96xf32>
    %397 = arith.divf %395, %396 : vector<8x96xf32>
    %398 = vector.extract_strided_slice %391 {offsets = [0, 96], sizes = [8, 32], strides = [1, 1]} : vector<8x128xf32> to vector<8x32xf32>
    %399 = math.tanh %398 : vector<8x32xf32>
    %400 = vector.extract_strided_slice %397 {offsets = [0, 0], sizes = [8, 32], strides = [1, 1]} : vector<8x96xf32> to vector<8x32xf32>
    %401 = vector.extract_strided_slice %397 {offsets = [0, 32], sizes = [8, 32], strides = [1, 1]} : vector<8x96xf32> to vector<8x32xf32>
    %402 = vector.extract_strided_slice %397 {offsets = [0, 64], sizes = [8, 32], strides = [1, 1]} : vector<8x96xf32> to vector<8x32xf32>
    %403 = arith.mulf %401, %381 : vector<8x32xf32>
    %404 = arith.mulf %400, %399 : vector<8x32xf32>
    %405 = arith.addf %403, %404 : vector<8x32xf32>
    %406 = math.tanh %405 : vector<8x32xf32>
    %407 = arith.mulf %402, %406 : vector<8x32xf32>
    %408 = arith.index_cast %387 : i32 to index
    %c0_115 = arith.constant 0 : index
    %409 = vector.load %arg12[%408, %c0_115] : memref<80x32xf32, #tpu.memory_space<vmem>>, vector<8x32xf32>
    tpu.vector_store %arg12[%408, %c0_115], %407 {strides = array<i32>} : memref<80x32xf32, #tpu.memory_space<vmem>>, vector<8x32xf32>,
    %c6_i32_116 = arith.constant 6 : i32
    %c8_i32_117 = arith.constant 8 : i32
    %410 = arith.muli %c6_i32_116, %c8_i32_117 : i32
    %411 = tpu.assume_multiple %410, 8 : i32
    %412 = arith.index_cast %411 : i32 to index
    %c0_118 = arith.constant 0 : index
    %413 = vector.load %arg11[%412, %c0_118] : memref<80x128xf32, #tpu.memory_space<vmem>>, vector<8x128xf32>
    %cst_119 = arith.constant dense<0.000000e+00> : vector<8x128xf32>
    %414 = tpu.matmul %407, %264, %cst_119 {dimension_numbers = #tpu.dot_dimension_numbers<[1], [0], [0], [1], [0, 0, 1, 1], [], []>} : vector<8x32xf32>, vector<32x128xf32>, vector<8x128xf32> -> vector<8x128xf32>
    %415 = arith.addf %413, %414 : vector<8x128xf32>
    %416 = vector.extract_strided_slice %415 {offsets = [0, 0], sizes = [8, 96], strides = [1, 1]} : vector<8x128xf32> to vector<8x96xf32>
    %417 = arith.negf %416 : vector<8x96xf32>
    %418 = math.exp %417 : vector<8x96xf32>
    %cst_120 = arith.constant 1.000000e+00 : f32
    %419 = vector.broadcast %cst_120 : f32 to vector<8x96xf32>
    %420 = arith.addf %419, %418 : vector<8x96xf32>
    %421 = arith.divf %419, %420 : vector<8x96xf32>
    %422 = vector.extract_strided_slice %415 {offsets = [0, 96], sizes = [8, 32], strides = [1, 1]} : vector<8x128xf32> to vector<8x32xf32>
    %423 = math.tanh %422 : vector<8x32xf32>
    %424 = vector.extract_strided_slice %421 {offsets = [0, 0], sizes = [8, 32], strides = [1, 1]} : vector<8x96xf32> to vector<8x32xf32>
    %425 = vector.extract_strided_slice %421 {offsets = [0, 32], sizes = [8, 32], strides = [1, 1]} : vector<8x96xf32> to vector<8x32xf32>
    %426 = vector.extract_strided_slice %421 {offsets = [0, 64], sizes = [8, 32], strides = [1, 1]} : vector<8x96xf32> to vector<8x32xf32>
    %427 = arith.mulf %425, %405 : vector<8x32xf32>
    %428 = arith.mulf %424, %423 : vector<8x32xf32>
    %429 = arith.addf %427, %428 : vector<8x32xf32>
    %430 = math.tanh %429 : vector<8x32xf32>
    %431 = arith.mulf %426, %430 : vector<8x32xf32>
    %432 = arith.index_cast %411 : i32 to index
    %c0_121 = arith.constant 0 : index
    %433 = vector.load %arg12[%432, %c0_121] : memref<80x32xf32, #tpu.memory_space<vmem>>, vector<8x32xf32>
    tpu.vector_store %arg12[%432, %c0_121], %431 {strides = array<i32>} : memref<80x32xf32, #tpu.memory_space<vmem>>, vector<8x32xf32>,
    %c7_i32_122 = arith.constant 7 : i32
    %c8_i32_123 = arith.constant 8 : i32
    %434 = arith.muli %c7_i32_122, %c8_i32_123 : i32
    %435 = tpu.assume_multiple %434, 8 : i32
    %436 = arith.index_cast %435 : i32 to index
    %c0_124 = arith.constant 0 : index
    %437 = vector.load %arg11[%436, %c0_124] : memref<80x128xf32, #tpu.memory_space<vmem>>, vector<8x128xf32>
    %cst_125 = arith.constant dense<0.000000e+00> : vector<8x128xf32>
    %438 = tpu.matmul %431, %264, %cst_125 {dimension_numbers = #tpu.dot_dimension_numbers<[1], [0], [0], [1], [0, 0, 1, 1], [], []>} : vector<8x32xf32>, vector<32x128xf32>, vector<8x128xf32> -> vector<8x128xf32>
    %439 = arith.addf %437, %438 : vector<8x128xf32>
    %440 = vector.extract_strided_slice %439 {offsets = [0, 0], sizes = [8, 96], strides = [1, 1]} : vector<8x128xf32> to vector<8x96xf32>
    %441 = arith.negf %440 : vector<8x96xf32>
    %442 = math.exp %441 : vector<8x96xf32>
    %cst_126 = arith.constant 1.000000e+00 : f32
    %443 = vector.broadcast %cst_126 : f32 to vector<8x96xf32>
    %444 = arith.addf %443, %442 : vector<8x96xf32>
    %445 = arith.divf %443, %444 : vector<8x96xf32>
    %446 = vector.extract_strided_slice %439 {offsets = [0, 96], sizes = [8, 32], strides = [1, 1]} : vector<8x128xf32> to vector<8x32xf32>
    %447 = math.tanh %446 : vector<8x32xf32>
    %448 = vector.extract_strided_slice %445 {offsets = [0, 0], sizes = [8, 32], strides = [1, 1]} : vector<8x96xf32> to vector<8x32xf32>
    %449 = vector.extract_strided_slice %445 {offsets = [0, 32], sizes = [8, 32], strides = [1, 1]} : vector<8x96xf32> to vector<8x32xf32>
    %450 = vector.extract_strided_slice %445 {offsets = [0, 64], sizes = [8, 32], strides = [1, 1]} : vector<8x96xf32> to vector<8x32xf32>
    %451 = arith.mulf %449, %429 : vector<8x32xf32>
    %452 = arith.mulf %448, %447 : vector<8x32xf32>
    %453 = arith.addf %451, %452 : vector<8x32xf32>
    %454 = math.tanh %453 : vector<8x32xf32>
    %455 = arith.mulf %450, %454 : vector<8x32xf32>
    %456 = arith.index_cast %435 : i32 to index
    %c0_127 = arith.constant 0 : index
    %457 = vector.load %arg12[%456, %c0_127] : memref<80x32xf32, #tpu.memory_space<vmem>>, vector<8x32xf32>
    tpu.vector_store %arg12[%456, %c0_127], %455 {strides = array<i32>} : memref<80x32xf32, #tpu.memory_space<vmem>>, vector<8x32xf32>,
    %c8_i32_128 = arith.constant 8 : i32
    %c8_i32_129 = arith.constant 8 : i32
    %458 = arith.muli %c8_i32_128, %c8_i32_129 : i32
    %459 = tpu.assume_multiple %458, 8 : i32
    %460 = arith.index_cast %459 : i32 to index
    %c0_130 = arith.constant 0 : index
    %461 = vector.load %arg11[%460, %c0_130] : memref<80x128xf32, #tpu.memory_space<vmem>>, vector<8x128xf32>
    %cst_131 = arith.constant dense<0.000000e+00> : vector<8x128xf32>
    %462 = tpu.matmul %455, %264, %cst_131 {dimension_numbers = #tpu.dot_dimension_numbers<[1], [0], [0], [1], [0, 0, 1, 1], [], []>} : vector<8x32xf32>, vector<32x128xf32>, vector<8x128xf32> -> vector<8x128xf32>
    %463 = arith.addf %461, %462 : vector<8x128xf32>
    %464 = vector.extract_strided_slice %463 {offsets = [0, 0], sizes = [8, 96], strides = [1, 1]} : vector<8x128xf32> to vector<8x96xf32>
    %465 = arith.negf %464 : vector<8x96xf32>
    %466 = math.exp %465 : vector<8x96xf32>
    %cst_132 = arith.constant 1.000000e+00 : f32
    %467 = vector.broadcast %cst_132 : f32 to vector<8x96xf32>
    %468 = arith.addf %467, %466 : vector<8x96xf32>
    %469 = arith.divf %467, %468 : vector<8x96xf32>
    %470 = vector.extract_strided_slice %463 {offsets = [0, 96], sizes = [8, 32], strides = [1, 1]} : vector<8x128xf32> to vector<8x32xf32>
    %471 = math.tanh %470 : vector<8x32xf32>
    %472 = vector.extract_strided_slice %469 {offsets = [0, 0], sizes = [8, 32], strides = [1, 1]} : vector<8x96xf32> to vector<8x32xf32>
    %473 = vector.extract_strided_slice %469 {offsets = [0, 32], sizes = [8, 32], strides = [1, 1]} : vector<8x96xf32> to vector<8x32xf32>
    %474 = vector.extract_strided_slice %469 {offsets = [0, 64], sizes = [8, 32], strides = [1, 1]} : vector<8x96xf32> to vector<8x32xf32>
    %475 = arith.mulf %473, %453 : vector<8x32xf32>
    %476 = arith.mulf %472, %471 : vector<8x32xf32>
    %477 = arith.addf %475, %476 : vector<8x32xf32>
    %478 = math.tanh %477 : vector<8x32xf32>
    %479 = arith.mulf %474, %478 : vector<8x32xf32>
    %480 = arith.index_cast %459 : i32 to index
    %c0_133 = arith.constant 0 : index
    %481 = vector.load %arg12[%480, %c0_133] : memref<80x32xf32, #tpu.memory_space<vmem>>, vector<8x32xf32>
    tpu.vector_store %arg12[%480, %c0_133], %479 {strides = array<i32>} : memref<80x32xf32, #tpu.memory_space<vmem>>, vector<8x32xf32>,
    %c9_i32_134 = arith.constant 9 : i32
    %c8_i32_135 = arith.constant 8 : i32
    %482 = arith.muli %c9_i32_134, %c8_i32_135 : i32
    %483 = tpu.assume_multiple %482, 8 : i32
    %484 = arith.index_cast %483 : i32 to index
    %c0_136 = arith.constant 0 : index
    %485 = vector.load %arg11[%484, %c0_136] : memref<80x128xf32, #tpu.memory_space<vmem>>, vector<8x128xf32>
    %cst_137 = arith.constant dense<0.000000e+00> : vector<8x128xf32>
    %486 = tpu.matmul %479, %264, %cst_137 {dimension_numbers = #tpu.dot_dimension_numbers<[1], [0], [0], [1], [0, 0, 1, 1], [], []>} : vector<8x32xf32>, vector<32x128xf32>, vector<8x128xf32> -> vector<8x128xf32>
    %487 = arith.addf %485, %486 : vector<8x128xf32>
    %488 = vector.extract_strided_slice %487 {offsets = [0, 0], sizes = [8, 96], strides = [1, 1]} : vector<8x128xf32> to vector<8x96xf32>
    %489 = arith.negf %488 : vector<8x96xf32>
    %490 = math.exp %489 : vector<8x96xf32>
    %cst_138 = arith.constant 1.000000e+00 : f32
    %491 = vector.broadcast %cst_138 : f32 to vector<8x96xf32>
    %492 = arith.addf %491, %490 : vector<8x96xf32>
    %493 = arith.divf %491, %492 : vector<8x96xf32>
    %494 = vector.extract_strided_slice %487 {offsets = [0, 96], sizes = [8, 32], strides = [1, 1]} : vector<8x128xf32> to vector<8x32xf32>
    %495 = math.tanh %494 : vector<8x32xf32>
    %496 = vector.extract_strided_slice %493 {offsets = [0, 0], sizes = [8, 32], strides = [1, 1]} : vector<8x96xf32> to vector<8x32xf32>
    %497 = vector.extract_strided_slice %493 {offsets = [0, 32], sizes = [8, 32], strides = [1, 1]} : vector<8x96xf32> to vector<8x32xf32>
    %498 = vector.extract_strided_slice %493 {offsets = [0, 64], sizes = [8, 32], strides = [1, 1]} : vector<8x96xf32> to vector<8x32xf32>
    %499 = arith.mulf %497, %477 : vector<8x32xf32>
    %500 = arith.mulf %496, %495 : vector<8x32xf32>
    %501 = arith.addf %499, %500 : vector<8x32xf32>
    %502 = math.tanh %501 : vector<8x32xf32>
    %503 = arith.mulf %498, %502 : vector<8x32xf32>
    %504 = arith.index_cast %483 : i32 to index
    %c0_139 = arith.constant 0 : index
    %505 = vector.load %arg12[%504, %c0_139] : memref<80x32xf32, #tpu.memory_space<vmem>>, vector<8x32xf32>
    tpu.vector_store %arg12[%504, %c0_139], %503 {strides = array<i32>} : memref<80x32xf32, #tpu.memory_space<vmem>>, vector<8x32xf32>,
    %c10_i32_140 = arith.constant 10 : i32
    %cst_141 = arith.constant 0.000000e+00 : f32
    %506 = vector.broadcast %cst_141 : f32 to vector<8x256xf32>
    %c0_142 = arith.constant 0 : index
    %c0_143 = arith.constant 0 : index
    %507 = vector.load %arg10[%c0_142, %c0_143] : memref<8x256xf32, #tpu.memory_space<vmem>>, vector<8x256xf32>
    tpu.vector_store %arg10[%c0_142, %c0_143], %506 {strides = array<i32>} : memref<8x256xf32, #tpu.memory_space<vmem>>, vector<8x256xf32>,
    %c0_144 = arith.constant 0 : index
    %c0_145 = arith.constant 0 : index
    %c0_146 = arith.constant 0 : index
    %508 = vector.load %arg6[%c0_144, %c0_145, %c0_146] : memref<2x64x128xf32, #tpu.memory_space<vmem>>, vector<1x64x128xf32>
    %509 = vector.shape_cast %508 : vector<1x64x128xf32> to vector<64x128xf32>
    %c1_147 = arith.constant 1 : index
    %c0_148 = arith.constant 0 : index
    %c0_149 = arith.constant 0 : index
    %510 = vector.load %arg6[%c1_147, %c0_148, %c0_149] : memref<2x64x128xf32, #tpu.memory_space<vmem>>, vector<1x64x128xf32>
    %511 = vector.shape_cast %510 : vector<1x64x128xf32> to vector<64x128xf32>
    %c0_150 = arith.constant 0 : index
    %c0_151 = arith.constant 0 : index
    %c0_152 = arith.constant 0 : index
    %512 = vector.load %arg7[%c0_150, %c0_151, %c0_152] : memref<2x1x128xf32, #tpu.memory_space<vmem>>, vector<1x1x128xf32>
    %513 = vector.shape_cast %512 : vector<1x1x128xf32> to vector<1x128xf32>
    %c1_153 = arith.constant 1 : index
    %c0_154 = arith.constant 0 : index
    %c0_155 = arith.constant 0 : index
    %514 = vector.load %arg7[%c1_153, %c0_154, %c0_155] : memref<2x1x128xf32, #tpu.memory_space<vmem>>, vector<1x1x128xf32>
    %515 = vector.shape_cast %514 : vector<1x1x128xf32> to vector<1x128xf32>
    %c0_156 = arith.constant 0 : index
    %c0_157 = arith.constant 0 : index
    %516 = vector.load %arg8[%c0_156, %c0_157] : memref<32x32xf32, #tpu.memory_space<vmem>>, vector<32x32xf32>
    %c0_158 = arith.constant 0 : index
    %c0_159 = arith.constant 0 : index
    %517 = vector.load %arg9[%c0_158, %c0_159] : memref<1x32xf32, #tpu.memory_space<vmem>>, vector<1x32xf32>
    %c0_160 = arith.constant 0 : index
    %c0_161 = arith.constant 0 : index
    %518 = vector.load %arg2[%c0_160, %c0_161] : memref<64x32xf32, #tpu.memory_space<vmem>>, vector<8x32xf32>
    %519 = tpu.concatenate %518, %251 in 1 : vector<8x32xf32>, vector<8x32xf32> -> vector<8x64xf32>
    %cst_162 = arith.constant dense<0.000000e+00> : vector<8x128xf32>
    %520 = tpu.matmul %519, %509, %cst_162 {dimension_numbers = #tpu.dot_dimension_numbers<[1], [0], [0], [1], [0, 0, 1, 1], [], []>} : vector<8x64xf32>, vector<64x128xf32>, vector<8x128xf32> -> vector<8x128xf32>
    %521 = vector.broadcast %513 : vector<1x128xf32> to vector<8x128xf32>
    %522 = arith.addf %520, %521 : vector<8x128xf32>
    %523 = vector.extract_strided_slice %522 {offsets = [0, 0], sizes = [8, 96], strides = [1, 1]} : vector<8x128xf32> to vector<8x96xf32>
    %524 = arith.negf %523 : vector<8x96xf32>
    %525 = math.exp %524 : vector<8x96xf32>
    %cst_163 = arith.constant 1.000000e+00 : f32
    %526 = vector.broadcast %cst_163 : f32 to vector<8x96xf32>
    %527 = arith.addf %526, %525 : vector<8x96xf32>
    %528 = arith.divf %526, %527 : vector<8x96xf32>
    %529 = vector.extract_strided_slice %522 {offsets = [0, 96], sizes = [8, 32], strides = [1, 1]} : vector<8x128xf32> to vector<8x32xf32>
    %530 = math.tanh %529 : vector<8x32xf32>
    %531 = vector.extract_strided_slice %528 {offsets = [0, 0], sizes = [8, 32], strides = [1, 1]} : vector<8x96xf32> to vector<8x32xf32>
    %532 = vector.extract_strided_slice %528 {offsets = [0, 32], sizes = [8, 32], strides = [1, 1]} : vector<8x96xf32> to vector<8x32xf32>
    %533 = vector.extract_strided_slice %528 {offsets = [0, 64], sizes = [8, 32], strides = [1, 1]} : vector<8x96xf32> to vector<8x32xf32>
    %534 = arith.mulf %532, %249 : vector<8x32xf32>
    %535 = arith.mulf %531, %530 : vector<8x32xf32>
    %536 = arith.addf %534, %535 : vector<8x32xf32>
    %537 = math.tanh %536 : vector<8x32xf32>
    %538 = arith.mulf %533, %537 : vector<8x32xf32>
    %539 = tpu.concatenate %538, %503 in 1 : vector<8x32xf32>, vector<8x32xf32> -> vector<8x64xf32>
    %cst_164 = arith.constant dense<0.000000e+00> : vector<8x128xf32>
    %540 = tpu.matmul %539, %511, %cst_164 {dimension_numbers = #tpu.dot_dimension_numbers<[1], [0], [0], [1], [0, 0, 1, 1], [], []>} : vector<8x64xf32>, vector<64x128xf32>, vector<8x128xf32> -> vector<8x128xf32>
    %541 = vector.broadcast %515 : vector<1x128xf32> to vector<8x128xf32>
    %542 = arith.addf %540, %541 : vector<8x128xf32>
    %543 = vector.extract_strided_slice %542 {offsets = [0, 0], sizes = [8, 96], strides = [1, 1]} : vector<8x128xf32> to vector<8x96xf32>
    %544 = arith.negf %543 : vector<8x96xf32>
    %545 = math.exp %544 : vector<8x96xf32>
    %cst_165 = arith.constant 1.000000e+00 : f32
    %546 = vector.broadcast %cst_165 : f32 to vector<8x96xf32>
    %547 = arith.addf %546, %545 : vector<8x96xf32>
    %548 = arith.divf %546, %547 : vector<8x96xf32>
    %549 = vector.extract_strided_slice %542 {offsets = [0, 96], sizes = [8, 32], strides = [1, 1]} : vector<8x128xf32> to vector<8x32xf32>
    %550 = math.tanh %549 : vector<8x32xf32>
    %551 = vector.extract_strided_slice %548 {offsets = [0, 0], sizes = [8, 32], strides = [1, 1]} : vector<8x96xf32> to vector<8x32xf32>
    %552 = vector.extract_strided_slice %548 {offsets = [0, 32], sizes = [8, 32], strides = [1, 1]} : vector<8x96xf32> to vector<8x32xf32>
    %553 = vector.extract_strided_slice %548 {offsets = [0, 64], sizes = [8, 32], strides = [1, 1]} : vector<8x96xf32> to vector<8x32xf32>
    %554 = arith.mulf %552, %501 : vector<8x32xf32>
    %555 = arith.mulf %551, %550 : vector<8x32xf32>
    %556 = arith.addf %554, %555 : vector<8x32xf32>
    %557 = math.tanh %556 : vector<8x32xf32>
    %558 = arith.mulf %553, %557 : vector<8x32xf32>
    %cst_166 = arith.constant dense<0.000000e+00> : vector<8x32xf32>
    %559 = tpu.matmul %558, %516, %cst_166 {dimension_numbers = #tpu.dot_dimension_numbers<[1], [0], [0], [1], [0, 0, 1, 1], [], []>} : vector<8x32xf32>, vector<32x32xf32>, vector<8x32xf32> -> vector<8x32xf32>
    %560 = vector.broadcast %517 : vector<1x32xf32> to vector<8x32xf32>
    %561 = arith.addf %559, %560 : vector<8x32xf32>
    %c0_167 = arith.constant 0 : index
    %c32 = arith.constant 32 : index
    %562 = vector.load %arg10[%c0_167, %c32] : memref<8x256xf32, #tpu.memory_space<vmem>>, vector<8x32xf32>
    tpu.vector_store %arg10[%c0_167, %c32], %561 {strides = array<i32>} : memref<8x256xf32, #tpu.memory_space<vmem>>, vector<8x32xf32>,
    %c1_168 = arith.constant 1 : index
    %563 = memref.load %arg0[%c1_168] : memref<8xi32, #tpu.memory_space<smem>>
    %c0_i32_169 = arith.constant 0 : i32
    %564 = arith.cmpi ne, %563, %c0_i32_169 : i32
    %c8 = arith.constant 8 : index
    %c0_170 = arith.constant 0 : index
    %565 = vector.load %arg2[%c8, %c0_170] : memref<64x32xf32, #tpu.memory_space<vmem>>, vector<8x32xf32>
    %566 = arith.select %564, %565, %561 : vector<8x32xf32>
    %567 = tpu.concatenate %566, %538 in 1 : vector<8x32xf32>, vector<8x32xf32> -> vector<8x64xf32>
    %cst_171 = arith.constant dense<0.000000e+00> : vector<8x128xf32>
    %568 = tpu.matmul %567, %509, %cst_171 {dimension_numbers = #tpu.dot_dimension_numbers<[1], [0], [0], [1], [0, 0, 1, 1], [], []>} : vector<8x64xf32>, vector<64x128xf32>, vector<8x128xf32> -> vector<8x128xf32>
    %569 = vector.broadcast %513 : vector<1x128xf32> to vector<8x128xf32>
    %570 = arith.addf %568, %569 : vector<8x128xf32>
    %571 = vector.extract_strided_slice %570 {offsets = [0, 0], sizes = [8, 96], strides = [1, 1]} : vector<8x128xf32> to vector<8x96xf32>
    %572 = arith.negf %571 : vector<8x96xf32>
    %573 = math.exp %572 : vector<8x96xf32>
    %cst_172 = arith.constant 1.000000e+00 : f32
    %574 = vector.broadcast %cst_172 : f32 to vector<8x96xf32>
    %575 = arith.addf %574, %573 : vector<8x96xf32>
    %576 = arith.divf %574, %575 : vector<8x96xf32>
    %577 = vector.extract_strided_slice %570 {offsets = [0, 96], sizes = [8, 32], strides = [1, 1]} : vector<8x128xf32> to vector<8x32xf32>
    %578 = math.tanh %577 : vector<8x32xf32>
    %579 = vector.extract_strided_slice %576 {offsets = [0, 0], sizes = [8, 32], strides = [1, 1]} : vector<8x96xf32> to vector<8x32xf32>
    %580 = vector.extract_strided_slice %576 {offsets = [0, 32], sizes = [8, 32], strides = [1, 1]} : vector<8x96xf32> to vector<8x32xf32>
    %581 = vector.extract_strided_slice %576 {offsets = [0, 64], sizes = [8, 32], strides = [1, 1]} : vector<8x96xf32> to vector<8x32xf32>
    %582 = arith.mulf %580, %536 : vector<8x32xf32>
    %583 = arith.mulf %579, %578 : vector<8x32xf32>
    %584 = arith.addf %582, %583 : vector<8x32xf32>
    %585 = math.tanh %584 : vector<8x32xf32>
    %586 = arith.mulf %581, %585 : vector<8x32xf32>
    %587 = tpu.concatenate %586, %558 in 1 : vector<8x32xf32>, vector<8x32xf32> -> vector<8x64xf32>
    %cst_173 = arith.constant dense<0.000000e+00> : vector<8x128xf32>
    %588 = tpu.matmul %587, %511, %cst_173 {dimension_numbers = #tpu.dot_dimension_numbers<[1], [0], [0], [1], [0, 0, 1, 1], [], []>} : vector<8x64xf32>, vector<64x128xf32>, vector<8x128xf32> -> vector<8x128xf32>
    %589 = vector.broadcast %515 : vector<1x128xf32> to vector<8x128xf32>
    %590 = arith.addf %588, %589 : vector<8x128xf32>
    %591 = vector.extract_strided_slice %590 {offsets = [0, 0], sizes = [8, 96], strides = [1, 1]} : vector<8x128xf32> to vector<8x96xf32>
    %592 = arith.negf %591 : vector<8x96xf32>
    %593 = math.exp %592 : vector<8x96xf32>
    %cst_174 = arith.constant 1.000000e+00 : f32
    %594 = vector.broadcast %cst_174 : f32 to vector<8x96xf32>
    %595 = arith.addf %594, %593 : vector<8x96xf32>
    %596 = arith.divf %594, %595 : vector<8x96xf32>
    %597 = vector.extract_strided_slice %590 {offsets = [0, 96], sizes = [8, 32], strides = [1, 1]} : vector<8x128xf32> to vector<8x32xf32>
    %598 = math.tanh %597 : vector<8x32xf32>
    %599 = vector.extract_strided_slice %596 {offsets = [0, 0], sizes = [8, 32], strides = [1, 1]} : vector<8x96xf32> to vector<8x32xf32>
    %600 = vector.extract_strided_slice %596 {offsets = [0, 32], sizes = [8, 32], strides = [1, 1]} : vector<8x96xf32> to vector<8x32xf32>
    %601 = vector.extract_strided_slice %596 {offsets = [0, 64], sizes = [8, 32], strides = [1, 1]} : vector<8x96xf32> to vector<8x32xf32>
    %602 = arith.mulf %600, %556 : vector<8x32xf32>
    %603 = arith.mulf %599, %598 : vector<8x32xf32>
    %604 = arith.addf %602, %603 : vector<8x32xf32>
    %605 = math.tanh %604 : vector<8x32xf32>
    %606 = arith.mulf %601, %605 : vector<8x32xf32>
    %cst_175 = arith.constant dense<0.000000e+00> : vector<8x32xf32>
    %607 = tpu.matmul %606, %516, %cst_175 {dimension_numbers = #tpu.dot_dimension_numbers<[1], [0], [0], [1], [0, 0, 1, 1], [], []>} : vector<8x32xf32>, vector<32x32xf32>, vector<8x32xf32> -> vector<8x32xf32>
    %608 = vector.broadcast %517 : vector<1x32xf32> to vector<8x32xf32>
    %609 = arith.addf %607, %608 : vector<8x32xf32>
    %c0_176 = arith.constant 0 : index
    %c64 = arith.constant 64 : index
    %610 = vector.load %arg10[%c0_176, %c64] : memref<8x256xf32, #tpu.memory_space<vmem>>, vector<8x32xf32>
    tpu.vector_store %arg10[%c0_176, %c64], %609 {strides = array<i32>} : memref<8x256xf32, #tpu.memory_space<vmem>>, vector<8x32xf32>,
    %c2 = arith.constant 2 : index
    %611 = memref.load %arg0[%c2] : memref<8xi32, #tpu.memory_space<smem>>
    %c0_i32_177 = arith.constant 0 : i32
    %612 = arith.cmpi ne, %611, %c0_i32_177 : i32
    %c16 = arith.constant 16 : index
    %c0_178 = arith.constant 0 : index
    %613 = vector.load %arg2[%c16, %c0_178] : memref<64x32xf32, #tpu.memory_space<vmem>>, vector<8x32xf32>
    %614 = arith.select %612, %613, %609 : vector<8x32xf32>
    %615 = tpu.concatenate %614, %586 in 1 : vector<8x32xf32>, vector<8x32xf32> -> vector<8x64xf32>
    %cst_179 = arith.constant dense<0.000000e+00> : vector<8x128xf32>
    %616 = tpu.matmul %615, %509, %cst_179 {dimension_numbers = #tpu.dot_dimension_numbers<[1], [0], [0], [1], [0, 0, 1, 1], [], []>} : vector<8x64xf32>, vector<64x128xf32>, vector<8x128xf32> -> vector<8x128xf32>
    %617 = vector.broadcast %513 : vector<1x128xf32> to vector<8x128xf32>
    %618 = arith.addf %616, %617 : vector<8x128xf32>
    %619 = vector.extract_strided_slice %618 {offsets = [0, 0], sizes = [8, 96], strides = [1, 1]} : vector<8x128xf32> to vector<8x96xf32>
    %620 = arith.negf %619 : vector<8x96xf32>
    %621 = math.exp %620 : vector<8x96xf32>
    %cst_180 = arith.constant 1.000000e+00 : f32
    %622 = vector.broadcast %cst_180 : f32 to vector<8x96xf32>
    %623 = arith.addf %622, %621 : vector<8x96xf32>
    %624 = arith.divf %622, %623 : vector<8x96xf32>
    %625 = vector.extract_strided_slice %618 {offsets = [0, 96], sizes = [8, 32], strides = [1, 1]} : vector<8x128xf32> to vector<8x32xf32>
    %626 = math.tanh %625 : vector<8x32xf32>
    %627 = vector.extract_strided_slice %624 {offsets = [0, 0], sizes = [8, 32], strides = [1, 1]} : vector<8x96xf32> to vector<8x32xf32>
    %628 = vector.extract_strided_slice %624 {offsets = [0, 32], sizes = [8, 32], strides = [1, 1]} : vector<8x96xf32> to vector<8x32xf32>
    %629 = vector.extract_strided_slice %624 {offsets = [0, 64], sizes = [8, 32], strides = [1, 1]} : vector<8x96xf32> to vector<8x32xf32>
    %630 = arith.mulf %628, %584 : vector<8x32xf32>
    %631 = arith.mulf %627, %626 : vector<8x32xf32>
    %632 = arith.addf %630, %631 : vector<8x32xf32>
    %633 = math.tanh %632 : vector<8x32xf32>
    %634 = arith.mulf %629, %633 : vector<8x32xf32>
    %635 = tpu.concatenate %634, %606 in 1 : vector<8x32xf32>, vector<8x32xf32> -> vector<8x64xf32>
    %cst_181 = arith.constant dense<0.000000e+00> : vector<8x128xf32>
    %636 = tpu.matmul %635, %511, %cst_181 {dimension_numbers = #tpu.dot_dimension_numbers<[1], [0], [0], [1], [0, 0, 1, 1], [], []>} : vector<8x64xf32>, vector<64x128xf32>, vector<8x128xf32> -> vector<8x128xf32>
    %637 = vector.broadcast %515 : vector<1x128xf32> to vector<8x128xf32>
    %638 = arith.addf %636, %637 : vector<8x128xf32>
    %639 = vector.extract_strided_slice %638 {offsets = [0, 0], sizes = [8, 96], strides = [1, 1]} : vector<8x128xf32> to vector<8x96xf32>
    %640 = arith.negf %639 : vector<8x96xf32>
    %641 = math.exp %640 : vector<8x96xf32>
    %cst_182 = arith.constant 1.000000e+00 : f32
    %642 = vector.broadcast %cst_182 : f32 to vector<8x96xf32>
    %643 = arith.addf %642, %641 : vector<8x96xf32>
    %644 = arith.divf %642, %643 : vector<8x96xf32>
    %645 = vector.extract_strided_slice %638 {offsets = [0, 96], sizes = [8, 32], strides = [1, 1]} : vector<8x128xf32> to vector<8x32xf32>
    %646 = math.tanh %645 : vector<8x32xf32>
    %647 = vector.extract_strided_slice %644 {offsets = [0, 0], sizes = [8, 32], strides = [1, 1]} : vector<8x96xf32> to vector<8x32xf32>
    %648 = vector.extract_strided_slice %644 {offsets = [0, 32], sizes = [8, 32], strides = [1, 1]} : vector<8x96xf32> to vector<8x32xf32>
    %649 = vector.extract_strided_slice %644 {offsets = [0, 64], sizes = [8, 32], strides = [1, 1]} : vector<8x96xf32> to vector<8x32xf32>
    %650 = arith.mulf %648, %604 : vector<8x32xf32>
    %651 = arith.mulf %647, %646 : vector<8x32xf32>
    %652 = arith.addf %650, %651 : vector<8x32xf32>
    %653 = math.tanh %652 : vector<8x32xf32>
    %654 = arith.mulf %649, %653 : vector<8x32xf32>
    %cst_183 = arith.constant dense<0.000000e+00> : vector<8x32xf32>
    %655 = tpu.matmul %654, %516, %cst_183 {dimension_numbers = #tpu.dot_dimension_numbers<[1], [0], [0], [1], [0, 0, 1, 1], [], []>} : vector<8x32xf32>, vector<32x32xf32>, vector<8x32xf32> -> vector<8x32xf32>
    %656 = vector.broadcast %517 : vector<1x32xf32> to vector<8x32xf32>
    %657 = arith.addf %655, %656 : vector<8x32xf32>
    %c0_184 = arith.constant 0 : index
    %c96 = arith.constant 96 : index
    %658 = vector.load %arg10[%c0_184, %c96] : memref<8x256xf32, #tpu.memory_space<vmem>>, vector<8x32xf32>
    tpu.vector_store %arg10[%c0_184, %c96], %657 {strides = array<i32>} : memref<8x256xf32, #tpu.memory_space<vmem>>, vector<8x32xf32>,
    %c3 = arith.constant 3 : index
    %659 = memref.load %arg0[%c3] : memref<8xi32, #tpu.memory_space<smem>>
    %c0_i32_185 = arith.constant 0 : i32
    %660 = arith.cmpi ne, %659, %c0_i32_185 : i32
    %c24 = arith.constant 24 : index
    %c0_186 = arith.constant 0 : index
    %661 = vector.load %arg2[%c24, %c0_186] : memref<64x32xf32, #tpu.memory_space<vmem>>, vector<8x32xf32>
    %662 = arith.select %660, %661, %657 : vector<8x32xf32>
    %663 = tpu.concatenate %662, %634 in 1 : vector<8x32xf32>, vector<8x32xf32> -> vector<8x64xf32>
    %cst_187 = arith.constant dense<0.000000e+00> : vector<8x128xf32>
    %664 = tpu.matmul %663, %509, %cst_187 {dimension_numbers = #tpu.dot_dimension_numbers<[1], [0], [0], [1], [0, 0, 1, 1], [], []>} : vector<8x64xf32>, vector<64x128xf32>, vector<8x128xf32> -> vector<8x128xf32>
    %665 = vector.broadcast %513 : vector<1x128xf32> to vector<8x128xf32>
    %666 = arith.addf %664, %665 : vector<8x128xf32>
    %667 = vector.extract_strided_slice %666 {offsets = [0, 0], sizes = [8, 96], strides = [1, 1]} : vector<8x128xf32> to vector<8x96xf32>
    %668 = arith.negf %667 : vector<8x96xf32>
    %669 = math.exp %668 : vector<8x96xf32>
    %cst_188 = arith.constant 1.000000e+00 : f32
    %670 = vector.broadcast %cst_188 : f32 to vector<8x96xf32>
    %671 = arith.addf %670, %669 : vector<8x96xf32>
    %672 = arith.divf %670, %671 : vector<8x96xf32>
    %673 = vector.extract_strided_slice %666 {offsets = [0, 96], sizes = [8, 32], strides = [1, 1]} : vector<8x128xf32> to vector<8x32xf32>
    %674 = math.tanh %673 : vector<8x32xf32>
    %675 = vector.extract_strided_slice %672 {offsets = [0, 0], sizes = [8, 32], strides = [1, 1]} : vector<8x96xf32> to vector<8x32xf32>
    %676 = vector.extract_strided_slice %672 {offsets = [0, 32], sizes = [8, 32], strides = [1, 1]} : vector<8x96xf32> to vector<8x32xf32>
    %677 = vector.extract_strided_slice %672 {offsets = [0, 64], sizes = [8, 32], strides = [1, 1]} : vector<8x96xf32> to vector<8x32xf32>
    %678 = arith.mulf %676, %632 : vector<8x32xf32>
    %679 = arith.mulf %675, %674 : vector<8x32xf32>
    %680 = arith.addf %678, %679 : vector<8x32xf32>
    %681 = math.tanh %680 : vector<8x32xf32>
    %682 = arith.mulf %677, %681 : vector<8x32xf32>
    %683 = tpu.concatenate %682, %654 in 1 : vector<8x32xf32>, vector<8x32xf32> -> vector<8x64xf32>
    %cst_189 = arith.constant dense<0.000000e+00> : vector<8x128xf32>
    %684 = tpu.matmul %683, %511, %cst_189 {dimension_numbers = #tpu.dot_dimension_numbers<[1], [0], [0], [1], [0, 0, 1, 1], [], []>} : vector<8x64xf32>, vector<64x128xf32>, vector<8x128xf32> -> vector<8x128xf32>
    %685 = vector.broadcast %515 : vector<1x128xf32> to vector<8x128xf32>
    %686 = arith.addf %684, %685 : vector<8x128xf32>
    %687 = vector.extract_strided_slice %686 {offsets = [0, 0], sizes = [8, 96], strides = [1, 1]} : vector<8x128xf32> to vector<8x96xf32>
    %688 = arith.negf %687 : vector<8x96xf32>
    %689 = math.exp %688 : vector<8x96xf32>
    %cst_190 = arith.constant 1.000000e+00 : f32
    %690 = vector.broadcast %cst_190 : f32 to vector<8x96xf32>
    %691 = arith.addf %690, %689 : vector<8x96xf32>
    %692 = arith.divf %690, %691 : vector<8x96xf32>
    %693 = vector.extract_strided_slice %686 {offsets = [0, 96], sizes = [8, 32], strides = [1, 1]} : vector<8x128xf32> to vector<8x32xf32>
    %694 = math.tanh %693 : vector<8x32xf32>
    %695 = vector.extract_strided_slice %692 {offsets = [0, 0], sizes = [8, 32], strides = [1, 1]} : vector<8x96xf32> to vector<8x32xf32>
    %696 = vector.extract_strided_slice %692 {offsets = [0, 32], sizes = [8, 32], strides = [1, 1]} : vector<8x96xf32> to vector<8x32xf32>
    %697 = vector.extract_strided_slice %692 {offsets = [0, 64], sizes = [8, 32], strides = [1, 1]} : vector<8x96xf32> to vector<8x32xf32>
    %698 = arith.mulf %696, %652 : vector<8x32xf32>
    %699 = arith.mulf %695, %694 : vector<8x32xf32>
    %700 = arith.addf %698, %699 : vector<8x32xf32>
    %701 = math.tanh %700 : vector<8x32xf32>
    %702 = arith.mulf %697, %701 : vector<8x32xf32>
    %cst_191 = arith.constant dense<0.000000e+00> : vector<8x32xf32>
    %703 = tpu.matmul %702, %516, %cst_191 {dimension_numbers = #tpu.dot_dimension_numbers<[1], [0], [0], [1], [0, 0, 1, 1], [], []>} : vector<8x32xf32>, vector<32x32xf32>, vector<8x32xf32> -> vector<8x32xf32>
    %704 = vector.broadcast %517 : vector<1x32xf32> to vector<8x32xf32>
    %705 = arith.addf %703, %704 : vector<8x32xf32>
    %c0_192 = arith.constant 0 : index
    %c128 = arith.constant 128 : index
    %706 = vector.load %arg10[%c0_192, %c128] : memref<8x256xf32, #tpu.memory_space<vmem>>, vector<8x32xf32>
    tpu.vector_store %arg10[%c0_192, %c128], %705 {strides = array<i32>} : memref<8x256xf32, #tpu.memory_space<vmem>>, vector<8x32xf32>,
    %c4 = arith.constant 4 : index
    %707 = memref.load %arg0[%c4] : memref<8xi32, #tpu.memory_space<smem>>
    %c0_i32_193 = arith.constant 0 : i32
    %708 = arith.cmpi ne, %707, %c0_i32_193 : i32
    %c32_194 = arith.constant 32 : index
    %c0_195 = arith.constant 0 : index
    %709 = vector.load %arg2[%c32_194, %c0_195] : memref<64x32xf32, #tpu.memory_space<vmem>>, vector<8x32xf32>
    %710 = arith.select %708, %709, %705 : vector<8x32xf32>
    %711 = tpu.concatenate %710, %682 in 1 : vector<8x32xf32>, vector<8x32xf32> -> vector<8x64xf32>
    %cst_196 = arith.constant dense<0.000000e+00> : vector<8x128xf32>
    %712 = tpu.matmul %711, %509, %cst_196 {dimension_numbers = #tpu.dot_dimension_numbers<[1], [0], [0], [1], [0, 0, 1, 1], [], []>} : vector<8x64xf32>, vector<64x128xf32>, vector<8x128xf32> -> vector<8x128xf32>
    %713 = vector.broadcast %513 : vector<1x128xf32> to vector<8x128xf32>
    %714 = arith.addf %712, %713 : vector<8x128xf32>
    %715 = vector.extract_strided_slice %714 {offsets = [0, 0], sizes = [8, 96], strides = [1, 1]} : vector<8x128xf32> to vector<8x96xf32>
    %716 = arith.negf %715 : vector<8x96xf32>
    %717 = math.exp %716 : vector<8x96xf32>
    %cst_197 = arith.constant 1.000000e+00 : f32
    %718 = vector.broadcast %cst_197 : f32 to vector<8x96xf32>
    %719 = arith.addf %718, %717 : vector<8x96xf32>
    %720 = arith.divf %718, %719 : vector<8x96xf32>
    %721 = vector.extract_strided_slice %714 {offsets = [0, 96], sizes = [8, 32], strides = [1, 1]} : vector<8x128xf32> to vector<8x32xf32>
    %722 = math.tanh %721 : vector<8x32xf32>
    %723 = vector.extract_strided_slice %720 {offsets = [0, 0], sizes = [8, 32], strides = [1, 1]} : vector<8x96xf32> to vector<8x32xf32>
    %724 = vector.extract_strided_slice %720 {offsets = [0, 32], sizes = [8, 32], strides = [1, 1]} : vector<8x96xf32> to vector<8x32xf32>
    %725 = vector.extract_strided_slice %720 {offsets = [0, 64], sizes = [8, 32], strides = [1, 1]} : vector<8x96xf32> to vector<8x32xf32>
    %726 = arith.mulf %724, %680 : vector<8x32xf32>
    %727 = arith.mulf %723, %722 : vector<8x32xf32>
    %728 = arith.addf %726, %727 : vector<8x32xf32>
    %729 = math.tanh %728 : vector<8x32xf32>
    %730 = arith.mulf %725, %729 : vector<8x32xf32>
    %731 = tpu.concatenate %730, %702 in 1 : vector<8x32xf32>, vector<8x32xf32> -> vector<8x64xf32>
    %cst_198 = arith.constant dense<0.000000e+00> : vector<8x128xf32>
    %732 = tpu.matmul %731, %511, %cst_198 {dimension_numbers = #tpu.dot_dimension_numbers<[1], [0], [0], [1], [0, 0, 1, 1], [], []>} : vector<8x64xf32>, vector<64x128xf32>, vector<8x128xf32> -> vector<8x128xf32>
    %733 = vector.broadcast %515 : vector<1x128xf32> to vector<8x128xf32>
    %734 = arith.addf %732, %733 : vector<8x128xf32>
    %735 = vector.extract_strided_slice %734 {offsets = [0, 0], sizes = [8, 96], strides = [1, 1]} : vector<8x128xf32> to vector<8x96xf32>
    %736 = arith.negf %735 : vector<8x96xf32>
    %737 = math.exp %736 : vector<8x96xf32>
    %cst_199 = arith.constant 1.000000e+00 : f32
    %738 = vector.broadcast %cst_199 : f32 to vector<8x96xf32>
    %739 = arith.addf %738, %737 : vector<8x96xf32>
    %740 = arith.divf %738, %739 : vector<8x96xf32>
    %741 = vector.extract_strided_slice %734 {offsets = [0, 96], sizes = [8, 32], strides = [1, 1]} : vector<8x128xf32> to vector<8x32xf32>
    %742 = math.tanh %741 : vector<8x32xf32>
    %743 = vector.extract_strided_slice %740 {offsets = [0, 0], sizes = [8, 32], strides = [1, 1]} : vector<8x96xf32> to vector<8x32xf32>
    %744 = vector.extract_strided_slice %740 {offsets = [0, 32], sizes = [8, 32], strides = [1, 1]} : vector<8x96xf32> to vector<8x32xf32>
    %745 = vector.extract_strided_slice %740 {offsets = [0, 64], sizes = [8, 32], strides = [1, 1]} : vector<8x96xf32> to vector<8x32xf32>
    %746 = arith.mulf %744, %700 : vector<8x32xf32>
    %747 = arith.mulf %743, %742 : vector<8x32xf32>
    %748 = arith.addf %746, %747 : vector<8x32xf32>
    %749 = math.tanh %748 : vector<8x32xf32>
    %750 = arith.mulf %745, %749 : vector<8x32xf32>
    %cst_200 = arith.constant dense<0.000000e+00> : vector<8x32xf32>
    %751 = tpu.matmul %750, %516, %cst_200 {dimension_numbers = #tpu.dot_dimension_numbers<[1], [0], [0], [1], [0, 0, 1, 1], [], []>} : vector<8x32xf32>, vector<32x32xf32>, vector<8x32xf32> -> vector<8x32xf32>
    %752 = vector.broadcast %517 : vector<1x32xf32> to vector<8x32xf32>
    %753 = arith.addf %751, %752 : vector<8x32xf32>
    %c0_201 = arith.constant 0 : index
    %c160 = arith.constant 160 : index
    %754 = vector.load %arg10[%c0_201, %c160] : memref<8x256xf32, #tpu.memory_space<vmem>>, vector<8x32xf32>
    tpu.vector_store %arg10[%c0_201, %c160], %753 {strides = array<i32>} : memref<8x256xf32, #tpu.memory_space<vmem>>, vector<8x32xf32>,
    %c5 = arith.constant 5 : index
    %755 = memref.load %arg0[%c5] : memref<8xi32, #tpu.memory_space<smem>>
    %c0_i32_202 = arith.constant 0 : i32
    %756 = arith.cmpi ne, %755, %c0_i32_202 : i32
    %c40 = arith.constant 40 : index
    %c0_203 = arith.constant 0 : index
    %757 = vector.load %arg2[%c40, %c0_203] : memref<64x32xf32, #tpu.memory_space<vmem>>, vector<8x32xf32>
    %758 = arith.select %756, %757, %753 : vector<8x32xf32>
    %759 = tpu.concatenate %758, %730 in 1 : vector<8x32xf32>, vector<8x32xf32> -> vector<8x64xf32>
    %cst_204 = arith.constant dense<0.000000e+00> : vector<8x128xf32>
    %760 = tpu.matmul %759, %509, %cst_204 {dimension_numbers = #tpu.dot_dimension_numbers<[1], [0], [0], [1], [0, 0, 1, 1], [], []>} : vector<8x64xf32>, vector<64x128xf32>, vector<8x128xf32> -> vector<8x128xf32>
    %761 = vector.broadcast %513 : vector<1x128xf32> to vector<8x128xf32>
    %762 = arith.addf %760, %761 : vector<8x128xf32>
    %763 = vector.extract_strided_slice %762 {offsets = [0, 0], sizes = [8, 96], strides = [1, 1]} : vector<8x128xf32> to vector<8x96xf32>
    %764 = arith.negf %763 : vector<8x96xf32>
    %765 = math.exp %764 : vector<8x96xf32>
    %cst_205 = arith.constant 1.000000e+00 : f32
    %766 = vector.broadcast %cst_205 : f32 to vector<8x96xf32>
    %767 = arith.addf %766, %765 : vector<8x96xf32>
    %768 = arith.divf %766, %767 : vector<8x96xf32>
    %769 = vector.extract_strided_slice %762 {offsets = [0, 96], sizes = [8, 32], strides = [1, 1]} : vector<8x128xf32> to vector<8x32xf32>
    %770 = math.tanh %769 : vector<8x32xf32>
    %771 = vector.extract_strided_slice %768 {offsets = [0, 0], sizes = [8, 32], strides = [1, 1]} : vector<8x96xf32> to vector<8x32xf32>
    %772 = vector.extract_strided_slice %768 {offsets = [0, 32], sizes = [8, 32], strides = [1, 1]} : vector<8x96xf32> to vector<8x32xf32>
    %773 = vector.extract_strided_slice %768 {offsets = [0, 64], sizes = [8, 32], strides = [1, 1]} : vector<8x96xf32> to vector<8x32xf32>
    %774 = arith.mulf %772, %728 : vector<8x32xf32>
    %775 = arith.mulf %771, %770 : vector<8x32xf32>
    %776 = arith.addf %774, %775 : vector<8x32xf32>
    %777 = math.tanh %776 : vector<8x32xf32>
    %778 = arith.mulf %773, %777 : vector<8x32xf32>
    %779 = tpu.concatenate %778, %750 in 1 : vector<8x32xf32>, vector<8x32xf32> -> vector<8x64xf32>
    %cst_206 = arith.constant dense<0.000000e+00> : vector<8x128xf32>
    %780 = tpu.matmul %779, %511, %cst_206 {dimension_numbers = #tpu.dot_dimension_numbers<[1], [0], [0], [1], [0, 0, 1, 1], [], []>} : vector<8x64xf32>, vector<64x128xf32>, vector<8x128xf32> -> vector<8x128xf32>
    %781 = vector.broadcast %515 : vector<1x128xf32> to vector<8x128xf32>
    %782 = arith.addf %780, %781 : vector<8x128xf32>
    %783 = vector.extract_strided_slice %782 {offsets = [0, 0], sizes = [8, 96], strides = [1, 1]} : vector<8x128xf32> to vector<8x96xf32>
    %784 = arith.negf %783 : vector<8x96xf32>
    %785 = math.exp %784 : vector<8x96xf32>
    %cst_207 = arith.constant 1.000000e+00 : f32
    %786 = vector.broadcast %cst_207 : f32 to vector<8x96xf32>
    %787 = arith.addf %786, %785 : vector<8x96xf32>
    %788 = arith.divf %786, %787 : vector<8x96xf32>
    %789 = vector.extract_strided_slice %782 {offsets = [0, 96], sizes = [8, 32], strides = [1, 1]} : vector<8x128xf32> to vector<8x32xf32>
    %790 = math.tanh %789 : vector<8x32xf32>
    %791 = vector.extract_strided_slice %788 {offsets = [0, 0], sizes = [8, 32], strides = [1, 1]} : vector<8x96xf32> to vector<8x32xf32>
    %792 = vector.extract_strided_slice %788 {offsets = [0, 32], sizes = [8, 32], strides = [1, 1]} : vector<8x96xf32> to vector<8x32xf32>
    %793 = vector.extract_strided_slice %788 {offsets = [0, 64], sizes = [8, 32], strides = [1, 1]} : vector<8x96xf32> to vector<8x32xf32>
    %794 = arith.mulf %792, %748 : vector<8x32xf32>
    %795 = arith.mulf %791, %790 : vector<8x32xf32>
    %796 = arith.addf %794, %795 : vector<8x32xf32>
    %797 = math.tanh %796 : vector<8x32xf32>
    %798 = arith.mulf %793, %797 : vector<8x32xf32>
    %cst_208 = arith.constant dense<0.000000e+00> : vector<8x32xf32>
    %799 = tpu.matmul %798, %516, %cst_208 {dimension_numbers = #tpu.dot_dimension_numbers<[1], [0], [0], [1], [0, 0, 1, 1], [], []>} : vector<8x32xf32>, vector<32x32xf32>, vector<8x32xf32> -> vector<8x32xf32>
    %800 = vector.broadcast %517 : vector<1x32xf32> to vector<8x32xf32>
    %801 = arith.addf %799, %800 : vector<8x32xf32>
    %c0_209 = arith.constant 0 : index
    %c192 = arith.constant 192 : index
    %802 = vector.load %arg10[%c0_209, %c192] : memref<8x256xf32, #tpu.memory_space<vmem>>, vector<8x32xf32>
    tpu.vector_store %arg10[%c0_209, %c192], %801 {strides = array<i32>} : memref<8x256xf32, #tpu.memory_space<vmem>>, vector<8x32xf32>,
    %c6 = arith.constant 6 : index
    %803 = memref.load %arg0[%c6] : memref<8xi32, #tpu.memory_space<smem>>
    %c0_i32_210 = arith.constant 0 : i32
    %804 = arith.cmpi ne, %803, %c0_i32_210 : i32
    %c48 = arith.constant 48 : index
    %c0_211 = arith.constant 0 : index
    %805 = vector.load %arg2[%c48, %c0_211] : memref<64x32xf32, #tpu.memory_space<vmem>>, vector<8x32xf32>
    %806 = arith.select %804, %805, %801 : vector<8x32xf32>
    %807 = tpu.concatenate %806, %778 in 1 : vector<8x32xf32>, vector<8x32xf32> -> vector<8x64xf32>
    %cst_212 = arith.constant dense<0.000000e+00> : vector<8x128xf32>
    %808 = tpu.matmul %807, %509, %cst_212 {dimension_numbers = #tpu.dot_dimension_numbers<[1], [0], [0], [1], [0, 0, 1, 1], [], []>} : vector<8x64xf32>, vector<64x128xf32>, vector<8x128xf32> -> vector<8x128xf32>
    %809 = vector.broadcast %513 : vector<1x128xf32> to vector<8x128xf32>
    %810 = arith.addf %808, %809 : vector<8x128xf32>
    %811 = vector.extract_strided_slice %810 {offsets = [0, 0], sizes = [8, 96], strides = [1, 1]} : vector<8x128xf32> to vector<8x96xf32>
    %812 = arith.negf %811 : vector<8x96xf32>
    %813 = math.exp %812 : vector<8x96xf32>
    %cst_213 = arith.constant 1.000000e+00 : f32
    %814 = vector.broadcast %cst_213 : f32 to vector<8x96xf32>
    %815 = arith.addf %814, %813 : vector<8x96xf32>
    %816 = arith.divf %814, %815 : vector<8x96xf32>
    %817 = vector.extract_strided_slice %810 {offsets = [0, 96], sizes = [8, 32], strides = [1, 1]} : vector<8x128xf32> to vector<8x32xf32>
    %818 = math.tanh %817 : vector<8x32xf32>
    %819 = vector.extract_strided_slice %816 {offsets = [0, 0], sizes = [8, 32], strides = [1, 1]} : vector<8x96xf32> to vector<8x32xf32>
    %820 = vector.extract_strided_slice %816 {offsets = [0, 32], sizes = [8, 32], strides = [1, 1]} : vector<8x96xf32> to vector<8x32xf32>
    %821 = vector.extract_strided_slice %816 {offsets = [0, 64], sizes = [8, 32], strides = [1, 1]} : vector<8x96xf32> to vector<8x32xf32>
    %822 = arith.mulf %820, %776 : vector<8x32xf32>
    %823 = arith.mulf %819, %818 : vector<8x32xf32>
    %824 = arith.addf %822, %823 : vector<8x32xf32>
    %825 = math.tanh %824 : vector<8x32xf32>
    %826 = arith.mulf %821, %825 : vector<8x32xf32>
    %827 = tpu.concatenate %826, %798 in 1 : vector<8x32xf32>, vector<8x32xf32> -> vector<8x64xf32>
    %cst_214 = arith.constant dense<0.000000e+00> : vector<8x128xf32>
    %828 = tpu.matmul %827, %511, %cst_214 {dimension_numbers = #tpu.dot_dimension_numbers<[1], [0], [0], [1], [0, 0, 1, 1], [], []>} : vector<8x64xf32>, vector<64x128xf32>, vector<8x128xf32> -> vector<8x128xf32>
    %829 = vector.broadcast %515 : vector<1x128xf32> to vector<8x128xf32>
    %830 = arith.addf %828, %829 : vector<8x128xf32>
    %831 = vector.extract_strided_slice %830 {offsets = [0, 0], sizes = [8, 96], strides = [1, 1]} : vector<8x128xf32> to vector<8x96xf32>
    %832 = arith.negf %831 : vector<8x96xf32>
    %833 = math.exp %832 : vector<8x96xf32>
    %cst_215 = arith.constant 1.000000e+00 : f32
    %834 = vector.broadcast %cst_215 : f32 to vector<8x96xf32>
    %835 = arith.addf %834, %833 : vector<8x96xf32>
    %836 = arith.divf %834, %835 : vector<8x96xf32>
    %837 = vector.extract_strided_slice %830 {offsets = [0, 96], sizes = [8, 32], strides = [1, 1]} : vector<8x128xf32> to vector<8x32xf32>
    %838 = math.tanh %837 : vector<8x32xf32>
    %839 = vector.extract_strided_slice %836 {offsets = [0, 0], sizes = [8, 32], strides = [1, 1]} : vector<8x96xf32> to vector<8x32xf32>
    %840 = vector.extract_strided_slice %836 {offsets = [0, 32], sizes = [8, 32], strides = [1, 1]} : vector<8x96xf32> to vector<8x32xf32>
    %841 = vector.extract_strided_slice %836 {offsets = [0, 64], sizes = [8, 32], strides = [1, 1]} : vector<8x96xf32> to vector<8x32xf32>
    %842 = arith.mulf %840, %796 : vector<8x32xf32>
    %843 = arith.mulf %839, %838 : vector<8x32xf32>
    %844 = arith.addf %842, %843 : vector<8x32xf32>
    %845 = math.tanh %844 : vector<8x32xf32>
    %846 = arith.mulf %841, %845 : vector<8x32xf32>
    %cst_216 = arith.constant dense<0.000000e+00> : vector<8x32xf32>
    %847 = tpu.matmul %846, %516, %cst_216 {dimension_numbers = #tpu.dot_dimension_numbers<[1], [0], [0], [1], [0, 0, 1, 1], [], []>} : vector<8x32xf32>, vector<32x32xf32>, vector<8x32xf32> -> vector<8x32xf32>
    %848 = vector.broadcast %517 : vector<1x32xf32> to vector<8x32xf32>
    %849 = arith.addf %847, %848 : vector<8x32xf32>
    %c0_217 = arith.constant 0 : index
    %c224 = arith.constant 224 : index
    %850 = vector.load %arg10[%c0_217, %c224] : memref<8x256xf32, #tpu.memory_space<vmem>>, vector<8x32xf32>
    tpu.vector_store %arg10[%c0_217, %c224], %849 {strides = array<i32>} : memref<8x256xf32, #tpu.memory_space<vmem>>, vector<8x32xf32>,
    return
  }
}

</mosaic_0001>

<bundles_post_ra>
// kernel: seq2seq_forward.1
= control target key start
LH: loop header
LB: loop body
LE: loop exit
PB: predicated region body
PF: predicated region fallthrough
CT: control target
= control target key end

     0   :  { %15 = vsyncpa [#allocation6], 0  ;;  %s4268_s0 = inlined_call_operand.vmem [shape: s32[8], index: 0, kind: input, shape index: {}]   ;;  %s4269_s1 = inlined_call_operand.vmem [shape: f32[80,32], index: 1, kind: input, shape index: {}]   ;;  %s4270_s2 = inlined_call_operand.vmem [shape: f32[64,32], index: 2, kind: input, shape index: {}]   ;;  %s4271_s3 = inlined_call_operand.vmem [shape: f32[2,32,128], index: 3, kind: input, shape index: {}]   ;;  %s4272_s4 = inlined_call_operand.hbm [shape: f32[2,32,128], index: 4, kind: input, shape index: {}]   ;;  %s4273_s5 = inlined_call_operand.vmem [shape: f32[2,1,128], index: 5, kind: input, shape index: {}]   ;;  %s4274_s6 = inlined_call_operand.vmem [shape: f32[2,64,128], index: 6, kind: input, shape index: {}]   ;;  %s4275_s7 = inlined_call_operand.vmem [shape: f32[2,1,128], index: 7, kind: input, shape index: {}]   ;;  %s4276_s8 = inlined_call_operand.vmem [shape: f32[32,32], index: 8, kind: input, shape index: {}]   ;;  %s4277_s9 = inlined_call_operand.vmem [shape: f32[1,32], index: 9, kind: input, shape index: {}]   ;;  %s4278_s10 = inlined_call_operand.vmem [shape: f32[8,256], index: 10, kind: output, shape index: {}]  }
   0x1   :  { %s22_s15 = sshll.u32 %s4268_s0, 4  ;;  %s23_s15 = int_to_ptr.vmem [resolvable:$true] %s22_s15 }
   0x2   :  { %16 = vsyncpa [#allocation5], 0  ;;  %s36_s18 = sshll.u32 %s4272_s4, 4  ;;  %s3295_s19 = smov [#allocation4]   ;;  %s37_s18 = int_to_ptr.hbm [resolvable:$true] %s36_s18 }
   0x3   :  { %25 = dma.vmem_to_smem %s23_s15, 16, %s3295_s19, [#allocation6]  }
   0x4   :  { %s3296_s20 = smov [#allocation7]   ;;  %s3297_s22 = smov 128  }
   0x5   :  { %s38_s21 = sshll.u32 %s3296_s20, 4  ;;  %s3298_s23 = smov 8   ;;  %s39_s21 = int_to_ptr.vmem [resolvable:$true] %s38_s21 }
   0x6   :  { %44 = dma.hbm_to_vmem [thread:$0]  %s37_s18, 1024, %s39_s21, [#allocation5], %s3297_s22, %s3297_s22, %s3298_s23  }
   0x7   :  { %3291 = dma.done.wait [#allocation6], 16  }
   0x8   :  { %3292 = vsyncadd [#allocation6], 4294967280 }
   0x9   :  { %3293 = dma.done.wait [#allocation5], 1024  }
   0xa   :  { %3294 = vsyncadd [#allocation5], 4294966272 }
   0xb   :  { %63 = sfence }
   0xc   :  { %v88_v0 = vld [vmem:[%s4271_s3 + $0x18] sm:$0xff]  ;;  %v87_v1 = vld [vmem:[%s4271_s3 + $0x10] sm:$0xff]  ;;  %v3370_v2 = vld [vmem:[#allocation7 + $0x18] sm:$0xff]  ;;  %vm64_vm0 = vcmask 261120   ;;  %v3299_v4 = vmov 0.0   ;;  %s3300_s18 = smov 32  }
   0xd   :  { %135 = vmatpush.msra.mxu0 %v88_v0  ;;  %200 = vmatpush.msra.mxu1 %v3370_v2  ;;  %v3373_v3 = vld [vmem:[#allocation7 + $0x10] sm:$0xff]  ;;  %65 = vst.msk [vmem:[#allocation3] sm:$0xff] %vm64_vm0, %v3299_v4  ;;  %v86_v5 = vld [vmem:[%s4271_s3 + $0x8] sm:$0xff]  ;;  %v3380_v6 = vld [vmem:[#allocation7 + $0x8] sm:$0xff]  ;;  %s3301_s19 = smov 64   ;;  %s3302_s26 = smov 96  }
   0xe   :  { %66 = vst.msk [vmem:[#allocation3 + $0x8] sm:$0xff] %vm64_vm0, %v3299_v4  ;;  %267 = vmatpush.msra.mxu2 %v3370_v2  ;;  %335 = vmatpush.msra.mxu3 %v3370_v2  ;;  %v85_v7 = vld [vmem:[%s4271_s3] sm:$0xff]  ;;  %v3392_v8 = vld [vmem:[#allocation7] sm:$0xff]  ;;  %v76_v37 = vld [vmem:[%s4269_s1 + $0x8] sm:$0xff]  ;;  %s2935_s15 = sld [smem:[#allocation4 + $0x2]] }
   0xf   :  { %136 = vmatpush.msra.mxu0 %v87_v1  ;;  %201 = vmatpush.msra.mxu1 %v3373_v3  ;;  %67 = vst.msk [vmem:[#allocation3 + $0x10] sm:$0xff] %vm64_vm0, %v3299_v4  ;;  %v75_v9 = vld [vmem:[%s4269_s1] sm:$0xff]  ;;  %v77_v1 = vld [vmem:[%s4269_s1 + $0x10] sm:$0xff]  ;;  %s2941_s21 = sld [smem:[#allocation4 + $0x3]] }
  0x10   :  { %68 = vst.msk [vmem:[#allocation3 + $0x18] sm:$0xff] %vm64_vm0, %v3299_v4  ;;  %268 = vmatpush.msra.mxu2 %v3373_v3  ;;  %336 = vmatpush.msra.mxu3 %v3373_v3  ;;  %v3448_v10 = vld [vmem:[%s4273_s5] ss:$0 sm:$0xff]  ;;  %s2953_s28 = sld [smem:[#allocation4 + $0x5]] }
  0x11   :  { %137 = vmatpush.msra.mxu0 %v86_v5  ;;  %202 = vmatpush.msra.mxu1 %v3380_v6  ;;  %69 = vst.msk [vmem:[#allocation3 + $0x20] sm:$0xff] %vm64_vm0, %v3299_v4 }
  0x12   :  { %70 = vst.msk [vmem:[#allocation3 + $0x28] sm:$0xff] %vm64_vm0, %v3299_v4  ;;  %269 = vmatpush.msra.mxu2 %v3380_v6  ;;  %337 = vmatpush.msra.mxu3 %v3380_v6 }
  0x13   :  { %138 = vmatpush.msra.mxu0 %v85_v7  ;;  %203 = vmatpush.msra.mxu1 %v3392_v8  ;;  %71 = vst.msk [vmem:[#allocation3 + $0x30] sm:$0xff] %vm64_vm0, %v3299_v4 }
  0x14   :  { %2852 = vmatmul.msk.f32.vlgmr.msra.gmra.mxu0 %vm64_vm0, %v75_v9  ;;  %204 = vmatmul.f32.vlgmr.msra.gmra.mxu1 %v3299_v4  ;;  %72 = vst.msk [vmem:[#allocation3 + $0x38] sm:$0xff] %vm64_vm0, %v3299_v4  ;;  %p2005_p1 = scmp.ne.s32.totalorder %s2935_s15, 0 }
  0x15   :  { %73 = vst.msk [vmem:[#allocation3 + $0x40] sm:$0xff] %vm64_vm0, %v3299_v4  ;;  %270 = vmatpush.msra.mxu2 %v3392_v8  ;;  %338 = vmatpush.msra.mxu3 %v3392_v8  ;;  %p2175_p2 = scmp.ne.s32.totalorder %s2941_s21, 0 }
  0x16   :  { %74 = vst.msk [vmem:[#allocation3 + $0x48] sm:$0xff] %vm64_vm0, %v3299_v4  ;;  %403 = vmatpush.msrb.mxu1 %v3370_v2  ;;  %s2007_s16 = scalar_select %p2005_p1, 1, 0 }
  0x17   :  { %471 = vmatpush.msrb.mxu2 %v3370_v2  ;;  %1633 = vst [vmem:[%s4278_s10] sm:$0xff] %v3299_v4  ;;  %539 = vmatpush.msrb.mxu3 %v3370_v2  ;;  %p2509_p4 = scmp.ne.s32.totalorder %s2953_s28, 0 }
  0x18   :  { %1634 = vst [vmem:[%s4278_s10 + $0x8] sm:$0xff] %v3299_v4  ;;  %404 = vmatpush.msrb.mxu1 %v3373_v3 }
  0x19   :  { %472 = vmatpush.msrb.mxu2 %v3373_v3  ;;  %540 = vmatpush.msrb.mxu3 %v3373_v3  ;;  %s2511_s29 = scalar_select %p2509_p4, 1, 0 }
  0x1a   :  { %405 = vmatpush.msrb.mxu1 %v3380_v6 }
  0x1b   :  { %473 = vmatpush.msrb.mxu2 %v3380_v6  ;;  %541 = vmatpush.msrb.mxu3 %v3380_v6 }
  0x1c   :  { %406 = vmatpush.msrb.mxu1 %v3392_v8  ;;  %2853 = vmatmul.msk.f32.gmra.mxu0 %vm64_vm0, %v76_v37 }
  0x1d   :  { %474 = vmatpush.msrb.mxu2 %v3392_v8  ;;  %542 = vmatpush.msrb.mxu3 %v3392_v8 }
  0x1e   :  { %607 = vmatpush.msra.mxu1 %v3370_v2 }
  0x20   :  { %608 = vmatpush.msra.mxu1 %v3373_v3 }
  0x22   :  { %609 = vmatpush.msra.mxu1 %v3380_v6 }
  0x24   :  { %610 = vmatpush.msra.mxu1 %v3392_v8  ;;  %2854 = vmatmul.msk.f32.gmra.mxu0 %vm64_vm0, %v77_v1 }
  0x91   :  { %v140_v11 = vpop.f32.mrf.mxu0  ;;  %v205_v12 = vpop.f32.mrf.mxu1 }
  0x92   :  { %v141_v13 = vadd.f32 %v3448_v10, %v140_v11 }
  0x94   :  { %v208_v14 = vadd.f32 %v205_v12, %v141_v13 }
  0x96   :  { %2978 = vtanh.f32 %v208_v14  ;;  %v2862_v16 = vmul.f32 -1.442695, %v208_v14 }
  0x98   :  { %2980 = vpow2.f32 %v2862_v16 }
  0x99   :  { %v143_v39 = vpop.f32.mrf.mxu0 }
  0x9a   :  { %v144_v40 = vadd.f32 %v3448_v10, %v143_v39 }
  0x9c   :  { %v2979_v15 = vpop.eup %2978 }
  0x9d   :  { %231 = vrot.lane.b32.xlu0 %v2979_v15, %s3300_s18 }
  0x9e   :  { %v2981_v17 = vpop.eup %2980 }
  0x9f   :  { %v212_v18 = vadd.f32 1.0, %v2981_v17 }
  0xa1   :  { %2982 = vrcp.f32 %v212_v18  ;;  %v224_v24 = vand.u32 2147483648, %v212_v18  ;;  %vm218_vm2 = vweird.f32 %v212_v18  ;;  %v222_v25 = vand.u32 2147483647, %v212_v18  ;;  %v146_v7 = vpop.f32.mrf.mxu0 }
  0xa2   :  { %v147_v9 = vadd.f32 %v3448_v10, %v146_v7 }
  0xa3   :  { %v225_v27 = vor.u32 1.1754944e-38, %v224_v24  ;;  %vm223_vm4 = vcmp.eq.f32.partialorder %v222_v25, 8.507059e+37 }
  0xa7   :  { %v2983_v19 = vpop.eup %2982 }
  0xa8   :  { %v214_v20 = vmul.f32 %v2983_v19, %v212_v18  ;;  %vm219_vm1 = vweird.f32 %v2983_v19 }
  0xa9   :  { %vm220_vm3 = vmor %vm218_vm2, %vm219_vm1 }
  0xaa   :  { %v215_v21 = vsub.f32 1.0, %v214_v20 }
  0xac   :  { %v216_v22 = vmul.f32 %v2983_v19, %v215_v21 }
  0xae   :  { %v217_v23 = vadd.f32 %v2983_v19, %v216_v22 }
  0xb0   :  { %v221_v26 = vsel %vm220_vm3, %v2983_v19, %v217_v23 }
  0xb1   :  { %v226_v29 = vsel %vm223_vm4, %v225_v27, %v221_v26 }
  0xb2   :  { %v229_v31 = vmul.f32 0.0, %v226_v29 }
 0x10f   :  { %v232_v28 = vpop.permute.xlu0 %231 }
 0x110   :  { %v234_v30 = vmul.f32 %v232_v28, %v226_v29 }
 0x112   :  { %236 = vrot.lane.b32.xlu0 %v234_v30, %s3300_s18 }
 0x184   :  { %v237_v32 = vpop.permute.xlu0 %236 }
 0x185   :  { %v239_v33 = vadd.f32 %v237_v32, %v229_v31 }
 0x187   :  { %2984 = vtanh.f32 %v239_v33 }
 0x18d   :  { %v2985_v34 = vpop.eup %2984 }
 0x18e   :  { %242 = vrot.lane.b32.xlu1 %v2985_v34, %s3300_s18 }
 0x200   :  { %v243_v35 = vpop.permute.xlu1 %242 }
 0x201   :  { %v245_v36 = vmul.f32 %v243_v35, %v226_v29 }
 0x203   :  { %247 = vrot.lane.b32.xlu1 %v245_v36, %s3301_s19 }
 0x275   :  { %v248_v38 = vpop.permute.xlu1 %247 }
 0x276   :  { %250 = vst.msk [vmem:[#allocation3] sm:$0xff] %vm64_vm0, %v248_v38  ;;  %2863 = vmatmul.msk.f32.vlgmr.msra.gmra.mxu2 %vm64_vm0, %v248_v38 }
 0x277   :  { %675 = vmatpush.msra.mxu2 %v3370_v2 }
 0x279   :  { %676 = vmatpush.msra.mxu2 %v3373_v3 }
 0x27b   :  { %677 = vmatpush.msra.mxu2 %v3380_v6 }
 0x27d   :  { %678 = vmatpush.msra.mxu2 %v3392_v8 }
 0x2f9   :  { %v272_v41 = vpop.f32.mrf.mxu2 }
 0x2fa   :  { %v275_v42 = vadd.f32 %v272_v41, %v144_v40 }
 0x2fc   :  { %2986 = vtanh.f32 %v275_v42  ;;  %v2864_v44 = vmul.f32 -1.442695, %v275_v42 }
 0x2fe   :  { %2988 = vpow2.f32 %v2864_v44 }
 0x302   :  { %v2987_v43 = vpop.eup %2986 }
 0x303   :  { %298 = vrot.lane.b32.xlu2 %v2987_v43, %s3300_s18 }
 0x304   :  { %v2989_v45 = vpop.eup %2988 }
 0x305   :  { %v279_v46 = vadd.f32 1.0, %v2989_v45 }
 0x307   :  { %2990 = vrcp.f32 %v279_v46  ;;  %v291_v52 = vand.u32 2147483648, %v279_v46  ;;  %vm285_vm6 = vweird.f32 %v279_v46  ;;  %v289_v53 = vand.u32 2147483647, %v279_v46 }
 0x309   :  { %v292_v55 = vor.u32 1.1754944e-38, %v291_v52  ;;  %vm290_vm8 = vcmp.eq.f32.partialorder %v289_v53, 8.507059e+37 }
 0x30d   :  { %v2991_v47 = vpop.eup %2990 }
 0x30e   :  { %v281_v48 = vmul.f32 %v2991_v47, %v279_v46  ;;  %vm286_vm5 = vweird.f32 %v2991_v47 }
 0x30f   :  { %vm287_vm7 = vmor %vm285_vm6, %vm286_vm5 }
 0x310   :  { %v282_v49 = vsub.f32 1.0, %v281_v48 }
 0x312   :  { %v283_v50 = vmul.f32 %v2991_v47, %v282_v49 }
 0x314   :  { %v284_v51 = vadd.f32 %v2991_v47, %v283_v50 }
 0x316   :  { %v288_v54 = vsel %vm287_vm7, %v2991_v47, %v284_v51 }
 0x317   :  { %v293_v57 = vsel %vm290_vm8, %v292_v55, %v288_v54 }
 0x318   :  { %v296_v59 = vmul.f32 %v293_v57, %v239_v33  ;;  %v78_v33 = vld [vmem:[%s4269_s1 + $0x18] sm:$0xff] }
 0x319   :  { %2855 = vmatmul.msk.f32.gmra.mxu0 %vm64_vm0, %v78_v33 }
 0x35d   :  { %v299_v56 = vpop.permute.xlu2 %298 }
 0x35e   :  { %v301_v58 = vmul.f32 %v299_v56, %v293_v57 }
 0x360   :  { %303 = vrot.lane.b32.xlu2 %v301_v58, %s3300_s18 }
 0x396   :  { %v149_v37 = vpop.f32.mrf.mxu0 }
 0x397   :  { %v150_v38 = vadd.f32 %v3448_v10, %v149_v37 }
 0x3ba   :  { %v304_v60 = vpop.permute.xlu2 %303 }
 0x3bb   :  { %v306_v61 = vadd.f32 %v304_v60, %v296_v59  ;;  %v79_v59 = vld [vmem:[%s4269_s1 + $0x20] sm:$0xff] }
 0x3bc   :  { %2856 = vmatmul.msk.f32.gmra.mxu0 %vm64_vm0, %v79_v59 }
 0x3bd   :  { %2992 = vtanh.f32 %v306_v61 }
 0x3c3   :  { %v2993_v62 = vpop.eup %2992 }
 0x3c4   :  { %309 = vrot.lane.b32.xlu0 %v2993_v62, %s3300_s18 }
 0x436   :  { %v310_v63 = vpop.permute.xlu0 %309 }
 0x437   :  { %v312_v0 = vmul.f32 %v310_v63, %v293_v57 }
 0x439   :  { %314 = vrot.lane.b32.xlu1 %v312_v0, %s3301_s19 }
 0x4ab   :  { %v315_v5 = vpop.permute.xlu1 %314 }
 0x4ac   :  { %318 = vst.msk [vmem:[#allocation3 + $0x8] sm:$0xff] %vm64_vm0, %v315_v5  ;;  %2865 = vmatmul.msk.f32.vlgmr.msra.gmra.mxu3 %vm64_vm0, %v315_v5 }
 0x4ad   :  { %743 = vmatpush.msra.mxu3 %v3370_v2 }
 0x4af   :  { %744 = vmatpush.msra.mxu3 %v3373_v3 }
 0x4b1   :  { %745 = vmatpush.msra.mxu3 %v3380_v6 }
 0x4b3   :  { %746 = vmatpush.msra.mxu3 %v3392_v8 }
 0x52f   :  { %v340_v11 = vpop.f32.mrf.mxu3 }
 0x530   :  { %v343_v12 = vadd.f32 %v340_v11, %v147_v9 }
 0x532   :  { %2994 = vtanh.f32 %v343_v12  ;;  %v2866_v14 = vmul.f32 -1.442695, %v343_v12 }
 0x534   :  { %2996 = vpow2.f32 %v2866_v14 }
 0x538   :  { %v2995_v13 = vpop.eup %2994 }
 0x539   :  { %366 = vrot.lane.b32.xlu2 %v2995_v13, %s3300_s18 }
 0x53a   :  { %v2997_v15 = vpop.eup %2996 }
 0x53b   :  { %v347_v16 = vadd.f32 1.0, %v2997_v15 }
 0x53d   :  { %2998 = vrcp.f32 %v347_v16  ;;  %v359_v22 = vand.u32 2147483648, %v347_v16  ;;  %vm353_vm10 = vweird.f32 %v347_v16  ;;  %v357_v23 = vand.u32 2147483647, %v347_v16 }
 0x53f   :  { %v360_v25 = vor.u32 1.1754944e-38, %v359_v22  ;;  %vm358_vm12 = vcmp.eq.f32.partialorder %v357_v23, 8.507059e+37 }
 0x543   :  { %v2999_v17 = vpop.eup %2998 }
 0x544   :  { %v349_v18 = vmul.f32 %v2999_v17, %v347_v16  ;;  %vm354_vm9 = vweird.f32 %v2999_v17 }
 0x545   :  { %vm355_vm11 = vmor %vm353_vm10, %vm354_vm9 }
 0x546   :  { %v350_v19 = vsub.f32 1.0, %v349_v18 }
 0x548   :  { %v351_v20 = vmul.f32 %v2999_v17, %v350_v19 }
 0x54a   :  { %v352_v21 = vadd.f32 %v2999_v17, %v351_v20 }
 0x54c   :  { %v356_v24 = vsel %vm355_vm11, %v2999_v17, %v352_v21 }
 0x54d   :  { %v361_v27 = vsel %vm358_vm12, %v360_v25, %v356_v24 }
 0x54e   :  { %v364_v29 = vmul.f32 %v361_v27, %v306_v61  ;;  %v152_v61 = vpop.f32.mrf.mxu0 }
 0x54f   :  { %v153_v62 = vadd.f32 %v3448_v10, %v152_v61 }
 0x593   :  { %v367_v26 = vpop.permute.xlu2 %366 }
 0x594   :  { %v369_v28 = vmul.f32 %v367_v26, %v361_v27 }
 0x596   :  { %371 = vrot.lane.b32.xlu0 %v369_v28, %s3300_s18 }
 0x608   :  { %v372_v30 = vpop.permute.xlu0 %371 }
 0x609   :  { %v374_v31 = vadd.f32 %v372_v30, %v364_v29  ;;  %v80_v29 = vld [vmem:[%s4269_s1 + $0x28] sm:$0xff] }
 0x60a   :  { %2857 = vmatmul.msk.f32.gmra.mxu0 %vm64_vm0, %v80_v29  ;;  %v863_v29 = vld [vmem:[#allocation3] sm:$0xff] }
 0x60b   :  { %3000 = vtanh.f32 %v374_v31 }
 0x611   :  { %v3001_v32 = vpop.eup %3000 }
 0x612   :  { %377 = vrot.lane.b32.xlu1 %v3001_v32, %s3300_s18 }
 0x684   :  { %v378_v34 = vpop.permute.xlu1 %377 }
 0x685   :  { %v380_v35 = vmul.f32 %v378_v34, %v361_v27 }
 0x687   :  { %382 = vrot.lane.b32.xlu2 %v380_v35, %s3301_s19 }
 0x6e1   :  { %v383_v36 = vpop.permute.xlu2 %382 }
 0x6e2   :  { %386 = vst.msk [vmem:[#allocation3 + $0x10] sm:$0xff] %vm64_vm0, %v383_v36  ;;  %2867 = vmatmul.msk.f32.vlgmr.msrb.gmra.mxu1 %vm64_vm0, %v383_v36 }
 0x6e3   :  { %811 = vmatpush.msrb.mxu1 %v3370_v2 }
 0x6e5   :  { %812 = vmatpush.msrb.mxu1 %v3373_v3 }
 0x6e7   :  { %813 = vmatpush.msrb.mxu1 %v3380_v6 }
 0x6e9   :  { %814 = vmatpush.msrb.mxu1 %v3392_v8 }
 0x75f   :  { %v408_v39 = vpop.f32.mrf.mxu1 }
 0x760   :  { %v411_v40 = vadd.f32 %v408_v39, %v150_v38 }
 0x762   :  { %3002 = vtanh.f32 %v411_v40  ;;  %v2868_v42 = vmul.f32 -1.442695, %v411_v40 }
 0x764   :  { %3004 = vpow2.f32 %v2868_v42 }
 0x768   :  { %v3003_v41 = vpop.eup %3002 }
 0x769   :  { %434 = vrot.lane.b32.xlu0 %v3003_v41, %s3300_s18 }
 0x76a   :  { %v3005_v43 = vpop.eup %3004 }
 0x76b   :  { %v415_v44 = vadd.f32 1.0, %v3005_v43 }
 0x76d   :  { %3006 = vrcp.f32 %v415_v44  ;;  %v427_v8 = vand.u32 2147483648, %v415_v44  ;;  %vm421_vm14 = vweird.f32 %v415_v44  ;;  %v425_v47 = vand.u32 2147483647, %v415_v44 }
 0x76f   :  { %v428_v49 = vor.u32 1.1754944e-38, %v427_v8  ;;  %vm426_vm1 = vcmp.eq.f32.partialorder %v425_v47, 8.507059e+37 }
 0x773   :  { %v3007_v2 = vpop.eup %3006 }
 0x774   :  { %v417_v3 = vmul.f32 %v3007_v2, %v415_v44  ;;  %vm422_vm13 = vweird.f32 %v3007_v2 }
 0x775   :  { %vm423_vm15 = vmor %vm421_vm14, %vm422_vm13 }
 0x776   :  { %v418_v45 = vsub.f32 1.0, %v417_v3 }
 0x778   :  { %v419_v6 = vmul.f32 %v3007_v2, %v418_v45 }
 0x77a   :  { %v420_v46 = vadd.f32 %v3007_v2, %v419_v6 }
 0x77c   :  { %v424_v48 = vsel %vm423_vm15, %v3007_v2, %v420_v46 }
 0x77d   :  { %v429_v51 = vsel %vm426_vm1, %v428_v49, %v424_v48 }
 0x77e   :  { %v432_v53 = vmul.f32 %v429_v51, %v374_v31  ;;  %v155_v31 = vpop.f32.mrf.mxu0 }
 0x77f   :  { %v156_v32 = vadd.f32 %v3448_v10, %v155_v31  ;;  %v865_v31 = vld [vmem:[#allocation3 + $0x10] sm:$0xff] }
 0x7db   :  { %v435_v50 = vpop.permute.xlu0 %434 }
 0x7dc   :  { %v437_v52 = vmul.f32 %v435_v50, %v429_v51 }
 0x7de   :  { %439 = vrot.lane.b32.xlu1 %v437_v52, %s3300_s18 }
 0x850   :  { %v440_v54 = vpop.permute.xlu1 %439 }
 0x851   :  { %v442_v55 = vadd.f32 %v440_v54, %v432_v53 }
 0x853   :  { %3008 = vtanh.f32 %v442_v55 }
 0x859   :  { %v3009_v56 = vpop.eup %3008 }
 0x85a   :  { %445 = vrot.lane.b32.xlu2 %v3009_v56, %s3300_s18 }
 0x8b4   :  { %v446_v57 = vpop.permute.xlu2 %445 }
 0x8b5   :  { %v448_v58 = vmul.f32 %v446_v57, %v429_v51  ;;  %v81_v51 = vld [vmem:[%s4269_s1 + $0x30] sm:$0xff] }
 0x8b6   :  { %2858 = vmatmul.msk.f32.gmra.mxu0 %vm64_vm0, %v81_v51 }
 0x8b7   :  { %450 = vrot.lane.b32.xlu0 %v448_v58, %s3301_s19 }
 0x929   :  { %v451_v60 = vpop.permute.xlu0 %450 }
 0x92a   :  { %454 = vst.msk [vmem:[#allocation3 + $0x18] sm:$0xff] %vm64_vm0, %v451_v60  ;;  %2869 = vmatmul.msk.f32.vlgmr.msrb.gmra.mxu2 %vm64_vm0, %v451_v60 }
 0x9ad   :  { %v476_v63 = vpop.f32.mrf.mxu2 }
 0x9ae   :  { %v479_v0 = vadd.f32 %v476_v63, %v153_v62 }
 0x9b0   :  { %3010 = vtanh.f32 %v479_v0  ;;  %v2870_v5 = vmul.f32 -1.442695, %v479_v0 }
 0x9b2   :  { %3012 = vpow2.f32 %v2870_v5 }
 0x9b6   :  { %v3011_v1 = vpop.eup %3010 }
 0x9b7   :  { %502 = vrot.lane.b32.xlu1 %v3011_v1, %s3300_s18 }
 0x9b8   :  { %v3013_v7 = vpop.eup %3012 }
 0x9b9   :  { %v483_v9 = vadd.f32 1.0, %v3013_v7 }
 0x9bb   :  { %3014 = vrcp.f32 %v483_v9  ;;  %v495_v16 = vand.u32 2147483648, %v483_v9  ;;  %vm489_vm3 = vweird.f32 %v483_v9  ;;  %v493_v17 = vand.u32 2147483647, %v483_v9 }
 0x9bd   :  { %v496_v19 = vor.u32 1.1754944e-38, %v495_v16  ;;  %vm494_vm5 = vcmp.eq.f32.partialorder %v493_v17, 8.507059e+37 }
 0x9c1   :  { %v3015_v11 = vpop.eup %3014 }
 0x9c2   :  { %v485_v12 = vmul.f32 %v3015_v11, %v483_v9  ;;  %vm490_vm2 = vweird.f32 %v3015_v11 }
 0x9c3   :  { %vm491_vm4 = vmor %vm489_vm3, %vm490_vm2 }
 0x9c4   :  { %v486_v13 = vsub.f32 1.0, %v485_v12 }
 0x9c6   :  { %v487_v14 = vmul.f32 %v3015_v11, %v486_v13 }
 0x9c8   :  { %v488_v15 = vadd.f32 %v3015_v11, %v487_v14 }
 0x9ca   :  { %v492_v18 = vsel %vm491_vm4, %v3015_v11, %v488_v15 }
 0x9cb   :  { %v497_v21 = vsel %vm494_vm5, %v496_v19, %v492_v18 }
 0x9cc   :  { %v500_v23 = vmul.f32 %v497_v21, %v442_v55  ;;  %v158_v55 = vpop.f32.mrf.mxu0 }
 0x9cd   :  { %v159_v56 = vadd.f32 %v3448_v10, %v158_v55 }
 0xa29   :  { %v503_v20 = vpop.permute.xlu1 %502 }
 0xa2a   :  { %v505_v22 = vmul.f32 %v503_v20, %v497_v21 }
 0xa2c   :  { %507 = vrot.lane.b32.xlu2 %v505_v22, %s3300_s18 }
 0xa86   :  { %v508_v24 = vpop.permute.xlu2 %507 }
 0xa87   :  { %v510_v25 = vadd.f32 %v508_v24, %v500_v23  ;;  %v2884_v23 = vld [vmem:[%s4271_s3 + $0x38] sm:$0xff]  ;;  %v2883_v24 = vld [vmem:[%s4271_s3 + $0x30] sm:$0xff] }
 0xa88   :  { %925 = vmatpush.msrb.mxu2 %v2884_v23 }
 0xa89   :  { %3016 = vtanh.f32 %v510_v25 }
 0xa8a   :  { %926 = vmatpush.msrb.mxu2 %v2883_v24 }
 0xa8f   :  { %v3017_v26 = vpop.eup %3016 }
 0xa90   :  { %513 = vrot.lane.b32.xlu0 %v3017_v26, %s3300_s18  ;;  %v2882_v26 = vld [vmem:[%s4271_s3 + $0x28] sm:$0xff] }
 0xa91   :  { %927 = vmatpush.msrb.mxu2 %v2882_v26 }
 0xb02   :  { %v514_v27 = vpop.permute.xlu0 %513 }
 0xb03   :  { %v516_v28 = vmul.f32 %v514_v27, %v497_v21  ;;  %v2881_v27 = vld [vmem:[%s4271_s3 + $0x20] sm:$0xff]  ;;  %s2177_s3 = scalar_select %p2175_p2, 1, 0 }
 0xb04   :  { %928 = vmatpush.msrb.mxu2 %v2881_v27 }
 0xb05   :  { %518 = vrot.lane.b32.xlu1 %v516_v28, %s3301_s19 }
 0xb77   :  { %v519_v30 = vpop.permute.xlu1 %518 }
 0xb78   :  { %522 = vst.msk [vmem:[#allocation3 + $0x20] sm:$0xff] %vm64_vm0, %v519_v30  ;;  %2871 = vmatmul.msk.f32.vlgmr.msrb.gmra.mxu3 %vm64_vm0, %v519_v30  ;;  %v864_v30 = vld [vmem:[#allocation3 + $0x8] sm:$0xff] }
 0xbfb   :  { %v544_v33 = vpop.f32.mrf.mxu3 }
 0xbfc   :  { %v547_v34 = vadd.f32 %v544_v33, %v156_v32  ;;  %v866_v32 = vld [vmem:[#allocation3 + $0x18] sm:$0xff]  ;;  %v867_v33 = vld [vmem:[#allocation3 + $0x20] sm:$0xff] }
 0xbfe   :  { %3018 = vtanh.f32 %v547_v34  ;;  %v2872_v36 = vmul.f32 -1.442695, %v547_v34 }
 0xc00   :  { %3020 = vpow2.f32 %v2872_v36 }
 0xc04   :  { %v3019_v35 = vpop.eup %3018 }
 0xc05   :  { %570 = vrot.lane.b32.xlu2 %v3019_v35, %s3300_s18 }
 0xc06   :  { %v3021_v37 = vpop.eup %3020 }
 0xc07   :  { %v551_v38 = vadd.f32 1.0, %v3021_v37 }
 0xc09   :  { %3022 = vrcp.f32 %v551_v38  ;;  %v563_v44 = vand.u32 2147483648, %v551_v38  ;;  %vm557_vm7 = vweird.f32 %v551_v38  ;;  %v561_v2 = vand.u32 2147483647, %v551_v38 }
 0xc0b   :  { %v564_v45 = vor.u32 1.1754944e-38, %v563_v44  ;;  %vm562_vm9 = vcmp.eq.f32.partialorder %v561_v2, 8.507059e+37 }
 0xc0f   :  { %v3023_v39 = vpop.eup %3022 }
 0xc10   :  { %v553_v40 = vmul.f32 %v3023_v39, %v551_v38  ;;  %vm558_vm6 = vweird.f32 %v3023_v39 }
 0xc11   :  { %vm559_vm8 = vmor %vm557_vm7, %vm558_vm6 }
 0xc12   :  { %v554_v41 = vsub.f32 1.0, %v553_v40 }
 0xc14   :  { %v555_v42 = vmul.f32 %v3023_v39, %v554_v41 }
 0xc16   :  { %v556_v43 = vadd.f32 %v3023_v39, %v555_v42 }
 0xc18   :  { %v560_v3 = vsel %vm559_vm8, %v3023_v39, %v556_v43 }
 0xc19   :  { %v565_v46 = vsel %vm562_vm9, %v564_v45, %v560_v3 }
 0xc1a   :  { %v568_v47 = vmul.f32 %v565_v46, %v510_v25  ;;  %v82_v25 = vld [vmem:[%s4269_s1 + $0x38] sm:$0xff] }
 0xc1b   :  { %2859 = vmatmul.msk.f32.gmra.mxu0 %vm64_vm0, %v82_v25 }
 0xc5f   :  { %v571_v6 = vpop.permute.xlu2 %570 }
 0xc60   :  { %v573_v8 = vmul.f32 %v571_v6, %v565_v46 }
 0xc62   :  { %575 = vrot.lane.b32.xlu0 %v573_v8, %s3300_s18 }
 0xc98   :  { %v161_v36 = vpop.f32.mrf.mxu0 }
 0xc99   :  { %v162_v37 = vadd.f32 %v3448_v10, %v161_v36 }
 0xcd4   :  { %v576_v48 = vpop.permute.xlu0 %575 }
 0xcd5   :  { %v578_v49 = vadd.f32 %v576_v48, %v568_v47 }
 0xcd7   :  { %3024 = vtanh.f32 %v578_v49 }
 0xcdd   :  { %v3025_v50 = vpop.eup %3024 }
 0xcde   :  { %581 = vrot.lane.b32.xlu1 %v3025_v50, %s3300_s18 }
 0xd50   :  { %v582_v52 = vpop.permute.xlu1 %581 }
 0xd51   :  { %v584_v53 = vmul.f32 %v582_v52, %v565_v46 }
 0xd53   :  { %586 = vrot.lane.b32.xlu2 %v584_v53, %s3301_s19 }
 0xdad   :  { %v587_v54 = vpop.permute.xlu2 %586 }
 0xdae   :  { %590 = vst.msk [vmem:[#allocation3 + $0x28] sm:$0xff] %vm64_vm0, %v587_v54  ;;  %2873 = vmatmul.msk.f32.vlgmr.msra.gmra.mxu1 %vm64_vm0, %v587_v54 }
 0xdb5   :  { %v868_v34 = vld [vmem:[#allocation3 + $0x28] sm:$0xff] }
 0xe2b   :  { %v612_v57 = vpop.f32.mrf.mxu1 }
 0xe2c   :  { %v615_v58 = vadd.f32 %v612_v57, %v159_v56 }
 0xe2e   :  { %3026 = vtanh.f32 %v615_v58  ;;  %v2874_v60 = vmul.f32 -1.442695, %v615_v58  ;;  %v3570_v58 = vld [vmem:[#allocation7 + $0x38] sm:$0xff] }
 0xe2f   :  { %988 = vmatpush.msrb.mxu3 %v3570_v58  ;;  %1054 = vmatpush.msra.mxu1 %v3570_v58 }
 0xe30   :  { %3028 = vpow2.f32 %v2874_v60  ;;  %v83_v60 = vld [vmem:[%s4269_s1 + $0x40] sm:$0xff] }
 0xe31   :  { %2860 = vmatmul.msk.f32.gmra.mxu0 %vm64_vm0, %v83_v60 }
 0xe34   :  { %v3027_v59 = vpop.eup %3026 }
 0xe35   :  { %638 = vrot.lane.b32.xlu0 %v3027_v59, %s3300_s18  ;;  %v3572_v59 = vld [vmem:[#allocation7 + $0x30] sm:$0xff] }
 0xe36   :  { %v3029_v61 = vpop.eup %3028  ;;  %989 = vmatpush.msrb.mxu3 %v3572_v59  ;;  %1055 = vmatpush.msra.mxu1 %v3572_v59 }
 0xe37   :  { %v619_v62 = vadd.f32 1.0, %v3029_v61  ;;  %v3579_v61 = vld [vmem:[#allocation7 + $0x28] sm:$0xff] }
 0xe38   :  { %990 = vmatpush.msrb.mxu3 %v3579_v61  ;;  %1056 = vmatpush.msra.mxu1 %v3579_v61 }
 0xe39   :  { %3030 = vrcp.f32 %v619_v62  ;;  %v631_v9 = vand.u32 2147483648, %v619_v62  ;;  %vm625_vm11 = vweird.f32 %v619_v62  ;;  %v629_v11 = vand.u32 2147483647, %v619_v62 }
 0xe3b   :  { %v632_v13 = vor.u32 1.1754944e-38, %v631_v9  ;;  %vm630_vm13 = vcmp.eq.f32.partialorder %v629_v11, 8.507059e+37  ;;  %v3606_v11 = vld [vmem:[%s4273_s5 + $0x1] ss:$0 sm:$0xff] }
 0xe3f   :  { %v3031_v63 = vpop.eup %3030 }
 0xe40   :  { %v621_v0 = vmul.f32 %v3031_v63, %v619_v62  ;;  %vm626_vm10 = vweird.f32 %v3031_v63  ;;  %v3583_v62 = vld [vmem:[#allocation7 + $0x20] sm:$0xff] }
 0xe41   :  { %vm627_vm12 = vmor %vm625_vm11, %vm626_vm10  ;;  %991 = vmatpush.msrb.mxu3 %v3583_v62  ;;  %1057 = vmatpush.msra.mxu1 %v3583_v62 }
 0xe42   :  { %v622_v1 = vsub.f32 1.0, %v621_v0 }
 0xe44   :  { %v623_v5 = vmul.f32 %v3031_v63, %v622_v1 }
 0xe46   :  { %v624_v7 = vadd.f32 %v3031_v63, %v623_v5 }
 0xe48   :  { %v628_v12 = vsel %vm627_vm12, %v3031_v63, %v624_v7 }
 0xe49   :  { %v633_v15 = vsel %vm630_vm13, %v632_v13, %v628_v12 }
 0xe4a   :  { %v636_v17 = vmul.f32 %v633_v15, %v578_v49 }
 0xea7   :  { %v639_v14 = vpop.permute.xlu0 %638 }
 0xea8   :  { %v641_v16 = vmul.f32 %v639_v14, %v633_v15 }
 0xeaa   :  { %643 = vrot.lane.b32.xlu1 %v641_v16, %s3300_s18 }
 0xeae   :  { %v164_v1 = vpop.f32.mrf.mxu0 }
 0xeaf   :  { %v165_v5 = vadd.f32 %v3448_v10, %v164_v1 }
 0xf1c   :  { %v644_v18 = vpop.permute.xlu1 %643 }
 0xf1d   :  { %v3531_v19 = vadd.f32 %v644_v18, %v636_v17 }
 0xf1f   :  { %3032 = vtanh.f32 %v3531_v19 }
 0xf25   :  { %v3033_v20 = vpop.eup %3032 }
 0xf26   :  { %649 = vrot.lane.b32.xlu2 %v3033_v20, %s3300_s18 }
 0xf80   :  { %v650_v21 = vpop.permute.xlu2 %649 }
 0xf81   :  { %v652_v22 = vmul.f32 %v650_v21, %v633_v15 }
 0xf83   :  { %654 = vrot.lane.b32.xlu0 %v652_v22, %s3301_s19 }
 0xff5   :  { %v655_v28 = vpop.permute.xlu0 %654 }
 0xff6   :  { %658 = vst.msk [vmem:[#allocation3 + $0x30] sm:$0xff] %vm64_vm0, %v655_v28  ;;  %2875 = vmatmul.msk.f32.vlgmr.msra.gmra.mxu2 %vm64_vm0, %v655_v28 }
 0xffd   :  { %v869_v35 = vld [vmem:[#allocation3 + $0x30] sm:$0xff] }
 0xffe   :  { %2886 = vmatmul.msk.f32.vlgmr.msrb.gmra.mxu2 %vm64_vm0, %v863_v29 }
0x1006   :  { %2887 = vmatmul.msk.f32.gmra.mxu2 %vm64_vm0, %v864_v30 }
0x100e   :  { %2888 = vmatmul.msk.f32.gmra.mxu2 %vm64_vm0, %v865_v31 }
0x1016   :  { %2889 = vmatmul.msk.f32.gmra.mxu2 %vm64_vm0, %v866_v32 }
0x101e   :  { %2890 = vmatmul.msk.f32.gmra.mxu2 %vm64_vm0, %v867_v33 }
0x1026   :  { %2891 = vmatmul.msk.f32.gmra.mxu2 %vm64_vm0, %v868_v34 }
0x102e   :  { %2892 = vmatmul.msk.f32.gmra.mxu2 %vm64_vm0, %v869_v35 }
0x1079   :  { %v680_v38 = vpop.f32.mrf.mxu2 }
0x107a   :  { %v683_v39 = vadd.f32 %v680_v38, %v162_v37 }
0x107c   :  { %3034 = vtanh.f32 %v683_v39  ;;  %v2876_v41 = vmul.f32 -1.442695, %v683_v39 }
0x107e   :  { %3036 = vpow2.f32 %v2876_v41 }
0x1082   :  { %v3035_v40 = vpop.eup %3034 }
0x1083   :  { %706 = vrot.lane.b32.xlu1 %v3035_v40, %s3300_s18 }
0x1084   :  { %v3037_v42 = vpop.eup %3036 }
0x1085   :  { %v687_v43 = vadd.f32 1.0, %v3037_v42 }
0x1087   :  { %3038 = vrcp.f32 %v687_v43  ;;  %v699_v46 = vand.u32 2147483648, %v687_v43  ;;  %vm693_vm15 = vweird.f32 %v687_v43  ;;  %v697_v8 = vand.u32 2147483647, %v687_v43 }
0x1089   :  { %v700_v48 = vor.u32 1.1754944e-38, %v699_v46  ;;  %vm698_vm2 = vcmp.eq.f32.partialorder %v697_v8, 8.507059e+37 }
0x108d   :  { %v3039_v44 = vpop.eup %3038 }
0x108e   :  { %v689_v2 = vmul.f32 %v3039_v44, %v687_v43  ;;  %vm694_vm14 = vweird.f32 %v3039_v44 }
0x108f   :  { %vm695_vm1 = vmor %vm693_vm15, %vm694_vm14 }
0x1090   :  { %v690_v3 = vsub.f32 1.0, %v689_v2 }
0x1092   :  { %v691_v45 = vmul.f32 %v3039_v44, %v690_v3 }
0x1094   :  { %v692_v6 = vadd.f32 %v3039_v44, %v691_v45 }
0x1096   :  { %v696_v47 = vsel %vm695_vm1, %v3039_v44, %v692_v6 }
0x1097   :  { %v701_v50 = vsel %vm698_vm2, %v700_v48, %v696_v47 }
0x1098   :  { %v704_v52 = vmul.f32 %v701_v50, %v3531_v19 }
0x10f5   :  { %v707_v49 = vpop.permute.xlu1 %706 }
0x10f6   :  { %v709_v51 = vmul.f32 %v707_v49, %v701_v50 }
0x10f8   :  { %711 = vrot.lane.b32.xlu2 %v709_v51, %s3300_s18 }
0x1152   :  { %v712_v53 = vpop.permute.xlu2 %711 }
0x1153   :  { %v3565_v54 = vadd.f32 %v712_v53, %v704_v52 }
0x1155   :  { %3040 = vtanh.f32 %v3565_v54 }
0x115b   :  { %v3041_v55 = vpop.eup %3040 }
0x115c   :  { %717 = vrot.lane.b32.xlu0 %v3041_v55, %s3300_s18 }
0x11ce   :  { %v718_v56 = vpop.permute.xlu0 %717 }
0x11cf   :  { %v720_v57 = vmul.f32 %v718_v56, %v701_v50  ;;  %v84_v50 = vld [vmem:[%s4269_s1 + $0x48] sm:$0xff] }
0x11d0   :  { %2861 = vmatmul.msk.f32.gmra.mxu0 %vm64_vm0, %v84_v50 }
0x11d1   :  { %722 = vrot.lane.b32.xlu1 %v720_v57, %s3301_s19 }
0x1243   :  { %v723_v63 = vpop.permute.xlu1 %722 }
0x1244   :  { %726 = vst.msk [vmem:[#allocation3 + $0x38] sm:$0xff] %vm64_vm0, %v723_v63  ;;  %2877 = vmatmul.msk.f32.vlgmr.msra.gmra.mxu3 %vm64_vm0, %v723_v63 }
0x1245   :  { %1120 = vmatpush.msra.mxu3 %v3570_v58 }
0x1247   :  { %1121 = vmatpush.msra.mxu3 %v3572_v59 }
0x1249   :  { %1122 = vmatpush.msra.mxu3 %v3579_v61 }
0x124b   :  { %v870_v0 = vld [vmem:[#allocation3 + $0x38] sm:$0xff]  ;;  %1123 = vmatpush.msra.mxu3 %v3583_v62 }
0x124c   :  { %2893 = vmatmul.msk.f32.gmra.mxu2 %vm64_vm0, %v870_v0  ;;  %992 = vmatmul.f32.vlgmr.msrb.gmra.mxu3 %v3299_v4  ;;  %v930_v4 = vpop.f32.mrf.mxu2 }
0x124d   :  { %1252 = vmatpush.msrb.mxu3 %v3570_v58  ;;  %v931_v12 = vadd.f32 %v3606_v11, %v930_v4 }
0x124f   :  { %1253 = vmatpush.msrb.mxu3 %v3572_v59 }
0x1251   :  { %1254 = vmatpush.msrb.mxu3 %v3579_v61 }
0x1253   :  { %1255 = vmatpush.msrb.mxu3 %v3583_v62 }
0x1254   :  { %v933_v63 = vpop.f32.mrf.mxu2 }
0x1255   :  { %v934_v0 = vadd.f32 %v3606_v11, %v933_v63 }
0x12c7   :  { %v748_v7 = vpop.f32.mrf.mxu3 }
0x12c8   :  { %v751_v9 = vadd.f32 %v748_v7, %v165_v5 }
0x12ca   :  { %3042 = vtanh.f32 %v751_v9  ;;  %v2878_v10 = vmul.f32 -1.442695, %v751_v9 }
0x12cf   :  { %v993_v13 = vpop.f32.mrf.mxu3 }
0x12d0   :  { %v3043_v14 = vpop.eup %3042  ;;  %v996_v15 = vadd.f32 %v993_v13, %v931_v12 }
0x12d1   :  { %774 = vrot.lane.b32.xlu2 %v3043_v14, %s3300_s18 }
0x12d2   :  { %3044 = vtanh.f32 %v996_v15  ;;  %v2896_v22 = vmul.f32 -1.442695, %v996_v15 }
0x12d3   :  { %3046 = vpow2.f32 %v2878_v10 }
0x12d8   :  { %v3045_v16 = vpop.eup %3044 }
0x12d9   :  { %1019 = vrot.lane.b32.xlu0 %v3045_v16, %s3300_s18  ;;  %v3047_v17 = vpop.eup %3046 }
0x12da   :  { %v755_v18 = vadd.f32 1.0, %v3047_v17 }
0x12dc   :  { %3048 = vrcp.f32 %v755_v18  ;;  %v767_v25 = vand.u32 2147483648, %v755_v18  ;;  %vm761_vm4 = vweird.f32 %v755_v18  ;;  %v765_v26 = vand.u32 2147483647, %v755_v18 }
0x12dd   :  { %3050 = vpow2.f32 %v2896_v22 }
0x12de   :  { %v768_v29 = vor.u32 1.1754944e-38, %v767_v25  ;;  %vm766_vm6 = vcmp.eq.f32.partialorder %v765_v26, 8.507059e+37 }
0x12e2   :  { %v3049_v19 = vpop.eup %3048 }
0x12e3   :  { %v757_v20 = vmul.f32 %v3049_v19, %v755_v18  ;;  %vm762_vm3 = vweird.f32 %v3049_v19  ;;  %v3051_v27 = vpop.eup %3050 }
0x12e4   :  { %vm763_vm5 = vmor %vm761_vm4, %vm762_vm3  ;;  %v1000_v30 = vadd.f32 1.0, %v3051_v27 }
0x12e5   :  { %v758_v21 = vsub.f32 1.0, %v757_v20 }
0x12e6   :  { %3052 = vrcp.f32 %v1000_v30  ;;  %v1012_v39 = vand.u32 2147483648, %v1000_v30  ;;  %vm1006_vm8 = vweird.f32 %v1000_v30  ;;  %v1010_v40 = vand.u32 2147483647, %v1000_v30 }
0x12e7   :  { %v759_v23 = vmul.f32 %v3049_v19, %v758_v21 }
0x12e8   :  { %v1013_v42 = vor.u32 1.1754944e-38, %v1012_v39  ;;  %vm1011_vm10 = vcmp.eq.f32.partialorder %v1010_v40, 8.507059e+37 }
0x12e9   :  { %v760_v24 = vadd.f32 %v3049_v19, %v759_v23 }
0x12eb   :  { %v764_v28 = vsel %vm763_vm5, %v3049_v19, %v760_v24 }
0x12ec   :  { %v769_v32 = vsel %vm766_vm6, %v768_v29, %v764_v28  ;;  %v3053_v34 = vpop.eup %3052 }
0x12ed   :  { %v1002_v35 = vmul.f32 %v3053_v34, %v1000_v30  ;;  %vm1007_vm7 = vweird.f32 %v3053_v34  ;;  %v772_v3 = vmul.f32 %v769_v32, %v3565_v54 }
0x12ee   :  { %vm1008_vm9 = vmor %vm1006_vm8, %vm1007_vm7 }
0x12ef   :  { %v1003_v36 = vsub.f32 1.0, %v1002_v35 }
0x12f1   :  { %v1004_v37 = vmul.f32 %v3053_v34, %v1003_v36 }
0x12f3   :  { %v1005_v38 = vadd.f32 %v3053_v34, %v1004_v37 }
0x12f5   :  { %v1009_v41 = vsel %vm1008_vm9, %v3053_v34, %v1005_v38 }
0x12f6   :  { %v1014_v44 = vsel %vm1011_vm10, %v1013_v42, %v1009_v41 }
0x12f7   :  { %v1017_v46 = vmul.f32 0.0, %v1014_v44 }
0x132b   :  { %v775_v31 = vpop.permute.xlu2 %774 }
0x132c   :  { %v777_v33 = vmul.f32 %v775_v31, %v769_v32  ;;  %v936_v31 = vpop.f32.mrf.mxu2 }
0x132e   :  { %779 = vrot.lane.b32.xlu1 %v777_v33, %s3300_s18 }
0x134b   :  { %v1020_v43 = vpop.permute.xlu0 %1019 }
0x134c   :  { %v1022_v2 = vmul.f32 %v1020_v43, %v1014_v44 }
0x134e   :  { %1024 = vrot.lane.b32.xlu2 %v1022_v2, %s3300_s18 }
0x13a0   :  { %v780_v45 = vpop.permute.xlu1 %779 }
0x13a1   :  { %v3614_v6 = vadd.f32 %v780_v45, %v772_v3 }
0x13a3   :  { %3054 = vtanh.f32 %v3614_v6 }
0x13a8   :  { %v1025_v8 = vpop.permute.xlu2 %1024 }
0x13a9   :  { %v3055_v47 = vpop.eup %3054  ;;  %v1027_v48 = vadd.f32 %v1025_v8, %v1017_v46 }
0x13aa   :  { %785 = vrot.lane.b32.xlu0 %v3055_v47, %s3300_s18 }
0x13ab   :  { %3056 = vtanh.f32 %v1027_v48 }
0x13b1   :  { %v3057_v49 = vpop.eup %3056 }
0x13b2   :  { %1030 = vrot.lane.b32.xlu1 %v3057_v49, %s3300_s18 }
0x141c   :  { %v786_v51 = vpop.permute.xlu0 %785 }
0x141d   :  { %v788_v52 = vmul.f32 %v786_v51, %v769_v32  ;;  %v937_v32 = vadd.f32 %v3606_v11, %v936_v31 }
0x141f   :  { %790 = vrot.lane.b32.xlu2 %v788_v52, %s3301_s19 }
0x1424   :  { %v1031_v53 = vpop.permute.xlu1 %1030 }
0x1425   :  { %v1033_v54 = vmul.f32 %v1031_v53, %v1014_v44 }
0x1427   :  { %1035 = vrot.lane.b32.xlu0 %v1033_v54, %s3301_s19 }
0x1479   :  { %v791_v55 = vpop.permute.xlu2 %790 }
0x147a   :  { %794 = vst.msk [vmem:[#allocation3 + $0x40] sm:$0xff] %vm64_vm0, %v791_v55  ;;  %2879 = vmatmul.msk.f32.vlgmr.msrb.gmra.mxu1 %vm64_vm0, %v791_v55  ;;  %v939_v55 = vpop.f32.mrf.mxu2 }
0x147b   :  { %1186 = vmatpush.msrb.mxu1 %v3570_v58 }
0x147d   :  { %1187 = vmatpush.msrb.mxu1 %v3572_v59 }
0x147f   :  { %1188 = vmatpush.msrb.mxu1 %v3579_v61 }
0x1481   :  { %v871_v56 = vld [vmem:[#allocation3 + $0x40] sm:$0xff]  ;;  %1189 = vmatpush.msrb.mxu1 %v3583_v62 }
0x1482   :  { %2894 = vmatmul.msk.f32.gmra.mxu2 %vm64_vm0, %v871_v56  ;;  %v940_v56 = vadd.f32 %v3606_v11, %v939_v55 }
0x1499   :  { %v1036_v57 = vpop.permute.xlu0 %1035 }
0x149a   :  { %1038 = vst.msk [vmem:[#allocation3] sm:$0xff] %vm64_vm0, %v1036_v57  ;;  %2897 = vmatmul.msk.f32.vlgmr.msra.gmra.mxu1 %vm64_vm0, %v1036_v57 }
0x149b   :  { %1318 = vmatpush.msra.mxu1 %v3570_v58 }
0x149d   :  { %1319 = vmatpush.msra.mxu1 %v3572_v59 }
0x149f   :  { %1320 = vmatpush.msra.mxu1 %v3579_v61 }
0x14a1   :  { %1321 = vmatpush.msra.mxu1 %v3583_v62 }
0x14f7   :  { %v3638_v60 = vpop.f32.mrf.mxu1 }
0x1517   :  { %v1059_v1 = vpop.f32.mrf.mxu1 }
0x1518   :  { %v1062_v5 = vadd.f32 %v1059_v1, %v934_v0 }
0x151a   :  { %3058 = vtanh.f32 %v1062_v5  ;;  %v2898_v9 = vmul.f32 -1.442695, %v1062_v5 }
0x151c   :  { %3060 = vpow2.f32 %v2898_v9 }
0x1520   :  { %v3059_v7 = vpop.eup %3058 }
0x1521   :  { %1085 = vrot.lane.b32.xlu1 %v3059_v7, %s3300_s18 }
0x1522   :  { %v3061_v4 = vpop.eup %3060 }
0x1523   :  { %v1066_v12 = vadd.f32 1.0, %v3061_v4 }
0x1525   :  { %3062 = vrcp.f32 %v1066_v12  ;;  %v1078_v17 = vand.u32 2147483648, %v1066_v12  ;;  %vm1072_vm12 = vweird.f32 %v1066_v12  ;;  %v1076_v18 = vand.u32 2147483647, %v1066_v12 }
0x1527   :  { %v1079_v20 = vor.u32 1.1754944e-38, %v1078_v17  ;;  %vm1077_vm14 = vcmp.eq.f32.partialorder %v1076_v18, 8.507059e+37 }
0x152b   :  { %v3063_v13 = vpop.eup %3062 }
0x152c   :  { %v1068_v14 = vmul.f32 %v3063_v13, %v1066_v12  ;;  %vm1073_vm11 = vweird.f32 %v3063_v13 }
0x152d   :  { %vm1074_vm13 = vmor %vm1072_vm12, %vm1073_vm11 }
0x152e   :  { %v1069_v15 = vsub.f32 1.0, %v1068_v14 }
0x1530   :  { %v1070_v16 = vmul.f32 %v3063_v13, %v1069_v15 }
0x1532   :  { %v1071_v10 = vadd.f32 %v3063_v13, %v1070_v16 }
0x1534   :  { %v1075_v19 = vsel %vm1074_vm13, %v3063_v13, %v1071_v10 }
0x1535   :  { %v1080_v22 = vsel %vm1077_vm14, %v1079_v20, %v1075_v19 }
0x1536   :  { %v1083_v24 = vmul.f32 %v1080_v22, %v1027_v48 }
0x1593   :  { %v1086_v21 = vpop.permute.xlu1 %1085 }
0x1594   :  { %v1088_v23 = vmul.f32 %v1086_v21, %v1080_v22 }
0x1596   :  { %1090 = vrot.lane.b32.xlu2 %v1088_v23, %s3300_s18 }
0x15f0   :  { %v1091_v25 = vpop.permute.xlu2 %1090 }
0x15f1   :  { %v1093_v26 = vadd.f32 %v1091_v25, %v1083_v24 }
0x15f3   :  { %3064 = vtanh.f32 %v1093_v26 }
0x15f9   :  { %v3065_v27 = vpop.eup %3064 }
0x15fa   :  { %1096 = vrot.lane.b32.xlu0 %v3065_v27, %s3300_s18 }
0x166c   :  { %v1097_v28 = vpop.permute.xlu0 %1096 }
0x166d   :  { %v1099_v29 = vmul.f32 %v1097_v28, %v1080_v22  ;;  %v942_v28 = vpop.f32.mrf.mxu2 }
0x166f   :  { %1101 = vrot.lane.b32.xlu1 %v1099_v29, %s3301_s19  ;;  %v943_v29 = vadd.f32 %v3606_v11, %v942_v28 }
0x16e1   :  { %v1102_v30 = vpop.permute.xlu1 %1101 }
0x16e2   :  { %1104 = vst.msk [vmem:[#allocation3 + $0x8] sm:$0xff] %vm64_vm0, %v1102_v30  ;;  %2899 = vmatmul.msk.f32.vlgmr.msra.gmra.mxu3 %vm64_vm0, %v1102_v30 }
0x16e3   :  { %1384 = vmatpush.msra.mxu3 %v3570_v58 }
0x16e5   :  { %1385 = vmatpush.msra.mxu3 %v3572_v59 }
0x16e7   :  { %1386 = vmatpush.msra.mxu3 %v3579_v61 }
0x16e9   :  { %1387 = vmatpush.msra.mxu3 %v3583_v62 }
0x1765   :  { %v1125_v33 = vpop.f32.mrf.mxu3 }
0x1766   :  { %v1128_v34 = vadd.f32 %v1125_v33, %v937_v32 }
0x1768   :  { %3066 = vtanh.f32 %v1128_v34  ;;  %v2900_v36 = vmul.f32 -1.442695, %v1128_v34 }
0x176a   :  { %3068 = vpow2.f32 %v2900_v36 }
0x176e   :  { %v3067_v35 = vpop.eup %3066 }
0x176f   :  { %1151 = vrot.lane.b32.xlu2 %v3067_v35, %s3300_s18 }
0x1770   :  { %v3069_v37 = vpop.eup %3068 }
0x1771   :  { %v1132_v38 = vadd.f32 1.0, %v3069_v37 }
0x1773   :  { %3070 = vrcp.f32 %v1132_v38  ;;  %v1144_v44 = vand.u32 2147483648, %v1132_v38  ;;  %vm1138_vm1 = vweird.f32 %v1132_v38  ;;  %v1142_v2 = vand.u32 2147483647, %v1132_v38 }
0x1775   :  { %v1145_v45 = vor.u32 1.1754944e-38, %v1144_v44  ;;  %vm1143_vm3 = vcmp.eq.f32.partialorder %v1142_v2, 8.507059e+37 }
0x1779   :  { %v3071_v39 = vpop.eup %3070 }
0x177a   :  { %v1134_v40 = vmul.f32 %v3071_v39, %v1132_v38  ;;  %vm1139_vm15 = vweird.f32 %v3071_v39 }
0x177b   :  { %vm1140_vm2 = vmor %vm1138_vm1, %vm1139_vm15 }
0x177c   :  { %v1135_v41 = vsub.f32 1.0, %v1134_v40 }
0x177e   :  { %v1136_v42 = vmul.f32 %v3071_v39, %v1135_v41 }
0x1780   :  { %v1137_v43 = vadd.f32 %v3071_v39, %v1136_v42 }
0x1782   :  { %v1141_v3 = vsel %vm1140_vm2, %v3071_v39, %v1137_v43 }
0x1783   :  { %v1146_v8 = vsel %vm1143_vm3, %v1145_v45, %v1141_v3 }
0x1784   :  { %v1149_v48 = vmul.f32 %v1146_v8, %v1093_v26 }
0x17c9   :  { %v1152_v46 = vpop.permute.xlu2 %1151 }
0x17ca   :  { %v1154_v47 = vmul.f32 %v1152_v46, %v1146_v8 }
0x17cc   :  { %1156 = vrot.lane.b32.xlu0 %v1154_v47, %s3300_s18 }
0x183e   :  { %v1157_v49 = vpop.permute.xlu0 %1156 }
0x183f   :  { %v1159_v50 = vadd.f32 %v1157_v49, %v1149_v48 }
0x1841   :  { %3072 = vtanh.f32 %v1159_v50 }
0x1847   :  { %v3073_v51 = vpop.eup %3072 }
0x1848   :  { %1162 = vrot.lane.b32.xlu1 %v3073_v51, %s3300_s18 }
0x18ba   :  { %v1163_v52 = vpop.permute.xlu1 %1162 }
0x18bb   :  { %v1165_v53 = vmul.f32 %v1163_v52, %v1146_v8  ;;  %v945_v52 = vpop.f32.mrf.mxu2 }
0x18bd   :  { %1167 = vrot.lane.b32.xlu2 %v1165_v53, %s3301_s19  ;;  %v946_v53 = vadd.f32 %v3606_v11, %v945_v52 }
0x1917   :  { %v1168_v54 = vpop.permute.xlu2 %1167 }
0x1918   :  { %1170 = vst.msk [vmem:[#allocation3 + $0x10] sm:$0xff] %vm64_vm0, %v1168_v54  ;;  %2901 = vmatmul.msk.f32.vlgmr.msrb.gmra.mxu1 %vm64_vm0, %v1168_v54 }
0x1919   :  { %1450 = vmatpush.msrb.mxu1 %v3570_v58 }
0x191b   :  { %1451 = vmatpush.msrb.mxu1 %v3572_v59 }
0x191d   :  { %1452 = vmatpush.msrb.mxu1 %v3579_v61 }
0x191f   :  { %1453 = vmatpush.msrb.mxu1 %v3583_v62 }
0x1995   :  { %v1191_v57 = vpop.f32.mrf.mxu1 }
0x1996   :  { %v1194_v63 = vadd.f32 %v1191_v57, %v940_v56 }
0x1998   :  { %3074 = vtanh.f32 %v1194_v63  ;;  %v2902_v1 = vmul.f32 -1.442695, %v1194_v63 }
0x199a   :  { %3076 = vpow2.f32 %v2902_v1 }
0x199e   :  { %v3075_v0 = vpop.eup %3074 }
0x199f   :  { %1217 = vrot.lane.b32.xlu0 %v3075_v0, %s3300_s18 }
0x19a0   :  { %v3077_v5 = vpop.eup %3076 }
0x19a1   :  { %v1198_v7 = vadd.f32 1.0, %v3077_v5 }
0x19a3   :  { %3078 = vrcp.f32 %v1198_v7  ;;  %v1210_v15 = vand.u32 2147483648, %v1198_v7  ;;  %vm1204_vm5 = vweird.f32 %v1198_v7  ;;  %v1208_v16 = vand.u32 2147483647, %v1198_v7 }
0x19a5   :  { %v1211_v17 = vor.u32 1.1754944e-38, %v1210_v15  ;;  %vm1209_vm7 = vcmp.eq.f32.partialorder %v1208_v16, 8.507059e+37 }
0x19a9   :  { %v3079_v9 = vpop.eup %3078 }
0x19aa   :  { %v1200_v4 = vmul.f32 %v3079_v9, %v1198_v7  ;;  %vm1205_vm4 = vweird.f32 %v3079_v9 }
0x19ab   :  { %vm1206_vm6 = vmor %vm1204_vm5, %vm1205_vm4 }
0x19ac   :  { %v1201_v12 = vsub.f32 1.0, %v1200_v4 }
0x19ae   :  { %v1202_v13 = vmul.f32 %v3079_v9, %v1201_v12 }
0x19b0   :  { %v1203_v14 = vadd.f32 %v3079_v9, %v1202_v13 }
0x19b2   :  { %v1207_v10 = vsel %vm1206_vm6, %v3079_v9, %v1203_v14 }
0x19b3   :  { %v1212_v19 = vsel %vm1209_vm7, %v1211_v17, %v1207_v10 }
0x19b4   :  { %v1215_v21 = vmul.f32 %v1212_v19, %v1159_v50 }
0x1a11   :  { %v1218_v18 = vpop.permute.xlu0 %1217 }
0x1a12   :  { %v1220_v20 = vmul.f32 %v1218_v18, %v1212_v19 }
0x1a14   :  { %1222 = vrot.lane.b32.xlu1 %v1220_v20, %s3300_s18 }
0x1a86   :  { %v1223_v22 = vpop.permute.xlu1 %1222 }
0x1a87   :  { %v1225_v23 = vadd.f32 %v1223_v22, %v1215_v21  ;;  %v948_v21 = vpop.f32.mrf.mxu2 }
0x1a88   :  { %v949_v22 = vadd.f32 %v3606_v11, %v948_v21 }
0x1a89   :  { %3080 = vtanh.f32 %v1225_v23 }
0x1a8f   :  { %v3081_v24 = vpop.eup %3080 }
0x1a90   :  { %1228 = vrot.lane.b32.xlu2 %v3081_v24, %s3300_s18 }
0x1aea   :  { %v1229_v25 = vpop.permute.xlu2 %1228 }
0x1aeb   :  { %v1231_v26 = vmul.f32 %v1229_v25, %v1212_v19 }
0x1aed   :  { %1233 = vrot.lane.b32.xlu0 %v1231_v26, %s3301_s19 }
0x1b5f   :  { %v1234_v27 = vpop.permute.xlu0 %1233 }
0x1b60   :  { %1236 = vst.msk [vmem:[#allocation3 + $0x18] sm:$0xff] %vm64_vm0, %v1234_v27  ;;  %2903 = vmatmul.msk.f32.vlgmr.msrb.gmra.mxu3 %vm64_vm0, %v1234_v27 }
0x1b61   :  { %1516 = vmatpush.msrb.mxu3 %v3570_v58 }
0x1b63   :  { %1517 = vmatpush.msrb.mxu3 %v3572_v59 }
0x1b65   :  { %1518 = vmatpush.msrb.mxu3 %v3579_v61 }
0x1b67   :  { %1519 = vmatpush.msrb.mxu3 %v3583_v62 }
0x1be3   :  { %v1257_v30 = vpop.f32.mrf.mxu3 }
0x1be4   :  { %v1260_v31 = vadd.f32 %v1257_v30, %v943_v29 }
0x1be6   :  { %3082 = vtanh.f32 %v1260_v31  ;;  %v2904_v33 = vmul.f32 -1.442695, %v1260_v31 }
0x1be8   :  { %3084 = vpow2.f32 %v2904_v33 }
0x1bec   :  { %v3083_v32 = vpop.eup %3082 }
0x1bed   :  { %1283 = vrot.lane.b32.xlu1 %v3083_v32, %s3300_s18 }
0x1bee   :  { %v3085_v34 = vpop.eup %3084 }
0x1bef   :  { %v1264_v35 = vadd.f32 1.0, %v3085_v34 }
0x1bf1   :  { %3086 = vrcp.f32 %v1264_v35  ;;  %v1276_v41 = vand.u32 2147483648, %v1264_v35  ;;  %vm1270_vm9 = vweird.f32 %v1264_v35  ;;  %v1274_v42 = vand.u32 2147483647, %v1264_v35 }
0x1bf3   :  { %v1277_v44 = vor.u32 1.1754944e-38, %v1276_v41  ;;  %vm1275_vm11 = vcmp.eq.f32.partialorder %v1274_v42, 8.507059e+37 }
0x1bf7   :  { %v3087_v36 = vpop.eup %3086 }
0x1bf8   :  { %v1266_v37 = vmul.f32 %v3087_v36, %v1264_v35  ;;  %vm1271_vm8 = vweird.f32 %v3087_v36 }
0x1bf9   :  { %vm1272_vm10 = vmor %vm1270_vm9, %vm1271_vm8 }
0x1bfa   :  { %v1267_v38 = vsub.f32 1.0, %v1266_v37 }
0x1bfc   :  { %v1268_v39 = vmul.f32 %v3087_v36, %v1267_v38 }
0x1bfe   :  { %v1269_v40 = vadd.f32 %v3087_v36, %v1268_v39 }
0x1c00   :  { %v1273_v43 = vsel %vm1272_vm10, %v3087_v36, %v1269_v40 }
0x1c01   :  { %v1278_v3 = vsel %vm1275_vm11, %v1277_v44, %v1273_v43 }
0x1c02   :  { %v1281_v46 = vmul.f32 %v1278_v3, %v1225_v23 }
0x1c5f   :  { %v1284_v2 = vpop.permute.xlu1 %1283 }
0x1c60   :  { %v1286_v45 = vmul.f32 %v1284_v2, %v1278_v3 }
0x1c62   :  { %1288 = vrot.lane.b32.xlu2 %v1286_v45, %s3300_s18 }
0x1cbc   :  { %v1289_v8 = vpop.permute.xlu2 %1288 }
0x1cbd   :  { %v1291_v47 = vadd.f32 %v1289_v8, %v1281_v46  ;;  %v951_v46 = vpop.f32.mrf.mxu2 }
0x1cbe   :  { %v952_v8 = vadd.f32 %v3606_v11, %v951_v46 }
0x1cbf   :  { %3088 = vtanh.f32 %v1291_v47 }
0x1cc5   :  { %v3089_v48 = vpop.eup %3088 }
0x1cc6   :  { %1294 = vrot.lane.b32.xlu0 %v3089_v48, %s3300_s18 }
0x1d38   :  { %v1295_v49 = vpop.permute.xlu0 %1294 }
0x1d39   :  { %v1297_v50 = vmul.f32 %v1295_v49, %v1278_v3 }
0x1d3b   :  { %1299 = vrot.lane.b32.xlu1 %v1297_v50, %s3301_s19 }
0x1dad   :  { %v1300_v51 = vpop.permute.xlu1 %1299 }
0x1dae   :  { %1302 = vst.msk [vmem:[#allocation3 + $0x20] sm:$0xff] %vm64_vm0, %v1300_v51  ;;  %2905 = vmatmul.msk.f32.vlgmr.msra.gmra.mxu1 %vm64_vm0, %v1300_v51 }
0x1daf   :  { %1582 = vmatpush.msra.mxu1 %v3570_v58 }
0x1db1   :  { %1583 = vmatpush.msra.mxu1 %v3572_v59 }
0x1db3   :  { %1584 = vmatpush.msra.mxu1 %v3579_v61 }
0x1db5   :  { %1585 = vmatpush.msra.mxu1 %v3583_v62 }
0x1e2b   :  { %v1323_v54 = vpop.f32.mrf.mxu1 }
0x1e2c   :  { %v1326_v55 = vadd.f32 %v1323_v54, %v946_v53 }
0x1e2e   :  { %3090 = vtanh.f32 %v1326_v55  ;;  %v2906_v57 = vmul.f32 -1.442695, %v1326_v55 }
0x1e30   :  { %3092 = vpow2.f32 %v2906_v57  ;;  %v167_v57 = vpop.f32.mrf.mxu0 }
0x1e34   :  { %v3091_v56 = vpop.eup %3090 }
0x1e35   :  { %1349 = vrot.lane.b32.xlu2 %v3091_v56, %s3300_s18 }
0x1e36   :  { %v3093_v63 = vpop.eup %3092 }
0x1e37   :  { %v1330_v0 = vadd.f32 1.0, %v3093_v63 }
0x1e39   :  { %3094 = vrcp.f32 %v1330_v0  ;;  %v1342_v62 = vand.u32 2147483648, %v1330_v0  ;;  %vm1336_vm13 = vweird.f32 %v1330_v0  ;;  %v1340_v7 = vand.u32 2147483647, %v1330_v0 }
0x1e3b   :  { %v1343_v4 = vor.u32 1.1754944e-38, %v1342_v62  ;;  %vm1341_vm15 = vcmp.eq.f32.partialorder %v1340_v7, 8.507059e+37 }
0x1e3f   :  { %v3095_v58 = vpop.eup %3094 }
0x1e40   :  { %v1332_v59 = vmul.f32 %v3095_v58, %v1330_v0  ;;  %vm1337_vm12 = vweird.f32 %v3095_v58 }
0x1e41   :  { %vm1338_vm14 = vmor %vm1336_vm13, %vm1337_vm12 }
0x1e42   :  { %v1333_v1 = vsub.f32 1.0, %v1332_v59  ;;  %v3250_v59 = vld [vmem:[%s4273_s5] ss:$0 sm:$0xff] }
0x1e44   :  { %v1334_v61 = vmul.f32 %v3095_v58, %v1333_v1  ;;  %v168_v1 = vadd.f32 %v3250_v59, %v167_v57  ;;  %v3746_v57 = vld [vmem:[%s4274_s6 + $0x20] sm:$0xff] }
0x1e46   :  { %v1335_v5 = vadd.f32 %v3095_v58, %v1334_v61  ;;  %v819_v62 = vadd.f32 %v3638_v60, %v168_v1 }
0x1e48   :  { %v1339_v9 = vsel %vm1338_vm14, %v3095_v58, %v1335_v5 }
0x1e49   :  { %v1344_v13 = vsel %vm1341_vm15, %v1343_v4, %v1339_v9 }
0x1e4a   :  { %v1347_v15 = vmul.f32 %v1344_v13, %v1291_v47 }
0x1e8f   :  { %v1350_v12 = vpop.permute.xlu2 %1349 }
0x1e90   :  { %v1352_v14 = vmul.f32 %v1350_v12, %v1344_v13 }
0x1e92   :  { %1354 = vrot.lane.b32.xlu0 %v1352_v14, %s3300_s18 }
0x1f04   :  { %v1355_v16 = vpop.permute.xlu0 %1354 }
0x1f05   :  { %v1357_v10 = vadd.f32 %v1355_v16, %v1347_v15 }
0x1f07   :  { %3096 = vtanh.f32 %v1357_v10 }
0x1f0d   :  { %v3097_v17 = vpop.eup %3096 }
0x1f0e   :  { %1360 = vrot.lane.b32.xlu1 %v3097_v17, %s3300_s18 }
0x1f80   :  { %v1361_v18 = vpop.permute.xlu1 %1360 }
0x1f81   :  { %v1363_v19 = vmul.f32 %v1361_v18, %v1344_v13 }
0x1f83   :  { %1365 = vrot.lane.b32.xlu2 %v1363_v19, %s3301_s19 }
0x1fdd   :  { %v1366_v20 = vpop.permute.xlu2 %1365 }
0x1fde   :  { %1368 = vst.msk [vmem:[#allocation3 + $0x28] sm:$0xff] %vm64_vm0, %v1366_v20  ;;  %2907 = vmatmul.msk.f32.vlgmr.msra.gmra.mxu3 %vm64_vm0, %v1366_v20 }
0x2061   :  { %v1389_v23 = vpop.f32.mrf.mxu3 }
0x2062   :  { %v1392_v24 = vadd.f32 %v1389_v23, %v949_v22 }
0x2064   :  { %3098 = vtanh.f32 %v1392_v24  ;;  %v2908_v26 = vmul.f32 -1.442695, %v1392_v24 }
0x2066   :  { %3100 = vpow2.f32 %v2908_v26 }
0x206a   :  { %v3099_v25 = vpop.eup %3098 }
0x206b   :  { %1415 = vrot.lane.b32.xlu0 %v3099_v25, %s3300_s18 }
0x206c   :  { %v3101_v27 = vpop.eup %3100 }
0x206d   :  { %v1396_v28 = vadd.f32 1.0, %v3101_v27 }
0x206f   :  { %3102 = vrcp.f32 %v1396_v28  ;;  %v1408_v34 = vand.u32 2147483648, %v1396_v28  ;;  %vm1402_vm2 = vweird.f32 %v1396_v28  ;;  %v1406_v35 = vand.u32 2147483647, %v1396_v28 }
0x2071   :  { %v1409_v37 = vor.u32 1.1754944e-38, %v1408_v34  ;;  %vm1407_vm4 = vcmp.eq.f32.partialorder %v1406_v35, 8.507059e+37 }
0x2075   :  { %v3103_v29 = vpop.eup %3102 }
0x2076   :  { %v1398_v30 = vmul.f32 %v3103_v29, %v1396_v28  ;;  %vm1403_vm1 = vweird.f32 %v3103_v29 }
0x2077   :  { %vm1404_vm3 = vmor %vm1402_vm2, %vm1403_vm1  ;;  %vm1668_vm2 = vcmask 523264  }
0x2078   :  { %v1399_v31 = vsub.f32 1.0, %v1398_v30 }
0x207a   :  { %v1400_v32 = vmul.f32 %v3103_v29, %v1399_v31 }
0x207c   :  { %v1401_v33 = vadd.f32 %v3103_v29, %v1400_v32 }
0x207e   :  { %v1405_v36 = vsel %vm1404_vm3, %v3103_v29, %v1401_v33  ;;  %v954_v33 = vpop.f32.mrf.mxu2 }
0x207f   :  { %v1410_v39 = vsel %vm1407_vm4, %v1409_v37, %v1405_v36  ;;  %v955_v34 = vadd.f32 %v3606_v11, %v954_v33 }
0x2080   :  { %v1413_v41 = vmul.f32 %v1410_v39, %v1357_v10  ;;  %v2880_v10 = vmul.f32 -1.442695, %v819_v62 }
0x20dd   :  { %v1416_v38 = vpop.permute.xlu0 %1415 }
0x20de   :  { %v1418_v40 = vmul.f32 %v1416_v38, %v1410_v39 }
0x20e0   :  { %1420 = vrot.lane.b32.xlu1 %v1418_v40, %s3300_s18 }
0x2152   :  { %v1421_v42 = vpop.permute.xlu1 %1420 }
0x2153   :  { %v1423_v43 = vadd.f32 %v1421_v42, %v1413_v41 }
0x2155   :  { %3104 = vtanh.f32 %v1423_v43 }
0x215b   :  { %v3105_v44 = vpop.eup %3104 }
0x215c   :  { %1426 = vrot.lane.b32.xlu2 %v3105_v44, %s3300_s18 }
0x21b6   :  { %v1427_v2 = vpop.permute.xlu2 %1426 }
0x21b7   :  { %v1429_v3 = vmul.f32 %v1427_v2, %v1410_v39 }
0x21b9   :  { %1431 = vrot.lane.b32.xlu0 %v1429_v3, %s3301_s19 }
0x222b   :  { %v1432_v45 = vpop.permute.xlu0 %1431 }
0x222c   :  { %1434 = vst.msk [vmem:[#allocation3 + $0x30] sm:$0xff] %vm64_vm0, %v1432_v45  ;;  %2909 = vmatmul.msk.f32.vlgmr.msrb.gmra.mxu1 %vm64_vm0, %v1432_v45 }
0x22a9   :  { %v1455_v47 = vpop.f32.mrf.mxu1 }
0x22aa   :  { %v1458_v48 = vadd.f32 %v1455_v47, %v952_v8 }
0x22ac   :  { %3106 = vtanh.f32 %v1458_v48  ;;  %v2910_v50 = vmul.f32 -1.442695, %v1458_v48 }
0x22ae   :  { %3108 = vpow2.f32 %v2910_v50 }
0x22b2   :  { %v3107_v49 = vpop.eup %3106 }
0x22b3   :  { %1481 = vrot.lane.b32.xlu1 %v3107_v49, %s3300_s18 }
0x22b4   :  { %v3109_v51 = vpop.eup %3108 }
0x22b5   :  { %v1462_v52 = vadd.f32 1.0, %v3109_v51 }
0x22b7   :  { %3110 = vrcp.f32 %v1462_v52  ;;  %v1474_v0 = vand.u32 2147483648, %v1462_v52  ;;  %vm1468_vm6 = vweird.f32 %v1462_v52  ;;  %v1472_v58 = vand.u32 2147483647, %v1462_v52 }
0x22b8   :  { %3112 = vtanh.f32 %v819_v62 }
0x22b9   :  { %v1475_v5 = vor.u32 1.1754944e-38, %v1474_v0  ;;  %vm1473_vm8 = vcmp.eq.f32.partialorder %v1472_v58, 8.507059e+37  ;;  %v3760_v0 = vld [vmem:[%s4274_s6 + $0x10] sm:$0xff]  ;;  %v3767_v58 = vld [vmem:[%s4274_s6 + $0x8] sm:$0xff] }
0x22bd   :  { %v3111_v53 = vpop.eup %3110 }
0x22be   :  { %v1464_v54 = vmul.f32 %v3111_v53, %v1462_v52  ;;  %vm1469_vm5 = vweird.f32 %v3111_v53  ;;  %v3113_v12 = vpop.eup %3112 }
0x22bf   :  { %vm1470_vm7 = vmor %vm1468_vm6, %vm1469_vm5 }
0x22c0   :  { %v1465_v55 = vsub.f32 1.0, %v1464_v54  ;;  %v3727_v54 = vld [vmem:[%s4274_s6 + $0x38] sm:$0xff] }
0x22c1   :  { %1680 = vmatpush.msra.mxu3 %v3727_v54  ;;  %2196 = vmatpush.msra.mxu2 %v3727_v54 }
0x22c2   :  { %v1466_v56 = vmul.f32 %v3111_v53, %v1465_v55  ;;  %v3732_v55 = vld [vmem:[%s4274_s6 + $0x30] sm:$0xff] }
0x22c3   :  { %1681 = vmatpush.msra.mxu3 %v3732_v55  ;;  %2197 = vmatpush.msra.mxu2 %v3732_v55 }
0x22c4   :  { %v1467_v63 = vadd.f32 %v3111_v53, %v1466_v56  ;;  %v3739_v56 = vld [vmem:[%s4274_s6 + $0x28] sm:$0xff] }
0x22c5   :  { %1682 = vmatpush.msra.mxu3 %v3739_v56  ;;  %2198 = vmatpush.msra.mxu2 %v3739_v56 }
0x22c6   :  { %v1471_v61 = vsel %vm1470_vm7, %v3111_v53, %v1467_v63  ;;  %v3753_v63 = vld [vmem:[%s4274_s6 + $0x18] sm:$0xff] }
0x22c7   :  { %v1476_v9 = vsel %vm1473_vm8, %v1475_v5, %v1471_v61  ;;  %1683 = vmatpush.msra.mxu3 %v3746_v57  ;;  %2199 = vmatpush.msra.mxu2 %v3746_v57  ;;  %v3777_v61 = vld [vmem:[%s4274_s6] sm:$0xff] }
0x22c8   :  { %v1479_v13 = vmul.f32 %v1476_v9, %v1423_v43 }
0x22c9   :  { %1684 = vmatpush.msra.mxu3 %v3753_v63  ;;  %2200 = vmatpush.msra.mxu2 %v3753_v63 }
0x22cb   :  { %1685 = vmatpush.msra.mxu3 %v3760_v0  ;;  %2201 = vmatpush.msra.mxu2 %v3760_v0 }
0x22cd   :  { %1686 = vmatpush.msra.mxu3 %v3767_v58  ;;  %2202 = vmatpush.msra.mxu2 %v3767_v58 }
0x22cf   :  { %1687 = vmatpush.msra.mxu3 %v3777_v61  ;;  %2203 = vmatpush.msra.mxu2 %v3777_v61 }
0x2325   :  { %v1482_v7 = vpop.permute.xlu1 %1481 }
0x2326   :  { %v1484_v4 = vmul.f32 %v1482_v7, %v1476_v9 }
0x2328   :  { %1486 = vrot.lane.b32.xlu2 %v1484_v4, %s3300_s18  ;;  %v1660_v4 = vld [vmem:[%s4270_s2] sm:$0xff] }
0x2330   :  { %842 = vrot.lane.b32.xlu2 %v3113_v12, %s3300_s18 }
0x2382   :  { %v1487_v14 = vpop.permute.xlu2 %1486 }
0x2383   :  { %v3706_v15 = vadd.f32 %v1487_v14, %v1479_v13 }
0x2385   :  { %3114 = vtanh.f32 %v3706_v15 }
0x2386   :  { %3116 = vpow2.f32 %v2880_v10 }
0x238a   :  { %v843_v29 = vpop.permute.xlu2 %842 }
0x238b   :  { %v3115_v16 = vpop.eup %3114 }
0x238c   :  { %1492 = vrot.lane.b32.xlu0 %v3115_v16, %s3300_s18  ;;  %v3117_v60 = vpop.eup %3116  ;;  %v3796_v16 = vld [vmem:[%s4275_s7] ss:$0 sm:$0xff] }
0x238d   :  { %v823_v17 = vadd.f32 1.0, %v3117_v60 }
0x238f   :  { %3118 = vrcp.f32 %v823_v17  ;;  %v835_v25 = vand.u32 2147483648, %v823_v17  ;;  %vm829_vm10 = vweird.f32 %v823_v17  ;;  %v833_v26 = vand.u32 2147483647, %v823_v17 }
0x2391   :  { %v836_v28 = vor.u32 1.1754944e-38, %v835_v25  ;;  %vm834_vm12 = vcmp.eq.f32.partialorder %v833_v26, 8.507059e+37  ;;  %v3251_v25 = vld [vmem:[%s4273_s5 + $0x1] ss:$0 sm:$0xff] }
0x2395   :  { %v3119_v18 = vpop.eup %3118 }
0x2396   :  { %v825_v19 = vmul.f32 %v3119_v18, %v823_v17  ;;  %vm830_vm9 = vweird.f32 %v3119_v18 }
0x2397   :  { %vm831_vm11 = vmor %vm829_vm10, %vm830_vm9 }
0x2398   :  { %v826_v20 = vsub.f32 1.0, %v825_v19 }
0x239a   :  { %v827_v21 = vmul.f32 %v3119_v18, %v826_v20 }
0x239c   :  { %v828_v23 = vadd.f32 %v3119_v18, %v827_v21 }
0x239e   :  { %v832_v27 = vsel %vm831_vm11, %v3119_v18, %v828_v23 }
0x239f   :  { %v837_v30 = vsel %vm834_vm12, %v836_v28, %v832_v27 }
0x23a0   :  { %v845_v31 = vmul.f32 %v843_v29, %v837_v30  ;;  %v840_v38 = vmul.f32 %v837_v30, %v3614_v6 }
0x23fe   :  { %v1493_v22 = vpop.permute.xlu0 %1492 }
0x23ff   :  { %v1495_v24 = vmul.f32 %v1493_v22, %v1476_v9 }
0x2401   :  { %1497 = vrot.lane.b32.xlu1 %v1495_v24, %s3301_s19 }
0x2409   :  { %847 = vrot.lane.b32.xlu1 %v845_v31, %s3300_s18 }
0x2473   :  { %v1498_v32 = vpop.permute.xlu1 %1497 }
0x2474   :  { %1500 = vst.msk [vmem:[#allocation3 + $0x38] sm:$0xff] %vm64_vm0, %v1498_v32  ;;  %2911 = vmatmul.msk.f32.vlgmr.msrb.gmra.mxu3 %vm64_vm0, %v1498_v32 }
0x247b   :  { %v848_v37 = vpop.permute.xlu1 %847 }
0x247c   :  { %v3716_v39 = vadd.f32 %v848_v37, %v840_v38 }
0x24f7   :  { %v1521_v35 = vpop.f32.mrf.mxu3 }
0x24f8   :  { %v1524_v36 = vadd.f32 %v1521_v35, %v955_v34 }
0x24fa   :  { %3120 = vtanh.f32 %v1524_v36  ;;  %v2912_v42 = vmul.f32 -1.442695, %v1524_v36 }
0x24fb   :  { %3122 = vtanh.f32 %v3716_v39 }
0x24fc   :  { %3124 = vpow2.f32 %v2912_v42 }
0x2500   :  { %v3121_v40 = vpop.eup %3120 }
0x2501   :  { %1547 = vrot.lane.b32.xlu0 %v3121_v40, %s3300_s18  ;;  %v3123_v41 = vpop.eup %3122 }
0x2502   :  { %v3125_v43 = vpop.eup %3124 }
0x2503   :  { %v1528_v11 = vadd.f32 1.0, %v3125_v43 }
0x2505   :  { %3126 = vrcp.f32 %v1528_v11  ;;  %v1540_v46 = vand.u32 2147483648, %v1528_v11  ;;  %vm1534_vm14 = vweird.f32 %v1528_v11  ;;  %v1538_v8 = vand.u32 2147483647, %v1528_v11 }
0x2507   :  { %v1541_v48 = vor.u32 1.1754944e-38, %v1540_v46  ;;  %vm1539_vm1 = vcmp.eq.f32.partialorder %v1538_v8, 8.507059e+37 }
0x2509   :  { %853 = vrot.lane.b32.xlu0 %v3123_v41, %s3300_s18 }
0x250b   :  { %v3127_v44 = vpop.eup %3126 }
0x250c   :  { %v1530_v2 = vmul.f32 %v3127_v44, %v1528_v11  ;;  %vm1535_vm13 = vweird.f32 %v3127_v44 }
0x250d   :  { %vm1536_vm15 = vmor %vm1534_vm14, %vm1535_vm13 }
0x250e   :  { %v1531_v3 = vsub.f32 1.0, %v1530_v2 }
0x2510   :  { %v1532_v45 = vmul.f32 %v3127_v44, %v1531_v3 }
0x2512   :  { %v1533_v6 = vadd.f32 %v3127_v44, %v1532_v45 }
0x2514   :  { %v1537_v47 = vsel %vm1536_vm15, %v3127_v44, %v1533_v6 }
0x2515   :  { %v1542_v50 = vsel %vm1539_vm1, %v1541_v48, %v1537_v47 }
0x2516   :  { %v1545_v59 = vmul.f32 %v1542_v50, %v3706_v15 }
0x2573   :  { %v1548_v49 = vpop.permute.xlu0 %1547 }
0x2574   :  { %v1550_v51 = vmul.f32 %v1548_v49, %v1542_v50 }
0x2576   :  { %1552 = vrot.lane.b32.xlu2 %v1550_v51, %s3300_s18 }
0x257b   :  { %v854_v52 = vpop.permute.xlu0 %853 }
0x257c   :  { %v856_v53 = vmul.f32 %v854_v52, %v837_v30 }
0x257e   :  { %1661 = vrot.lane.b32.xlu0 %v856_v53, %s3302_s26  ;;  %858 = vrot.lane.b32.xlu2 %v856_v53, %s3301_s19 }
0x25d0   :  { %v1553_v1 = vpop.permute.xlu2 %1552 }
0x25d1   :  { %v3779_v5 = vadd.f32 %v1553_v1, %v1545_v59 }
0x25d3   :  { %3128 = vtanh.f32 %v3779_v5 }
0x25d8   :  { %v859_v62 = vpop.permute.xlu2 %858 }
0x25d9   :  { %v3129_v7 = vpop.eup %3128  ;;  %862 = vst.msk [vmem:[#allocation3 + $0x48] sm:$0xff] %vm64_vm0, %v859_v62 }
0x25da   :  { %1558 = vrot.lane.b32.xlu1 %v3129_v7, %s3300_s18 }
0x25e0   :  { %v872_v9 = vld [vmem:[#allocation3 + $0x48] sm:$0xff] }
0x25e1   :  { %2895 = vmatmul.msk.f32.gmra.mxu2 %vm64_vm0, %v872_v9 }
0x25f0   :  { %v1662_v12 = vpop.permute.xlu0 %1661 }
0x25f1   :  { %v1664_v13 = vsel %vm64_vm0, %v1660_v4, %v1662_v12  ;;  %v3825_v12 = vld [vmem:[%s4274_s6 + $0x78] sm:$0xff] }
0x25f2   :  { %2924 = vmatmul.msk.f32.vlgmr.msra.gmra.mxu3 %vm1668_vm2, %v1664_v13  ;;  %1751 = vmatpush.msrb.mxu0 %v3825_v12  ;;  %v3837_v13 = vld [vmem:[%s4274_s6 + $0x68] sm:$0xff] }
0x25f3   :  { %1924 = vmatpush.msrb.mxu3 %v3825_v12  ;;  %2429 = vmatpush.msrb.mxu2 %v3825_v12 }
0x264c   :  { %v1559_v14 = vpop.permute.xlu1 %1558 }
0x264d   :  { %v1561_v15 = vmul.f32 %v1559_v14, %v1542_v50  ;;  %v3845_v14 = vld [vmem:[%s4274_s6 + $0x60] sm:$0xff] }
0x264f   :  { %1563 = vrot.lane.b32.xlu1 %v1561_v15, %s3301_s19  ;;  %v3853_v15 = vld [vmem:[%s4274_s6 + $0x58] sm:$0xff] }
0x2664   :  { %v957_v23 = vpop.f32.mrf.mxu2 }
0x2665   :  { %v958_v26 = vadd.f32 %v3251_v25, %v957_v23  ;;  %v3895_v23 = vld [vmem:[%s4275_s7 + $0x1] ss:$0 sm:$0xff] }
0x2675   :  { %v1689_v10 = vpop.f32.mrf.mxu3 }
0x2676   :  { %v1690_v60 = vadd.f32 %v3796_v16, %v1689_v10  ;;  %v3861_v10 = vld [vmem:[%s4274_s6 + $0x50] sm:$0xff] }
0x2678   :  { %3130 = vtanh.f32 %v1690_v60  ;;  %v2925_v19 = vmul.f32 -1.442695, %v1690_v60  ;;  %v3869_v60 = vld [vmem:[%s4274_s6 + $0x48] sm:$0xff] }
0x267a   :  { %3132 = vpow2.f32 %v2925_v19 }
0x267e   :  { %v3131_v17 = vpop.eup %3130 }
0x267f   :  { %1714 = vrot.lane.b32.xlu0 %v3131_v17, %s3300_s18  ;;  %v3877_v17 = vld [vmem:[%s4274_s6 + $0x40] sm:$0xff] }
0x2680   :  { %v3133_v20 = vpop.eup %3132 }
0x2681   :  { %v1695_v21 = vadd.f32 1.0, %v3133_v20 }
0x2683   :  { %3134 = vrcp.f32 %v1695_v21  ;;  %v1707_v33 = vand.u32 2147483648, %v1695_v21  ;;  %vm1701_vm4 = vweird.f32 %v1695_v21  ;;  %v1705_v34 = vand.u32 2147483647, %v1695_v21 }
0x2685   :  { %v1708_v37 = vor.u32 1.1754944e-38, %v1707_v33  ;;  %vm1706_vm6 = vcmp.eq.f32.partialorder %v1705_v34, 8.507059e+37 }
0x2689   :  { %v3135_v22 = vpop.eup %3134 }
0x268a   :  { %v1697_v24 = vmul.f32 %v3135_v22, %v1695_v21  ;;  %vm1702_vm3 = vweird.f32 %v3135_v22 }
0x268b   :  { %vm1703_vm5 = vmor %vm1701_vm4, %vm1702_vm3 }
0x268c   :  { %v1698_v27 = vsub.f32 1.0, %v1697_v24 }
0x268e   :  { %v1699_v30 = vmul.f32 %v3135_v22, %v1698_v27 }
0x2690   :  { %v1700_v31 = vadd.f32 %v3135_v22, %v1699_v30 }
0x2692   :  { %v1704_v35 = vsel %vm1703_vm5, %v3135_v22, %v1700_v31 }
0x2693   :  { %v1709_v38 = vsel %vm1706_vm6, %v1708_v37, %v1704_v35 }
0x2694   :  { %v1712_v51 = vmul.f32 %v1709_v38, %v3716_v39 }
0x26c1   :  { %v1564_v18 = vpop.permute.xlu1 %1563 }
0x26c2   :  { %1566 = vst.msk [vmem:[#allocation3 + $0x40] sm:$0xff] %vm64_vm0, %v1564_v18  ;;  %2913 = vmatmul.msk.f32.vlgmr.msra.gmra.mxu1 %vm64_vm0, %v1564_v18 }
0x26f1   :  { %v1715_v36 = vpop.permute.xlu0 %1714 }
0x26f2   :  { %v1717_v40 = vmul.f32 %v1715_v36, %v1709_v38 }
0x273f   :  { %v1587_v28 = vpop.f32.mrf.mxu1 }
0x2740   :  { %v1590_v29 = vadd.f32 %v1587_v28, %v958_v26 }
0x2742   :  { %3136 = vtanh.f32 %v1590_v29  ;;  %v2914_v41 = vmul.f32 -1.442695, %v1590_v29 }
0x2744   :  { %3138 = vpow2.f32 %v2914_v41 }
0x2748   :  { %v3137_v32 = vpop.eup %3136 }
0x2749   :  { %1613 = vrot.lane.b32.xlu2 %v3137_v32, %s3300_s18 }
0x274a   :  { %v3139_v42 = vpop.eup %3138 }
0x274b   :  { %v1594_v43 = vadd.f32 1.0, %v3139_v42 }
0x274d   :  { %3140 = vrcp.f32 %v1594_v43  ;;  %v1606_v6 = vand.u32 2147483648, %v1594_v43  ;;  %vm1600_vm8 = vweird.f32 %v1594_v43  ;;  %v1604_v46 = vand.u32 2147483647, %v1594_v43 }
0x274f   :  { %v1607_v47 = vor.u32 1.1754944e-38, %v1606_v6  ;;  %vm1605_vm10 = vcmp.eq.f32.partialorder %v1604_v46, 8.507059e+37  ;;  %v3922_v6 = vld [vmem:[%s4276_s8 + $0x8] sm:$0xff]  ;;  %v3930_v46 = vld [vmem:[%s4276_s8] sm:$0xff] }
0x2751   :  { %1719 = vrot.lane.b32.xlu2 %v1717_v40, %s3300_s18 }
0x2753   :  { %v3141_v11 = vpop.eup %3140 }
0x2754   :  { %v1596_v44 = vmul.f32 %v3141_v11, %v1594_v43  ;;  %vm1601_vm7 = vweird.f32 %v3141_v11 }
0x2755   :  { %vm1602_vm9 = vmor %vm1600_vm8, %vm1601_vm7 }
0x2756   :  { %v1597_v2 = vsub.f32 1.0, %v1596_v44 }
0x2758   :  { %v1598_v3 = vmul.f32 %v3141_v11, %v1597_v2 }
0x275a   :  { %v1599_v45 = vadd.f32 %v3141_v11, %v1598_v3  ;;  %v3910_v3 = vld [vmem:[%s4276_s8 + $0x18] sm:$0xff] }
0x275b   :  { %1820 = vmatpush.msrb.mxu1 %v3910_v3 }
0x275c   :  { %v1603_v8 = vsel %vm1602_vm9, %v3141_v11, %v1599_v45  ;;  %v3915_v45 = vld [vmem:[%s4276_s8 + $0x10] sm:$0xff]  ;;  %s2929_s8 = sld [smem:[#allocation4 + $0x1]] }
0x275d   :  { %v1608_v49 = vsel %vm1605_vm10, %v1607_v47, %v1603_v8  ;;  %1821 = vmatpush.msrb.mxu1 %v3915_v45 }
0x275e   :  { %v1611_v1 = vmul.f32 %v1608_v49, %v3779_v5  ;;  %v3830_v5 = vld [vmem:[%s4274_s6 + $0x70] sm:$0xff]  ;;  %s2947_s6 = sld [smem:[#allocation4 + $0x4]] }
0x275f   :  { %1752 = vmatpush.msrb.mxu0 %v3830_v5  ;;  %1925 = vmatpush.msrb.mxu3 %v3830_v5 }
0x2760   :  { %2430 = vmatpush.msrb.mxu2 %v3830_v5  ;;  %1822 = vmatpush.msrb.mxu1 %v3922_v6 }
0x2761   :  { %1753 = vmatpush.msrb.mxu0 %v3837_v13  ;;  %1926 = vmatpush.msrb.mxu3 %v3837_v13 }
0x2762   :  { %2431 = vmatpush.msrb.mxu2 %v3837_v13  ;;  %1823 = vmatpush.msrb.mxu1 %v3930_v46  ;;  %p1835_p0 = scmp.ne.s32.totalorder %s2929_s8, 0 }
0x2763   :  { %1754 = vmatpush.msrb.mxu0 %v3845_v14  ;;  %1927 = vmatpush.msrb.mxu3 %v3845_v14 }
0x2764   :  { %2432 = vmatpush.msrb.mxu2 %v3845_v14  ;;  %1856 = vmatpush.msra.mxu1 %v3727_v54  ;;  %s1837_s30 = scalar_select %p1835_p0, 1, 0 }
0x2765   :  { %1755 = vmatpush.msrb.mxu0 %v3853_v15  ;;  %1928 = vmatpush.msrb.mxu3 %v3853_v15  ;;  %p2340_p3 = scmp.ne.s32.totalorder %s2947_s6, 0 }
0x2766   :  { %2433 = vmatpush.msrb.mxu2 %v3853_v15  ;;  %1857 = vmatpush.msra.mxu1 %v3732_v55 }
0x2767   :  { %1756 = vmatpush.msrb.mxu0 %v3861_v10  ;;  %1929 = vmatpush.msrb.mxu3 %v3861_v10  ;;  %s2342_s0 = scalar_select %p2340_p3, 1, 0 }
0x2768   :  { %2434 = vmatpush.msrb.mxu2 %v3861_v10  ;;  %1858 = vmatpush.msra.mxu1 %v3739_v56 }
0x2769   :  { %1757 = vmatpush.msrb.mxu0 %v3869_v60  ;;  %1930 = vmatpush.msrb.mxu3 %v3869_v60 }
0x276a   :  { %2435 = vmatpush.msrb.mxu2 %v3869_v60  ;;  %1859 = vmatpush.msra.mxu1 %v3746_v57 }
0x276b   :  { %1758 = vmatpush.msrb.mxu0 %v3877_v17  ;;  %1931 = vmatpush.msrb.mxu3 %v3877_v17 }
0x276c   :  { %2436 = vmatpush.msrb.mxu2 %v3877_v17  ;;  %1860 = vmatpush.msra.mxu1 %v3753_v63 }
0x276d   :  { %1990 = vmatpush.msra.mxu0 %v3910_v3  ;;  %2160 = vmatpush.msra.mxu3 %v3910_v3 }
0x276e   :  { %1861 = vmatpush.msra.mxu1 %v3760_v0 }
0x276f   :  { %1991 = vmatpush.msra.mxu0 %v3915_v45  ;;  %2161 = vmatpush.msra.mxu3 %v3915_v45 }
0x2770   :  { %1862 = vmatpush.msra.mxu1 %v3767_v58 }
0x2771   :  { %1992 = vmatpush.msra.mxu0 %v3922_v6  ;;  %2162 = vmatpush.msra.mxu3 %v3922_v6 }
0x2772   :  { %1863 = vmatpush.msra.mxu1 %v3777_v61 }
0x2773   :  { %1993 = vmatpush.msra.mxu0 %v3930_v46  ;;  %2163 = vmatpush.msra.mxu3 %v3930_v46 }
0x27a3   :  { %v1614_v48 = vpop.permute.xlu2 %1613 }
0x27a4   :  { %v1616_v50 = vmul.f32 %v1614_v48, %v1608_v49 }
0x27a6   :  { %1618 = vrot.lane.b32.xlu1 %v1616_v50, %s3300_s18  ;;  %v1838_v50 = vstv %s1837_s30 }
0x27a7   :  { %vm1839_vm15 = vcmp.eq.s32.totalorder %v1838_v50, 1 }
0x27ab   :  { %v1720_v52 = vpop.permute.xlu2 %1719 }
0x27ac   :  { %v3809_v53 = vadd.f32 %v1720_v52, %v1712_v51  ;;  %v1836_v52 = vld [vmem:[%s4270_s2 + $0x8] sm:$0xff] }
0x27ae   :  { %3142 = vtanh.f32 %v3809_v53 }
0x27b4   :  { %v3143_v59 = vpop.eup %3142 }
0x27b5   :  { %1725 = vrot.lane.b32.xlu1 %v3143_v59, %s3300_s18 }
0x2818   :  { %v1619_v62 = vpop.permute.xlu1 %1618 }
0x2819   :  { %v3814_v7 = vadd.f32 %v1619_v62, %v1611_v1 }
0x281b   :  { %3144 = vtanh.f32 %v3814_v7 }
0x2821   :  { %v3145_v9 = vpop.eup %3144 }
0x2822   :  { %1624 = vrot.lane.b32.xlu0 %v3145_v9, %s3300_s18 }
0x2827   :  { %v1726_v4 = vpop.permute.xlu1 %1725 }
0x2828   :  { %v3818_v39 = vmul.f32 %v1726_v4, %v1709_v38 }
0x282a   :  { %1730 = vrot.lane.b32.xlu2 %v3818_v39, %s3301_s19 }
0x2884   :  { %v1731_v20 = vpop.permute.xlu2 %1730 }
0x2894   :  { %v1625_v18 = vpop.permute.xlu0 %1624 }
0x2895   :  { %v3886_v19 = vmul.f32 %v1625_v18, %v1608_v49  ;;  %v3968_v49 = vld [vmem:[%s4277_s9] ss:$0 sm:$0xff] }
0x2897   :  { %1733 = vrot.lane.b32.xlu0 %v3886_v19, %s3302_s26 }
0x2909   :  { %v1734_v21 = vpop.permute.xlu0 %1733 }
0x290a   :  { %v1736_v22 = vsel %vm64_vm0, %v1731_v20, %v1734_v21 }
0x290b   :  { %2926 = vmatmul.msk.f32.vlgmr.msrb.gmra.mxu0 %vm1668_vm2, %v1736_v22 }
0x290c   :  { %2026 = vmatpush.msrb.mxu0 %v3727_v54 }
0x290e   :  { %2027 = vmatpush.msrb.mxu0 %v3732_v55 }
0x2910   :  { %2028 = vmatpush.msrb.mxu0 %v3739_v56 }
0x2912   :  { %2029 = vmatpush.msrb.mxu0 %v3746_v57 }
0x2914   :  { %2030 = vmatpush.msrb.mxu0 %v3753_v63 }
0x2916   :  { %2031 = vmatpush.msrb.mxu0 %v3760_v0 }
0x2918   :  { %2032 = vmatpush.msrb.mxu0 %v3767_v58 }
0x291a   :  { %2033 = vmatpush.msrb.mxu0 %v3777_v61 }
0x2988   :  { %v1760_v24 = vpop.f32.mrf.mxu0 }
0x2989   :  { %v1761_v25 = vadd.f32 %v3895_v23, %v1760_v24 }
0x298b   :  { %3146 = vtanh.f32 %v1761_v25  ;;  %v2927_v27 = vmul.f32 -1.442695, %v1761_v25 }
0x298d   :  { %3148 = vpow2.f32 %v2927_v27 }
0x2991   :  { %v3147_v26 = vpop.eup %3146 }
0x2992   :  { %1785 = vrot.lane.b32.xlu1 %v3147_v26, %s3300_s18 }
0x2993   :  { %v3149_v28 = vpop.eup %3148 }
0x2994   :  { %v1766_v29 = vadd.f32 1.0, %v3149_v28 }
0x2996   :  { %3150 = vrcp.f32 %v1766_v29  ;;  %v1778_v35 = vand.u32 2147483648, %v1766_v29  ;;  %vm1772_vm12 = vweird.f32 %v1766_v29  ;;  %v1776_v36 = vand.u32 2147483647, %v1766_v29 }
0x2998   :  { %v1779_v38 = vor.u32 1.1754944e-38, %v1778_v35  ;;  %vm1777_vm14 = vcmp.eq.f32.partialorder %v1776_v36, 8.507059e+37 }
0x299c   :  { %v3151_v30 = vpop.eup %3150 }
0x299d   :  { %v1768_v31 = vmul.f32 %v3151_v30, %v1766_v29  ;;  %vm1773_vm11 = vweird.f32 %v3151_v30 }
0x299e   :  { %vm1774_vm13 = vmor %vm1772_vm12, %vm1773_vm11 }
0x299f   :  { %v1769_v32 = vsub.f32 1.0, %v1768_v31 }
0x29a1   :  { %v1770_v33 = vmul.f32 %v3151_v30, %v1769_v32 }
0x29a3   :  { %v1771_v34 = vadd.f32 %v3151_v30, %v1770_v33 }
0x29a5   :  { %v1775_v37 = vsel %vm1774_vm13, %v3151_v30, %v1771_v34 }
0x29a6   :  { %v1780_v41 = vsel %vm1777_vm14, %v1779_v38, %v1775_v37 }
0x29a7   :  { %v1783_v43 = vmul.f32 %v1780_v41, %v3814_v7 }
0x2a04   :  { %v1786_v40 = vpop.permute.xlu1 %1785 }
0x2a05   :  { %v1788_v42 = vmul.f32 %v1786_v40, %v1780_v41 }
0x2a07   :  { %1790 = vrot.lane.b32.xlu2 %v1788_v42, %s3300_s18 }
0x2a0f   :  { %1841 = vrot.lane.b32.xlu2 %v3818_v39, %s3302_s26 }
0x2a61   :  { %v1791_v11 = vpop.permute.xlu2 %1790 }
0x2a62   :  { %v3903_v44 = vadd.f32 %v1791_v11, %v1783_v43 }
0x2a64   :  { %3152 = vtanh.f32 %v3903_v44 }
0x2a69   :  { %v1842_v1 = vpop.permute.xlu2 %1841 }
0x2a6a   :  { %v3153_v2 = vpop.eup %3152 }
0x2a6b   :  { %1796 = vrot.lane.b32.xlu0 %v3153_v2, %s3300_s18 }
0x2add   :  { %v1797_v8 = vpop.permute.xlu0 %1796 }
0x2ade   :  { %v1799_v47 = vmul.f32 %v1797_v8, %v1780_v41 }
0x2ae0   :  { %1804 = vrot.lane.b32.xlu1 %v1799_v47, %s3301_s19 }
0x2b52   :  { %v1805_v48 = vpop.permute.xlu1 %1804 }
0x2b53   :  { %2928 = vmatmul.msk.f32.vlgmr.msrb.gmra.mxu1 %vm64_vm0, %v1805_v48 }
0x2b54   :  { %2094 = vmatpush.msrb.mxu1 %v3825_v12 }
0x2b56   :  { %2095 = vmatpush.msrb.mxu1 %v3830_v5 }
0x2b58   :  { %2096 = vmatpush.msrb.mxu1 %v3837_v13 }
0x2b5a   :  { %2097 = vmatpush.msrb.mxu1 %v3845_v14 }
0x2b5c   :  { %2098 = vmatpush.msrb.mxu1 %v3853_v15 }
0x2b5e   :  { %2099 = vmatpush.msrb.mxu1 %v3861_v10 }
0x2b60   :  { %2100 = vmatpush.msrb.mxu1 %v3869_v60 }
0x2b62   :  { %2101 = vmatpush.msrb.mxu1 %v3877_v17 }
0x2bd0   :  { %v1825_v51 = vpop.f32.mrf.mxu1 }
0x2bd1   :  { %v3974_v59 = vadd.f32 %v3968_v49, %v1825_v51 }
0x2bd3   :  { %v1840_v62 = vsel %vm1839_vm15, %v1836_v52, %v3974_v59 }
0x2bd4   :  { %v1844_v7 = vsel %vm64_vm0, %v1840_v62, %v1842_v1 }
0x2bd5   :  { %2930 = vmatmul.msk.f32.vlgmr.msra.gmra.mxu1 %vm1668_vm2, %v1844_v7 }
0x2bd6   :  { %2361 = vmatpush.msra.mxu1 %v3727_v54 }
0x2bd8   :  { %2362 = vmatpush.msra.mxu1 %v3732_v55 }
0x2bda   :  { %2363 = vmatpush.msra.mxu1 %v3739_v56 }
0x2bdc   :  { %2364 = vmatpush.msra.mxu1 %v3746_v57 }
0x2bde   :  { %2365 = vmatpush.msra.mxu1 %v3753_v63 }
0x2be0   :  { %2366 = vmatpush.msra.mxu1 %v3760_v0 }
0x2be2   :  { %2367 = vmatpush.msra.mxu1 %v3767_v58 }
0x2be4   :  { %2368 = vmatpush.msra.mxu1 %v3777_v61 }
0x2c52   :  { %v1865_v9 = vpop.f32.mrf.mxu1 }
0x2c53   :  { %v1866_v4 = vadd.f32 %v3796_v16, %v1865_v9 }
0x2c55   :  { %3154 = vtanh.f32 %v1866_v4  ;;  %v2931_v18 = vmul.f32 -1.442695, %v1866_v4 }
0x2c57   :  { %3156 = vpow2.f32 %v2931_v18 }
0x2c5b   :  { %v3155_v39 = vpop.eup %3154 }
0x2c5c   :  { %1890 = vrot.lane.b32.xlu0 %v3155_v39, %s3300_s18 }
0x2c5d   :  { %v3157_v20 = vpop.eup %3156 }
0x2c5e   :  { %v1871_v21 = vadd.f32 1.0, %v3157_v20 }
0x2c60   :  { %3158 = vrcp.f32 %v1871_v21  ;;  %v1883_v28 = vand.u32 2147483648, %v1871_v21  ;;  %vm1877_vm3 = vweird.f32 %v1871_v21  ;;  %v1881_v29 = vand.u32 2147483647, %v1871_v21 }
0x2c62   :  { %v1884_v31 = vor.u32 1.1754944e-38, %v1883_v28  ;;  %vm1882_vm5 = vcmp.eq.f32.partialorder %v1881_v29, 8.507059e+37 }
0x2c66   :  { %v3159_v22 = vpop.eup %3158 }
0x2c67   :  { %v1873_v24 = vmul.f32 %v3159_v22, %v1871_v21  ;;  %vm1878_vm1 = vweird.f32 %v3159_v22 }
0x2c68   :  { %vm1879_vm4 = vmor %vm1877_vm3, %vm1878_vm1 }
0x2c69   :  { %v1874_v25 = vsub.f32 1.0, %v1873_v24 }
0x2c6b   :  { %v1875_v26 = vmul.f32 %v3159_v22, %v1874_v25 }
0x2c6d   :  { %v1876_v27 = vadd.f32 %v3159_v22, %v1875_v26 }
0x2c6f   :  { %v1880_v30 = vsel %vm1879_vm4, %v3159_v22, %v1876_v27 }
0x2c70   :  { %v1885_v33 = vsel %vm1882_vm5, %v1884_v31, %v1880_v30 }
0x2c71   :  { %v1888_v35 = vmul.f32 %v1885_v33, %v3809_v53 }
0x2cce   :  { %v1891_v32 = vpop.permute.xlu0 %1890 }
0x2ccf   :  { %v1893_v34 = vmul.f32 %v1891_v32, %v1885_v33  ;;  %v2006_v32 = vld [vmem:[%s4270_s2 + $0x10] sm:$0xff] }
0x2cd1   :  { %1895 = vrot.lane.b32.xlu1 %v1893_v34, %s3300_s18 }
0x2cd9   :  { %1909 = vrot.lane.b32.xlu1 %v1799_v47, %s3302_s26 }
0x2d43   :  { %v1896_v36 = vpop.permute.xlu1 %1895 }
0x2d44   :  { %v3992_v37 = vadd.f32 %v1896_v36, %v1888_v35 }
0x2d46   :  { %3160 = vtanh.f32 %v3992_v37 }
0x2d4b   :  { %v1910_v42 = vpop.permute.xlu1 %1909 }
0x2d4c   :  { %v3161_v38 = vpop.eup %3160 }
0x2d4d   :  { %1901 = vrot.lane.b32.xlu2 %v3161_v38, %s3300_s18 }
0x2da7   :  { %v1902_v40 = vpop.permute.xlu2 %1901 }
0x2da8   :  { %v1904_v41 = vmul.f32 %v1902_v40, %v1885_v33 }
0x2daa   :  { %1906 = vrot.lane.b32.xlu0 %v1904_v41, %s3301_s19 }
0x2e1c   :  { %v1907_v43 = vpop.permute.xlu0 %1906 }
0x2e1d   :  { %v1912_v11 = vsel %vm64_vm0, %v1907_v43, %v1910_v42 }
0x2e1e   :  { %2932 = vmatmul.msk.f32.vlgmr.msrb.gmra.mxu3 %vm1668_vm2, %v1912_v11 }
0x2e1f   :  { %2264 = vmatpush.msrb.mxu3 %v3825_v12 }
0x2e21   :  { %2265 = vmatpush.msrb.mxu3 %v3830_v5 }
0x2e23   :  { %2266 = vmatpush.msrb.mxu3 %v3837_v13 }
0x2e25   :  { %2267 = vmatpush.msrb.mxu3 %v3845_v14 }
0x2e27   :  { %2268 = vmatpush.msrb.mxu3 %v3853_v15 }
0x2e29   :  { %2269 = vmatpush.msrb.mxu3 %v3861_v10 }
0x2e2b   :  { %2270 = vmatpush.msrb.mxu3 %v3869_v60 }
0x2e2d   :  { %2271 = vmatpush.msrb.mxu3 %v3877_v17 }
0x2ea1   :  { %v1933_v53 = vpop.f32.mrf.mxu3 }
0x2ea2   :  { %v1934_v2 = vadd.f32 %v3895_v23, %v1933_v53 }
0x2ea4   :  { %3162 = vtanh.f32 %v1934_v2  ;;  %v2933_v47 = vmul.f32 -1.442695, %v1934_v2 }
0x2ea6   :  { %3164 = vpow2.f32 %v2933_v47 }
0x2eaa   :  { %v3163_v8 = vpop.eup %3162 }
0x2eab   :  { %1958 = vrot.lane.b32.xlu2 %v3163_v8, %s3300_s18 }
0x2eac   :  { %v3165_v48 = vpop.eup %3164 }
0x2ead   :  { %v1939_v50 = vadd.f32 1.0, %v3165_v48 }
0x2eaf   :  { %3166 = vrcp.f32 %v1939_v50  ;;  %v1951_v9 = vand.u32 2147483648, %v1939_v50  ;;  %vm1945_vm7 = vweird.f32 %v1939_v50  ;;  %v1949_v4 = vand.u32 2147483647, %v1939_v50 }
0x2eb1   :  { %v1952_v18 = vor.u32 1.1754944e-38, %v1951_v9  ;;  %vm1950_vm9 = vcmp.eq.f32.partialorder %v1949_v4, 8.507059e+37 }
0x2eb5   :  { %v3167_v51 = vpop.eup %3166 }
0x2eb6   :  { %v1941_v52 = vmul.f32 %v3167_v51, %v1939_v50  ;;  %vm1946_vm6 = vweird.f32 %v3167_v51 }
0x2eb7   :  { %vm1947_vm8 = vmor %vm1945_vm7, %vm1946_vm6 }
0x2eb8   :  { %v1942_v1 = vsub.f32 1.0, %v1941_v52 }
0x2eba   :  { %v1943_v62 = vmul.f32 %v3167_v51, %v1942_v1 }
0x2ebc   :  { %v1944_v7 = vadd.f32 %v3167_v51, %v1943_v62 }
0x2ebe   :  { %v1948_v39 = vsel %vm1947_vm8, %v3167_v51, %v1944_v7 }
0x2ebf   :  { %v1953_v21 = vsel %vm1950_vm9, %v1952_v18, %v1948_v39 }
0x2ec0   :  { %v1956_v24 = vmul.f32 %v1953_v21, %v3903_v44  ;;  %v2008_v44 = vstv %s2007_s16 }
0x2ec1   :  { %vm2009_vm10 = vcmp.eq.s32.totalorder %v2008_v44, 1 }
0x2f05   :  { %v1959_v20 = vpop.permute.xlu2 %1958 }
0x2f06   :  { %v1961_v22 = vmul.f32 %v1959_v20, %v1953_v21 }
0x2f08   :  { %1963 = vrot.lane.b32.xlu0 %v1961_v22, %s3300_s18 }
0x2f10   :  { %2011 = vrot.lane.b32.xlu0 %v1904_v41, %s3302_s26 }
0x2f7a   :  { %v1964_v25 = vpop.permute.xlu0 %1963 }
0x2f7b   :  { %v4012_v26 = vadd.f32 %v1964_v25, %v1956_v24 }
0x2f7d   :  { %3168 = vtanh.f32 %v4012_v26 }
0x2f82   :  { %v2012_v34 = vpop.permute.xlu0 %2011 }
0x2f83   :  { %v3169_v27 = vpop.eup %3168 }
0x2f84   :  { %1969 = vrot.lane.b32.xlu1 %v3169_v27, %s3300_s18 }
0x2ff6   :  { %v1970_v28 = vpop.permute.xlu1 %1969 }
0x2ff7   :  { %v1972_v29 = vmul.f32 %v1970_v28, %v1953_v21 }
0x2ff9   :  { %1974 = vrot.lane.b32.xlu2 %v1972_v29, %s3301_s19 }
0x3053   :  { %v1975_v30 = vpop.permute.xlu2 %1974 }
0x3054   :  { %2934 = vmatmul.msk.f32.vlgmr.msra.gmra.mxu0 %vm64_vm0, %v1975_v30 }
0x3055   :  { %2330 = vmatpush.msra.mxu0 %v3910_v3 }
0x3057   :  { %2331 = vmatpush.msra.mxu0 %v3915_v45 }
0x3059   :  { %2332 = vmatpush.msra.mxu0 %v3922_v6 }
0x305b   :  { %2333 = vmatpush.msra.mxu0 %v3930_v46 }
0x30d1   :  { %v1995_v31 = vpop.f32.mrf.mxu0 }
0x30d2   :  { %v4026_v33 = vadd.f32 %v3968_v49, %v1995_v31 }
0x30d4   :  { %v2010_v35 = vsel %vm2009_vm10, %v2006_v32, %v4026_v33 }
0x30d5   :  { %v2014_v36 = vsel %vm64_vm0, %v2010_v35, %v2012_v34 }
0x30d6   :  { %2936 = vmatmul.msk.f32.vlgmr.msrb.gmra.mxu0 %vm1668_vm2, %v2014_v36 }
0x30d7   :  { %2495 = vmatpush.msrb.mxu0 %v3910_v3 }
0x30d9   :  { %2496 = vmatpush.msrb.mxu0 %v3915_v45 }
0x30db   :  { %2497 = vmatpush.msrb.mxu0 %v3922_v6 }
0x30dd   :  { %2498 = vmatpush.msrb.mxu0 %v3930_v46 }
0x3153   :  { %v2035_v38 = vpop.f32.mrf.mxu0 }
0x3154   :  { %v2036_v40 = vadd.f32 %v3796_v16, %v2035_v38 }
0x3156   :  { %3170 = vtanh.f32 %v2036_v40  ;;  %v2937_v42 = vmul.f32 -1.442695, %v2036_v40 }
0x3158   :  { %3172 = vpow2.f32 %v2937_v42 }
0x315c   :  { %v3171_v41 = vpop.eup %3170 }
0x315d   :  { %2060 = vrot.lane.b32.xlu1 %v3171_v41, %s3300_s18 }
0x315e   :  { %v3173_v43 = vpop.eup %3172 }
0x315f   :  { %v2041_v11 = vadd.f32 1.0, %v3173_v43 }
0x3161   :  { %3174 = vrcp.f32 %v2041_v11  ;;  %v2053_v50 = vand.u32 2147483648, %v2041_v11  ;;  %vm2047_vm12 = vweird.f32 %v2041_v11  ;;  %v2051_v51 = vand.u32 2147483647, %v2041_v11 }
0x3163   :  { %v2054_v1 = vor.u32 1.1754944e-38, %v2053_v50  ;;  %vm2052_vm14 = vcmp.eq.f32.partialorder %v2051_v51, 8.507059e+37 }
0x3167   :  { %v3175_v53 = vpop.eup %3174 }
0x3168   :  { %v2043_v2 = vmul.f32 %v3175_v53, %v2041_v11  ;;  %vm2048_vm11 = vweird.f32 %v3175_v53 }
0x3169   :  { %vm2049_vm13 = vmor %vm2047_vm12, %vm2048_vm11 }
0x316a   :  { %v2044_v8 = vsub.f32 1.0, %v2043_v2 }
0x316c   :  { %v2045_v47 = vmul.f32 %v3175_v53, %v2044_v8 }
0x316e   :  { %v2046_v48 = vadd.f32 %v3175_v53, %v2045_v47 }
0x3170   :  { %v2050_v52 = vsel %vm2049_vm13, %v3175_v53, %v2046_v48 }
0x3171   :  { %v2055_v7 = vsel %vm2052_vm14, %v2054_v1, %v2050_v52 }
0x3172   :  { %v2058_v4 = vmul.f32 %v2055_v7, %v3992_v37 }
0x31cf   :  { %v2061_v62 = vpop.permute.xlu1 %2060 }
0x31d0   :  { %v2063_v9 = vmul.f32 %v2061_v62, %v2055_v7 }
0x31d2   :  { %2065 = vrot.lane.b32.xlu2 %v2063_v9, %s3300_s18 }
0x31da   :  { %2079 = vrot.lane.b32.xlu2 %v1972_v29, %s3302_s26 }
0x322c   :  { %v2066_v39 = vpop.permute.xlu2 %2065 }
0x322d   :  { %v4040_v18 = vadd.f32 %v2066_v39, %v2058_v4 }
0x322f   :  { %3176 = vtanh.f32 %v4040_v18 }
0x3234   :  { %v2080_v24 = vpop.permute.xlu2 %2079 }
0x3235   :  { %v3177_v20 = vpop.eup %3176 }
0x3236   :  { %2071 = vrot.lane.b32.xlu0 %v3177_v20, %s3300_s18 }
0x32a8   :  { %v2072_v21 = vpop.permute.xlu0 %2071 }
0x32a9   :  { %v2074_v22 = vmul.f32 %v2072_v21, %v2055_v7  ;;  %v2176_v7 = vld [vmem:[%s4270_s2 + $0x18] sm:$0xff] }
0x32ab   :  { %2076 = vrot.lane.b32.xlu1 %v2074_v22, %s3301_s19 }
0x331d   :  { %v2077_v25 = vpop.permute.xlu1 %2076 }
0x331e   :  { %v2082_v27 = vsel %vm64_vm0, %v2077_v25, %v2080_v24 }
0x331f   :  { %2938 = vmatmul.msk.f32.vlgmr.msrb.gmra.mxu1 %vm1668_vm2, %v2082_v27 }
0x3320   :  { %2664 = vmatpush.msrb.mxu1 %v3910_v3 }
0x3322   :  { %2665 = vmatpush.msrb.mxu1 %v3915_v45 }
0x3324   :  { %2666 = vmatpush.msrb.mxu1 %v3922_v6 }
0x3326   :  { %2667 = vmatpush.msrb.mxu1 %v3930_v46 }
0x339c   :  { %v2103_v37 = vpop.f32.mrf.mxu1 }
0x339d   :  { %v2104_v28 = vadd.f32 %v3895_v23, %v2103_v37 }
0x339f   :  { %3178 = vtanh.f32 %v2104_v28  ;;  %v2939_v30 = vmul.f32 -1.442695, %v2104_v28 }
0x33a1   :  { %3180 = vpow2.f32 %v2939_v30 }
0x33a5   :  { %v3179_v29 = vpop.eup %3178 }
0x33a6   :  { %2128 = vrot.lane.b32.xlu0 %v3179_v29, %s3300_s18 }
0x33a7   :  { %v3181_v44 = vpop.eup %3180 }
0x33a8   :  { %v2109_v31 = vadd.f32 1.0, %v3181_v44 }
0x33aa   :  { %3182 = vrcp.f32 %v2109_v31  ;;  %v2121_v40 = vand.u32 2147483648, %v2109_v31  ;;  %vm2115_vm1 = vweird.f32 %v2109_v31  ;;  %v2119_v41 = vand.u32 2147483647, %v2109_v31 }
0x33ac   :  { %v2122_v43 = vor.u32 1.1754944e-38, %v2121_v40  ;;  %vm2120_vm4 = vcmp.eq.f32.partialorder %v2119_v41, 8.507059e+37 }
0x33b0   :  { %v3183_v32 = vpop.eup %3182 }
0x33b1   :  { %v2111_v34 = vmul.f32 %v3183_v32, %v2109_v31  ;;  %vm2116_vm15 = vweird.f32 %v3183_v32 }
0x33b2   :  { %vm2117_vm3 = vmor %vm2115_vm1, %vm2116_vm15 }
0x33b3   :  { %v2112_v35 = vsub.f32 1.0, %v2111_v34 }
0x33b5   :  { %v2113_v36 = vmul.f32 %v3183_v32, %v2112_v35 }
0x33b7   :  { %v2114_v38 = vadd.f32 %v3183_v32, %v2113_v36 }
0x33b9   :  { %v2118_v42 = vsel %vm2117_vm3, %v3183_v32, %v2114_v38 }
0x33ba   :  { %v2123_v53 = vsel %vm2120_vm4, %v2122_v43, %v2118_v42 }
0x33bb   :  { %v2126_v8 = vmul.f32 %v2123_v53, %v4012_v26  ;;  %v2178_v26 = vstv %s2177_s3 }
0x33bc   :  { %vm2179_vm5 = vcmp.eq.s32.totalorder %v2178_v26, 1 }
0x3418   :  { %v2129_v11 = vpop.permute.xlu0 %2128 }
0x3419   :  { %v2131_v2 = vmul.f32 %v2129_v11, %v2123_v53 }
0x341b   :  { %2133 = vrot.lane.b32.xlu1 %v2131_v2, %s3300_s18 }
0x3423   :  { %2181 = vrot.lane.b32.xlu1 %v2074_v22, %s3302_s26 }
0x348d   :  { %v2134_v47 = vpop.permute.xlu1 %2133 }
0x348e   :  { %v4056_v48 = vadd.f32 %v2134_v47, %v2126_v8 }
0x3490   :  { %3184 = vtanh.f32 %v4056_v48 }
0x3495   :  { %v2182_v4 = vpop.permute.xlu1 %2181 }
0x3496   :  { %v3185_v50 = vpop.eup %3184 }
0x3497   :  { %2139 = vrot.lane.b32.xlu2 %v3185_v50, %s3300_s18 }
0x34f1   :  { %v2140_v51 = vpop.permute.xlu2 %2139 }
0x34f2   :  { %v2142_v52 = vmul.f32 %v2140_v51, %v2123_v53 }
0x34f4   :  { %2144 = vrot.lane.b32.xlu0 %v2142_v52, %s3301_s19 }
0x3566   :  { %v2145_v1 = vpop.permute.xlu0 %2144 }
0x3567   :  { %2940 = vmatmul.msk.f32.vlgmr.msra.gmra.mxu3 %vm64_vm0, %v2145_v1 }
0x3568   :  { %2530 = vmatpush.msra.mxu3 %v3727_v54 }
0x356a   :  { %2531 = vmatpush.msra.mxu3 %v3732_v55 }
0x356c   :  { %2532 = vmatpush.msra.mxu3 %v3739_v56 }
0x356e   :  { %2533 = vmatpush.msra.mxu3 %v3746_v57 }
0x3570   :  { %2534 = vmatpush.msra.mxu3 %v3753_v63 }
0x3572   :  { %2535 = vmatpush.msra.mxu3 %v3760_v0 }
0x3574   :  { %2536 = vmatpush.msra.mxu3 %v3767_v58 }
0x3576   :  { %2537 = vmatpush.msra.mxu3 %v3777_v61 }
0x35ea   :  { %v2165_v62 = vpop.f32.mrf.mxu3 }
0x35eb   :  { %v4074_v9 = vadd.f32 %v3968_v49, %v2165_v62 }
0x35ed   :  { %v2180_v39 = vsel %vm2179_vm5, %v2176_v7, %v4074_v9 }
0x35ee   :  { %v2184_v20 = vsel %vm64_vm0, %v2180_v39, %v2182_v4 }
0x35ef   :  { %2942 = vmatmul.msk.f32.vlgmr.msra.gmra.mxu2 %vm1668_vm2, %v2184_v20 }
0x35f0   :  { %2699 = vmatpush.msra.mxu2 %v3727_v54 }
0x35f2   :  { %2700 = vmatpush.msra.mxu2 %v3732_v55 }
0x35f4   :  { %2701 = vmatpush.msra.mxu2 %v3739_v56 }
0x35f6   :  { %2702 = vmatpush.msra.mxu2 %v3746_v57 }
0x35f8   :  { %2703 = vmatpush.msra.mxu2 %v3753_v63 }
0x35fa   :  { %2704 = vmatpush.msra.mxu2 %v3760_v0 }
0x35fc   :  { %2705 = vmatpush.msra.mxu2 %v3767_v58 }
0x35fe   :  { %2706 = vmatpush.msra.mxu2 %v3777_v61 }
0x3672   :  { %v2205_v21 = vpop.f32.mrf.mxu2 }
0x3673   :  { %v2206_v22 = vadd.f32 %v3796_v16, %v2205_v21 }
0x3675   :  { %3186 = vtanh.f32 %v2206_v22  ;;  %v2943_v54 = vmul.f32 -1.442695, %v2206_v22 }
0x3677   :  { %3188 = vpow2.f32 %v2943_v54 }
0x367b   :  { %v3187_v24 = vpop.eup %3186 }
0x367c   :  { %2230 = vrot.lane.b32.xlu2 %v3187_v24, %s3300_s18 }
0x367d   :  { %v3189_v55 = vpop.eup %3188 }
0x367e   :  { %v2211_v56 = vadd.f32 1.0, %v3189_v55  ;;  %v2341_v55 = vld [vmem:[%s4270_s2 + $0x20] sm:$0xff] }
0x3680   :  { %3190 = vrcp.f32 %v2211_v56  ;;  %v2223_v58 = vand.u32 2147483648, %v2211_v56  ;;  %vm2217_vm7 = vweird.f32 %v2211_v56  ;;  %v2221_v61 = vand.u32 2147483647, %v2211_v56 }
0x3682   :  { %v2224_v37 = vor.u32 1.1754944e-38, %v2223_v58  ;;  %vm2222_vm9 = vcmp.eq.f32.partialorder %v2221_v61, 8.507059e+37 }
0x3686   :  { %v3191_v57 = vpop.eup %3190 }
0x3687   :  { %v2213_v63 = vmul.f32 %v3191_v57, %v2211_v56  ;;  %vm2218_vm6 = vweird.f32 %v3191_v57 }
0x3688   :  { %vm2219_vm8 = vmor %vm2217_vm7, %vm2218_vm6 }
0x3689   :  { %v2214_v25 = vsub.f32 1.0, %v2213_v63 }
0x368b   :  { %v2215_v0 = vmul.f32 %v3191_v57, %v2214_v25 }
0x368d   :  { %v2216_v27 = vadd.f32 %v3191_v57, %v2215_v0 }
0x368f   :  { %v2220_v16 = vsel %vm2219_vm8, %v3191_v57, %v2216_v27  ;;  %v4143_v27 = vld [vmem:[%s4275_s7] ss:$0 sm:$0xff] }
0x3690   :  { %v2225_v29 = vsel %vm2222_vm9, %v2224_v37, %v2220_v16 }
0x3691   :  { %v2228_v44 = vmul.f32 %v2225_v29, %v4040_v18 }
0x36d6   :  { %v2231_v28 = vpop.permute.xlu2 %2230 }
0x36d7   :  { %v2233_v30 = vmul.f32 %v2231_v28, %v2225_v29 }
0x36d9   :  { %2235 = vrot.lane.b32.xlu0 %v2233_v30, %s3300_s18 }
0x36e1   :  { %2249 = vrot.lane.b32.xlu0 %v2142_v52, %s3302_s26 }
0x374b   :  { %v2236_v31 = vpop.permute.xlu0 %2235 }
0x374c   :  { %v4092_v32 = vadd.f32 %v2236_v31, %v2228_v44 }
0x374e   :  { %3192 = vtanh.f32 %v4092_v32 }
0x3753   :  { %v2250_v38 = vpop.permute.xlu0 %2249 }
0x3754   :  { %v3193_v34 = vpop.eup %3192 }
0x3755   :  { %2241 = vrot.lane.b32.xlu1 %v3193_v34, %s3300_s18 }
0x37c7   :  { %v2242_v35 = vpop.permute.xlu1 %2241 }
0x37c8   :  { %v2244_v36 = vmul.f32 %v2242_v35, %v2225_v29 }
0x37ca   :  { %2246 = vrot.lane.b32.xlu2 %v2244_v36, %s3301_s19 }
0x3824   :  { %v2247_v40 = vpop.permute.xlu2 %2246 }
0x3825   :  { %v2252_v41 = vsel %vm64_vm0, %v2247_v40, %v2250_v38 }
0x3826   :  { %2944 = vmatmul.msk.f32.vlgmr.msrb.gmra.mxu3 %vm1668_vm2, %v2252_v41 }
0x3827   :  { %2833 = vmatpush.msrb.mxu3 %v3910_v3 }
0x3829   :  { %2834 = vmatpush.msrb.mxu3 %v3915_v45 }
0x382b   :  { %2835 = vmatpush.msrb.mxu3 %v3922_v6 }
0x382d   :  { %2836 = vmatpush.msrb.mxu3 %v3930_v46 }
0x38a9   :  { %v2273_v18 = vpop.f32.mrf.mxu3 }
0x38aa   :  { %v2274_v42 = vadd.f32 %v3895_v23, %v2273_v18 }
0x38ac   :  { %3194 = vtanh.f32 %v2274_v42  ;;  %v2945_v11 = vmul.f32 -1.442695, %v2274_v42 }
0x38ae   :  { %3196 = vpow2.f32 %v2945_v11 }
0x38b2   :  { %v3195_v43 = vpop.eup %3194 }
0x38b3   :  { %2298 = vrot.lane.b32.xlu1 %v3195_v43, %s3300_s18 }
0x38b4   :  { %v3197_v53 = vpop.eup %3196 }
0x38b5   :  { %v2279_v2 = vadd.f32 1.0, %v3197_v53 }
0x38b7   :  { %3198 = vrcp.f32 %v2279_v2  ;;  %v2291_v6 = vand.u32 2147483648, %v2279_v2  ;;  %vm2285_vm11 = vweird.f32 %v2279_v2  ;;  %v2289_v46 = vand.u32 2147483647, %v2279_v2 }
0x38b9   :  { %v2292_v52 = vor.u32 1.1754944e-38, %v2291_v6  ;;  %vm2290_vm13 = vcmp.eq.f32.partialorder %v2289_v46, 8.507059e+37 }
0x38bd   :  { %v3199_v8 = vpop.eup %3198 }
0x38be   :  { %v2281_v3 = vmul.f32 %v3199_v8, %v2279_v2  ;;  %vm2286_vm10 = vweird.f32 %v3199_v8 }
0x38bf   :  { %vm2287_vm12 = vmor %vm2285_vm11, %vm2286_vm10 }
0x38c0   :  { %v2282_v47 = vsub.f32 1.0, %v2281_v3 }
0x38c2   :  { %v2283_v45 = vmul.f32 %v3199_v8, %v2282_v47 }
0x38c4   :  { %v2284_v50 = vadd.f32 %v3199_v8, %v2283_v45 }
0x38c6   :  { %v2288_v51 = vsel %vm2287_vm12, %v3199_v8, %v2284_v50 }
0x38c7   :  { %v2293_v26 = vsel %vm2290_vm13, %v2292_v52, %v2288_v51 }
0x38c8   :  { %v2296_v7 = vmul.f32 %v2293_v26, %v4056_v48  ;;  %v2343_v48 = vstv %s2342_s0 }
0x38c9   :  { %vm2344_vm14 = vcmp.eq.s32.totalorder %v2343_v48, 1 }
0x3925   :  { %v2299_v1 = vpop.permute.xlu1 %2298 }
0x3926   :  { %v2301_v62 = vmul.f32 %v2299_v1, %v2293_v26 }
0x3928   :  { %2303 = vrot.lane.b32.xlu2 %v2301_v62, %s3300_s18 }
0x3930   :  { %2346 = vrot.lane.b32.xlu2 %v2244_v36, %s3302_s26 }
0x3982   :  { %v2304_v4 = vpop.permute.xlu2 %2303 }
0x3983   :  { %v4108_v39 = vadd.f32 %v2304_v4, %v2296_v7 }
0x3985   :  { %3200 = vtanh.f32 %v4108_v39 }
0x398a   :  { %v2347_v57 = vpop.permute.xlu2 %2346 }
0x398b   :  { %v3201_v20 = vpop.eup %3200 }
0x398c   :  { %2309 = vrot.lane.b32.xlu0 %v3201_v20, %s3300_s18 }
0x39fe   :  { %v2310_v21 = vpop.permute.xlu0 %2309 }
0x39ff   :  { %v2312_v22 = vmul.f32 %v2310_v21, %v2293_v26 }
0x3a01   :  { %2314 = vrot.lane.b32.xlu1 %v2312_v22, %s3301_s19 }
0x3a73   :  { %v2315_v24 = vpop.permute.xlu1 %2314 }
0x3a74   :  { %2946 = vmatmul.msk.f32.vlgmr.msra.gmra.mxu0 %vm64_vm0, %v2315_v24 }
0x3a75   :  { %2598 = vmatpush.msra.mxu0 %v3825_v12 }
0x3a77   :  { %2599 = vmatpush.msra.mxu0 %v3830_v5 }
0x3a79   :  { %2600 = vmatpush.msra.mxu0 %v3837_v13 }
0x3a7b   :  { %2601 = vmatpush.msra.mxu0 %v3845_v14 }
0x3a7d   :  { %2602 = vmatpush.msra.mxu0 %v3853_v15 }
0x3a7f   :  { %2603 = vmatpush.msra.mxu0 %v3861_v10 }
0x3a81   :  { %2604 = vmatpush.msra.mxu0 %v3869_v60 }
0x3a83   :  { %2605 = vmatpush.msra.mxu0 %v3877_v17 }
0x3af1   :  { %v2335_v54 = vpop.f32.mrf.mxu0 }
0x3af2   :  { %v2336_v56 = vadd.f32 %v3968_v49, %v2335_v54 }
0x3af4   :  { %v2345_v63 = vsel %vm2344_vm14, %v2341_v55, %v2336_v56  ;;  %2338 = vst.msk [vmem:[%s4278_s10 + $0x8] sm:$0xff] %vm64_vm0, %v2336_v56  ;;  %v2512_v55 = vstv %s2511_s29  ;;  %v2510_v56 = vld [vmem:[%s4270_s2 + $0x28] sm:$0xff] }
0x3af5   :  { %v2349_v25 = vsel %vm64_vm0, %v2345_v63, %v2347_v57  ;;  %vm2513_vm9 = vcmp.eq.s32.totalorder %v2512_v55, 1 }
0x3af6   :  { %2948 = vmatmul.msk.f32.vlgmr.msra.gmra.mxu1 %vm1668_vm2, %v2349_v25 }
0x3af7   :  { %2767 = vmatpush.msra.mxu1 %v3825_v12 }
0x3af9   :  { %2768 = vmatpush.msra.mxu1 %v3830_v5 }
0x3afb   :  { %2769 = vmatpush.msra.mxu1 %v3837_v13 }
0x3afd   :  { %2770 = vmatpush.msra.mxu1 %v3845_v14 }
0x3aff   :  { %2771 = vmatpush.msra.mxu1 %v3853_v15 }
0x3b01   :  { %2772 = vmatpush.msra.mxu1 %v3861_v10 }
0x3b03   :  { %2773 = vmatpush.msra.mxu1 %v3869_v60 }
0x3b05   :  { %2774 = vmatpush.msra.mxu1 %v3877_v17 }
0x3b73   :  { %v2370_v0 = vpop.f32.mrf.mxu1 }
0x3b74   :  { %v2371_v12 = vadd.f32 %v4143_v27, %v2370_v0 }
0x3b76   :  { %3202 = vtanh.f32 %v2371_v12  ;;  %v2949_v13 = vmul.f32 -1.442695, %v2371_v12 }
0x3b78   :  { %3204 = vpow2.f32 %v2949_v13 }
0x3b7c   :  { %v3203_v5 = vpop.eup %3202 }
0x3b7d   :  { %2395 = vrot.lane.b32.xlu0 %v3203_v5, %s3300_s18 }
0x3b7e   :  { %v3205_v14 = vpop.eup %3204 }
0x3b7f   :  { %v2376_v15 = vadd.f32 1.0, %v3205_v14 }
0x3b81   :  { %3206 = vrcp.f32 %v2376_v15  ;;  %v2388_v16 = vand.u32 2147483648, %v2376_v15  ;;  %vm2382_vm1 = vweird.f32 %v2376_v15  ;;  %v2386_v37 = vand.u32 2147483647, %v2376_v15 }
0x3b83   :  { %v2389_v29 = vor.u32 1.1754944e-38, %v2388_v16  ;;  %vm2387_vm4 = vcmp.eq.f32.partialorder %v2386_v37, 8.507059e+37 }
0x3b87   :  { %v3207_v10 = vpop.eup %3206 }
0x3b88   :  { %v2378_v60 = vmul.f32 %v3207_v10, %v2376_v15  ;;  %vm2383_vm15 = vweird.f32 %v3207_v10 }
0x3b89   :  { %vm2384_vm3 = vmor %vm2382_vm1, %vm2383_vm15 }
0x3b8a   :  { %v2379_v17 = vsub.f32 1.0, %v2378_v60 }
0x3b8c   :  { %v2380_v58 = vmul.f32 %v3207_v10, %v2379_v17 }
0x3b8e   :  { %v2381_v61 = vadd.f32 %v3207_v10, %v2380_v58 }
0x3b90   :  { %v2385_v28 = vsel %vm2384_vm3, %v3207_v10, %v2381_v61 }
0x3b91   :  { %v2390_v44 = vsel %vm2387_vm4, %v2389_v29, %v2385_v28 }
0x3b92   :  { %v2393_v34 = vmul.f32 %v2390_v44, %v4092_v32 }
0x3bef   :  { %v2396_v30 = vpop.permute.xlu0 %2395 }
0x3bf0   :  { %v2398_v31 = vmul.f32 %v2396_v30, %v2390_v44 }
0x3bf2   :  { %2400 = vrot.lane.b32.xlu1 %v2398_v31, %s3300_s18 }
0x3bfa   :  { %2414 = vrot.lane.b32.xlu1 %v2312_v22, %s3302_s26 }
0x3c64   :  { %v2401_v35 = vpop.permute.xlu1 %2400 }
0x3c65   :  { %v4150_v36 = vadd.f32 %v2401_v35, %v2393_v34 }
0x3c67   :  { %3208 = vtanh.f32 %v4150_v36 }
0x3c6c   :  { %v2415_v18 = vpop.permute.xlu1 %2414 }
0x3c6d   :  { %v3209_v38 = vpop.eup %3208 }
0x3c6e   :  { %2406 = vrot.lane.b32.xlu2 %v3209_v38, %s3300_s18 }
0x3cc8   :  { %v2407_v40 = vpop.permute.xlu2 %2406 }
0x3cc9   :  { %v2409_v41 = vmul.f32 %v2407_v40, %v2390_v44 }
0x3ccb   :  { %2411 = vrot.lane.b32.xlu0 %v2409_v41, %s3301_s19 }
0x3d3d   :  { %v2412_v42 = vpop.permute.xlu0 %2411 }
0x3d3e   :  { %v2417_v43 = vsel %vm64_vm0, %v2412_v42, %v2415_v18 }
0x3d3f   :  { %2950 = vmatmul.msk.f32.vlgmr.msrb.gmra.mxu2 %vm1668_vm2, %v2417_v43 }
0x3dc2   :  { %v2438_v11 = vpop.f32.mrf.mxu2 }
0x3dc3   :  { %v2439_v32 = vadd.f32 %v3895_v23, %v2438_v11 }
0x3dc5   :  { %3210 = vtanh.f32 %v2439_v32  ;;  %v2951_v2 = vmul.f32 -1.442695, %v2439_v32 }
0x3dc7   :  { %3212 = vpow2.f32 %v2951_v2 }
0x3dcb   :  { %v3211_v53 = vpop.eup %3210 }
0x3dcc   :  { %2463 = vrot.lane.b32.xlu2 %v3211_v53, %s3300_s18 }
0x3dcd   :  { %v3213_v8 = vpop.eup %3212 }
0x3dce   :  { %v2444_v3 = vadd.f32 1.0, %v3213_v8 }
0x3dd0   :  { %3214 = vrcp.f32 %v2444_v3  ;;  %v2456_v51 = vand.u32 2147483648, %v2444_v3  ;;  %vm2450_vm6 = vweird.f32 %v2444_v3  ;;  %v2454_v52 = vand.u32 2147483647, %v2444_v3 }
0x3dd2   :  { %v2457_v1 = vor.u32 1.1754944e-38, %v2456_v51  ;;  %vm2455_vm8 = vcmp.eq.f32.partialorder %v2454_v52, 8.507059e+37 }
0x3dd6   :  { %v3215_v47 = vpop.eup %3214 }
0x3dd7   :  { %v2446_v45 = vmul.f32 %v3215_v47, %v2444_v3  ;;  %vm2451_vm5 = vweird.f32 %v3215_v47 }
0x3dd8   :  { %vm2452_vm7 = vmor %vm2450_vm6, %vm2451_vm5 }
0x3dd9   :  { %v2447_v50 = vsub.f32 1.0, %v2446_v45 }
0x3ddb   :  { %v2448_v6 = vmul.f32 %v3215_v47, %v2447_v50 }
0x3ddd   :  { %v2449_v46 = vadd.f32 %v3215_v47, %v2448_v6 }
0x3ddf   :  { %v2453_v23 = vsel %vm2452_vm7, %v3215_v47, %v2449_v46 }
0x3de0   :  { %v2458_v62 = vsel %vm2455_vm8, %v2457_v1, %v2453_v23 }
0x3de1   :  { %v2461_v4 = vmul.f32 %v2458_v62, %v4108_v39 }
0x3e26   :  { %v2464_v26 = vpop.permute.xlu2 %2463 }
0x3e27   :  { %v2466_v7 = vmul.f32 %v2464_v26, %v2458_v62 }
0x3e29   :  { %2468 = vrot.lane.b32.xlu0 %v2466_v7, %s3300_s18 }
0x3e31   :  { %2515 = vrot.lane.b32.xlu0 %v2409_v41, %s3302_s26 }
0x3e9b   :  { %v2469_v20 = vpop.permute.xlu0 %2468 }
0x3e9c   :  { %v4162_v21 = vadd.f32 %v2469_v20, %v2461_v4 }
0x3e9e   :  { %3216 = vtanh.f32 %v4162_v21 }
0x3ea3   :  { %v2516_v63 = vpop.permute.xlu0 %2515 }
0x3ea4   :  { %v3217_v22 = vpop.eup %3216 }
0x3ea5   :  { %2474 = vrot.lane.b32.xlu1 %v3217_v22, %s3300_s18 }
0x3f17   :  { %v2475_v24 = vpop.permute.xlu1 %2474 }
0x3f18   :  { %v2477_v48 = vmul.f32 %v2475_v24, %v2458_v62 }
0x3f1a   :  { %2479 = vrot.lane.b32.xlu2 %v2477_v48, %s3301_s19 }
0x3f74   :  { %v2480_v54 = vpop.permute.xlu2 %2479 }
0x3f75   :  { %2952 = vmatmul.msk.f32.vlgmr.msrb.gmra.mxu0 %vm64_vm0, %v2480_v54 }
0x3ff2   :  { %v2500_v39 = vpop.f32.mrf.mxu0 }
0x3ff3   :  { %v4172_v57 = vadd.f32 %v3968_v49, %v2500_v39 }
0x3ff5   :  { %v2514_v25 = vsel %vm2513_vm9, %v2510_v56, %v4172_v57 }
0x3ff6   :  { %v2518_v0 = vsel %vm64_vm0, %v2514_v25, %v2516_v63  ;;  %v2679_v63 = vld [vmem:[%s4270_s2 + $0x30] sm:$0xff]  ;;  %v4211_v25 = vld [vmem:[%s4277_s9] ss:$0 sm:$0xff] }
0x3ff7   :  { %2954 = vmatmul.msk.f32.vlgmr.msra.gmra.mxu3 %vm1668_vm2, %v2518_v0 }
0x407a   :  { %v2539_v12 = vpop.f32.mrf.mxu3 }
0x407b   :  { %v2540_v5 = vadd.f32 %v4143_v27, %v2539_v12 }
0x407d   :  { %3218 = vtanh.f32 %v2540_v5  ;;  %v2955_v14 = vmul.f32 -1.442695, %v2540_v5 }
0x407f   :  { %3220 = vpow2.f32 %v2955_v14 }
0x4083   :  { %v3219_v13 = vpop.eup %3218 }
0x4084   :  { %2564 = vrot.lane.b32.xlu1 %v3219_v13, %s3300_s18 }
0x4085   :  { %v3221_v15 = vpop.eup %3220 }
0x4086   :  { %v2545_v10 = vadd.f32 1.0, %v3221_v15 }
0x4088   :  { %3222 = vrcp.f32 %v2545_v10  ;;  %v2557_v16 = vand.u32 2147483648, %v2545_v10  ;;  %vm2551_vm11 = vweird.f32 %v2545_v10  ;;  %v2555_v37 = vand.u32 2147483647, %v2545_v10 }
0x408a   :  { %v2558_v29 = vor.u32 1.1754944e-38, %v2557_v16  ;;  %vm2556_vm13 = vcmp.eq.f32.partialorder %v2555_v37, 8.507059e+37 }
0x408e   :  { %v3223_v49 = vpop.eup %3222 }
0x408f   :  { %v2547_v60 = vmul.f32 %v3223_v49, %v2545_v10  ;;  %vm2552_vm10 = vweird.f32 %v3223_v49 }
0x4090   :  { %vm2553_vm12 = vmor %vm2551_vm11, %vm2552_vm10 }
0x4091   :  { %v2548_v17 = vsub.f32 1.0, %v2547_v60 }
0x4093   :  { %v2549_v58 = vmul.f32 %v3223_v49, %v2548_v17 }
0x4095   :  { %v2550_v61 = vadd.f32 %v3223_v49, %v2549_v58 }
0x4097   :  { %v2554_v28 = vsel %vm2553_vm12, %v3223_v49, %v2550_v61  ;;  %vm1832_vm12 = vcmask 523520  }
0x4098   :  { %v2559_v44 = vsel %vm2556_vm13, %v2558_v29, %v2554_v28  ;;  %vm2002_vm13 = vcmask 785920  }
0x4099   :  { %v2562_v34 = vmul.f32 %v2559_v44, %v4150_v36  ;;  %v4192_v36 = vld [vmem:[%s4275_s7 + $0x1] ss:$0 sm:$0xff]  ;;  %s2959_s7 = sld [smem:[#allocation4 + $0x6]] }
0x409f   :  { %p2678_p5 = scmp.ne.s32.totalorder %s2959_s7, 0 }
0x40a1   :  { %s2680_s13 = scalar_select %p2678_p5, 1, 0 }
0x40a3   :  { %v2681_v56 = vstv %s2680_s13 }
0x40a4   :  { %vm2682_vm4 = vcmp.eq.s32.totalorder %v2681_v56, 1 }
0x40f6   :  { %v2565_v30 = vpop.permute.xlu1 %2564 }
0x40f7   :  { %v2567_v31 = vmul.f32 %v2565_v30, %v2559_v44 }
0x40f9   :  { %2569 = vrot.lane.b32.xlu2 %v2567_v31, %s3300_s18 }
0x4101   :  { %2583 = vrot.lane.b32.xlu2 %v2477_v48, %s3302_s26 }
0x4153   :  { %v2570_v35 = vpop.permute.xlu2 %2569 }
0x4154   :  { %v4182_v38 = vadd.f32 %v2570_v35, %v2562_v34 }
0x4156   :  { %3224 = vtanh.f32 %v4182_v38 }
0x415b   :  { %v2584_v42 = vpop.permute.xlu2 %2583 }
0x415c   :  { %v3225_v40 = vpop.eup %3224 }
0x415d   :  { %2575 = vrot.lane.b32.xlu0 %v3225_v40, %s3300_s18 }
0x41cf   :  { %v2576_v41 = vpop.permute.xlu0 %2575 }
0x41d0   :  { %v2578_v18 = vmul.f32 %v2576_v41, %v2559_v44 }
0x41d2   :  { %2580 = vrot.lane.b32.xlu1 %v2578_v18, %s3301_s19 }
0x4244   :  { %v2581_v43 = vpop.permute.xlu1 %2580 }
0x4245   :  { %v2586_v11 = vsel %vm64_vm0, %v2581_v43, %v2584_v42 }
0x4246   :  { %2956 = vmatmul.msk.f32.vlgmr.msra.gmra.mxu0 %vm1668_vm2, %v2586_v11 }
0x42c3   :  { %v2607_v32 = vpop.f32.mrf.mxu0 }
0x42c4   :  { %v2608_v53 = vadd.f32 %v4192_v36, %v2607_v32 }
0x42c6   :  { %3226 = vtanh.f32 %v2608_v53  ;;  %v2957_v8 = vmul.f32 -1.442695, %v2608_v53 }
0x42c8   :  { %3228 = vpow2.f32 %v2957_v8 }
0x42cc   :  { %v3227_v2 = vpop.eup %3226 }
0x42cd   :  { %2632 = vrot.lane.b32.xlu0 %v3227_v2, %s3300_s18 }
0x42ce   :  { %v3229_v3 = vpop.eup %3228 }
0x42cf   :  { %v2613_v47 = vadd.f32 1.0, %v3229_v3 }
0x42d1   :  { %3230 = vrcp.f32 %v2613_v47  ;;  %v2625_v52 = vand.u32 2147483648, %v2613_v47  ;;  %vm2619_vm15 = vweird.f32 %v2613_v47  ;;  %v2623_v23 = vand.u32 2147483647, %v2613_v47 }
0x42d3   :  { %v2626_v26 = vor.u32 1.1754944e-38, %v2625_v52  ;;  %vm2624_vm3 = vcmp.eq.f32.partialorder %v2623_v23, 8.507059e+37 }
0x42d7   :  { %v3231_v45 = vpop.eup %3230 }
0x42d8   :  { %v2615_v50 = vmul.f32 %v3231_v45, %v2613_v47  ;;  %vm2620_vm14 = vweird.f32 %v3231_v45 }
0x42d9   :  { %vm2621_vm1 = vmor %vm2619_vm15, %vm2620_vm14  ;;  %vm2172_vm14 = vcmask 1048320  }
0x42da   :  { %v2616_v6 = vsub.f32 1.0, %v2615_v50 }
0x42dc   :  { %v2617_v46 = vmul.f32 %v3231_v45, %v2616_v6 }
0x42de   :  { %v2618_v51 = vadd.f32 %v3231_v45, %v2617_v46 }
0x42e0   :  { %v2622_v1 = vsel %vm2621_vm1, %v3231_v45, %v2618_v51 }
0x42e1   :  { %v2627_v7 = vsel %vm2624_vm3, %v2626_v26, %v2622_v1 }
0x42e2   :  { %v2630_v20 = vmul.f32 %v2627_v7, %v4162_v21 }
0x433f   :  { %v2633_v62 = vpop.permute.xlu0 %2632 }
0x4340   :  { %v2635_v4 = vmul.f32 %v2633_v62, %v2627_v7 }
0x4342   :  { %2637 = vrot.lane.b32.xlu1 %v2635_v4, %s3300_s18 }
0x434a   :  { %2684 = vrot.lane.b32.xlu1 %v2578_v18, %s3302_s26 }
0x43b4   :  { %v2638_v22 = vpop.permute.xlu1 %2637 }
0x43b5   :  { %v4199_v24 = vadd.f32 %v2638_v22, %v2630_v20 }
0x43b7   :  { %3232 = vtanh.f32 %v4199_v24 }
0x43bc   :  { %v2685_v12 = vpop.permute.xlu1 %2684 }
0x43bd   :  { %v3233_v48 = vpop.eup %3232 }
0x43be   :  { %2643 = vrot.lane.b32.xlu2 %v3233_v48, %s3300_s18 }
0x4418   :  { %v2644_v54 = vpop.permute.xlu2 %2643 }
0x4419   :  { %v2646_v55 = vmul.f32 %v2644_v54, %v2627_v7 }
0x441b   :  { %2648 = vrot.lane.b32.xlu0 %v2646_v55, %s3301_s19 }
0x448d   :  { %v2649_v39 = vpop.permute.xlu0 %2648 }
0x448e   :  { %2958 = vmatmul.msk.f32.vlgmr.msrb.gmra.mxu1 %vm64_vm0, %v2649_v39 }
0x450b   :  { %v2669_v21 = vpop.f32.mrf.mxu1 }
0x450c   :  { %v4214_v0 = vadd.f32 %v4211_v25, %v2669_v21 }
0x450e   :  { %v2683_v5 = vsel %vm2682_vm4, %v2679_v63, %v4214_v0 }
0x450f   :  { %v2687_v13 = vsel %vm64_vm0, %v2683_v5, %v2685_v12 }
0x4510   :  { %2960 = vmatmul.msk.f32.vlgmr.msra.gmra.mxu2 %vm1668_vm2, %v2687_v13 }
0x4593   :  { %v2708_v14 = vpop.f32.mrf.mxu2 }
0x4594   :  { %v2709_v15 = vadd.f32 %v4143_v27, %v2708_v14 }
0x4596   :  { %3234 = vtanh.f32 %v2709_v15  ;;  %v2961_v49 = vmul.f32 -1.442695, %v2709_v15 }
0x4598   :  { %3236 = vpow2.f32 %v2961_v49 }
0x459c   :  { %v3235_v10 = vpop.eup %3234 }
0x459d   :  { %2733 = vrot.lane.b32.xlu2 %v3235_v10, %s3300_s18 }
0x459e   :  { %v3237_v60 = vpop.eup %3236 }
0x459f   :  { %v2714_v17 = vadd.f32 1.0, %v3237_v60 }
0x45a1   :  { %3238 = vrcp.f32 %v2714_v17  ;;  %v2726_v29 = vand.u32 2147483648, %v2714_v17  ;;  %vm2720_vm6 = vweird.f32 %v2714_v17  ;;  %v2724_v30 = vand.u32 2147483647, %v2714_v17 }
0x45a3   :  { %v2727_v44 = vor.u32 1.1754944e-38, %v2726_v29  ;;  %vm2725_vm8 = vcmp.eq.f32.partialorder %v2724_v30, 8.507059e+37 }
0x45a7   :  { %v3239_v58 = vpop.eup %3238 }
0x45a8   :  { %v2716_v61 = vmul.f32 %v3239_v58, %v2714_v17  ;;  %vm2721_vm5 = vweird.f32 %v3239_v58 }
0x45a9   :  { %vm2722_vm7 = vmor %vm2720_vm6, %vm2721_vm5 }
0x45aa   :  { %v2717_v16 = vsub.f32 1.0, %v2716_v61 }
0x45ac   :  { %v2718_v37 = vmul.f32 %v3239_v58, %v2717_v16 }
0x45ae   :  { %v2719_v28 = vadd.f32 %v3239_v58, %v2718_v37 }
0x45b0   :  { %v2723_v27 = vsel %vm2722_vm7, %v3239_v58, %v2719_v28 }
0x45b1   :  { %v2728_v34 = vsel %vm2725_vm8, %v2727_v44, %v2723_v27 }
0x45b2   :  { %v2731_v40 = vmul.f32 %v2728_v34, %v4182_v38 }
0x45f7   :  { %v2734_v31 = vpop.permute.xlu2 %2733 }
0x45f8   :  { %v2736_v35 = vmul.f32 %v2734_v31, %v2728_v34 }
0x45fa   :  { %2738 = vrot.lane.b32.xlu0 %v2736_v35, %s3300_s18 }
0x4602   :  { %2752 = vrot.lane.b32.xlu0 %v2646_v55, %s3302_s26 }
0x466c   :  { %v2739_v41 = vpop.permute.xlu0 %2738 }
0x466d   :  { %v2741_v18 = vadd.f32 %v2739_v41, %v2731_v40 }
0x466f   :  { %3240 = vtanh.f32 %v2741_v18 }
0x4674   :  { %v2753_v32 = vpop.permute.xlu0 %2752 }
0x4675   :  { %v3241_v42 = vpop.eup %3240 }
0x4676   :  { %2744 = vrot.lane.b32.xlu1 %v3241_v42, %s3300_s18 }
0x46e8   :  { %v2745_v43 = vpop.permute.xlu1 %2744 }
0x46e9   :  { %v2747_v11 = vmul.f32 %v2745_v43, %v2728_v34 }
0x46eb   :  { %2749 = vrot.lane.b32.xlu2 %v2747_v11, %s3301_s19 }
0x4745   :  { %v2750_v53 = vpop.permute.xlu2 %2749 }
0x4746   :  { %v2755_v2 = vsel %vm64_vm0, %v2750_v53, %v2753_v32 }
0x4747   :  { %2962 = vmatmul.msk.f32.vlgmr.msra.gmra.mxu1 %vm1668_vm2, %v2755_v2 }
0x47c4   :  { %v2776_v8 = vpop.f32.mrf.mxu1 }
0x47c5   :  { %v2777_v3 = vadd.f32 %v4192_v36, %v2776_v8 }
0x47c7   :  { %3242 = vtanh.f32 %v2777_v3  ;;  %v2963_v47 = vmul.f32 -1.442695, %v2777_v3 }
0x47c9   :  { %3244 = vpow2.f32 %v2963_v47 }
0x47cd   :  { %v3243_v38 = vpop.eup %3242 }
0x47ce   :  { %2801 = vrot.lane.b32.xlu1 %v3243_v38, %s3300_s18 }
0x47cf   :  { %v3245_v45 = vpop.eup %3244 }
0x47d0   :  { %v2782_v50 = vadd.f32 1.0, %v3245_v45 }
0x47d2   :  { %3246 = vrcp.f32 %v2782_v50  ;;  %v2794_v1 = vand.u32 2147483648, %v2782_v50  ;;  %vm2788_vm2 = vweird.f32 %v2782_v50  ;;  %v2792_v26 = vand.u32 2147483647, %v2782_v50 }
0x47d4   :  { %v2795_v62 = vor.u32 1.1754944e-38, %v2794_v1  ;;  %vm2793_vm11 = vcmp.eq.f32.partialorder %v2792_v26, 8.507059e+37 }
0x47d8   :  { %v3247_v6 = vpop.eup %3246 }
0x47d9   :  { %v2784_v46 = vmul.f32 %v3247_v6, %v2782_v50  ;;  %vm2789_vm9 = vweird.f32 %v3247_v6 }
0x47da   :  { %vm2790_vm10 = vmor %vm2788_vm2, %vm2789_vm9 }
0x47db   :  { %v2785_v51 = vsub.f32 1.0, %v2784_v46 }
0x47dd   :  { %v2786_v52 = vmul.f32 %v3247_v6, %v2785_v51 }
0x47df   :  { %v2787_v23 = vadd.f32 %v3247_v6, %v2786_v52 }
0x47e1   :  { %v2791_v36 = vsel %vm2790_vm10, %v3247_v6, %v2787_v23 }
0x47e2   :  { %v2796_v4 = vsel %vm2793_vm11, %v2795_v62, %v2791_v36 }
0x47e3   :  { %v2799_v22 = vmul.f32 %v2796_v4, %v4199_v24 }
0x4840   :  { %v2802_v7 = vpop.permute.xlu1 %2801 }
0x4841   :  { %v2804_v20 = vmul.f32 %v2802_v7, %v2796_v4 }
0x4843   :  { %2806 = vrot.lane.b32.xlu2 %v2804_v20, %s3300_s18 }
0x484b   :  { %1829 = vrot.lane.b32.xlu2 %v3974_v59, %s3300_s18 }
0x4853   :  { %2673 = vrot.lane.b32.xlu2 %v4214_v0, %s3301_s19 }
0x489d   :  { %v2807_v48 = vpop.permute.xlu2 %2806 }
0x489e   :  { %v2809_v54 = vadd.f32 %v2807_v48, %v2799_v22 }
0x48a0   :  { %3248 = vtanh.f32 %v2809_v54 }
0x48a5   :  { %v1830_v55 = vpop.permute.xlu2 %1829 }
0x48a6   :  { %v3249_v39 = vpop.eup %3248  ;;  %1833 = vst.msk [vmem:[%s4278_s10] sm:$0xff] %vm1832_vm12, %v1830_v55 }
0x48a7   :  { %2812 = vrot.lane.b32.xlu0 %v3249_v39, %s3300_s18 }
0x48ad   :  { %v2674_v21 = vpop.permute.xlu2 %2673 }
0x48af   :  { %2504 = vrot.lane.b32.xlu0 %v4172_v57, %s3300_s18 }
0x48b7   :  { %1629 = vrot.lane.b32.xlu0 %v3886_v19, %s3301_s19 }
0x4919   :  { %v2813_v59 = vpop.permute.xlu0 %2812 }
0x491a   :  { %v2815_v24 = vmul.f32 %v2813_v59, %v2796_v4 }
0x491c   :  { %2817 = vrot.lane.b32.xlu1 %v2815_v24, %s3301_s19 }
0x4921   :  { %v2505_v56 = vpop.permute.xlu0 %2504 }
0x4922   :  { %2507 = vst.msk [vmem:[%s4278_s10 + $0x8] sm:$0xff] %vm1832_vm12, %v2505_v56 }
0x4923   :  { %2676 = vst.msk [vmem:[%s4278_s10 + $0x8] sm:$0xff] %vm2002_vm13, %v2674_v21 }
0x4924   :  { %1999 = vrot.lane.b32.xlu1 %v4026_v33, %s3301_s19 }
0x4929   :  { %v1630_v57 = vpop.permute.xlu0 %1629 }
0x492a   :  { %1632 = vst.msk [vmem:[#allocation3 + $0x48] sm:$0xff] %vm64_vm0, %v1630_v57 }
0x492c   :  { %2169 = vrot.lane.b32.xlu1 %v4074_v9, %s3302_s26 }
0x498e   :  { %v2818_v19 = vpop.permute.xlu1 %2817 }
0x498f   :  { %2964 = vmatmul.msk.f32.vlgmr.msrb.gmra.mxu3 %vm64_vm0, %v2818_v19 }
0x4996   :  { %v2000_v63 = vpop.permute.xlu1 %1999 }
0x4997   :  { %2003 = vst.msk [vmem:[%s4278_s10] sm:$0xff] %vm2002_vm13, %v2000_v63 }
0x499e   :  { %v2170_v0 = vpop.permute.xlu1 %2169 }
0x499f   :  { %2173 = vst.msk [vmem:[%s4278_s10] sm:$0xff] %vm2172_vm14, %v2170_v0 }
0x4a12   :  { %v2838_v33 = vpop.f32.mrf.mxu3 }
0x4a13   :  { %v2839_v12 = vadd.f32 %v4211_v25, %v2838_v33 }
0x4a15   :  { %2842 = vrot.lane.b32.xlu2 %v2839_v12, %s3302_s26 }
0x4a6f   :  { %v2843_v9 = vpop.permute.xlu2 %2842 }
0x4a70   :  { %2845 = vst.msk [vmem:[%s4278_s10 + $0x8] sm:$0xff] %vm2172_vm14, %v2843_v9 }
0x4a71   :  { %2850 = vsyncpa [#allocation5], 1 }
0x4a72   :  { %2851 = vsyncpa [#allocation6], 1 }

</bundles_post_ra>
